<compile_context>
chip_gen: v7x
topology: tpu7x:2x2x1
jax: 0.10.0
libtpu: 0.0.40
codegen_flags: <defaults>
</compile_context>

<pallas_src>
from functools import partial

import jax
import jax.numpy as jnp
from jax.experimental import pallas as pl
from jax.experimental.pallas import tpu as pltpu

_LANE = 128


def _round_up(v, m):
    return (v + m - 1) // m * m


# -----------------------------------------------------------------------------
# Fused [optional 2x2 max-pool] / [optional prev-layer BN+ReLU] + Conv3x3(pad=1)
# + bias + per-image BN sufficient statistics.
# One grid step == one image (batch axis is "parallel").
# -----------------------------------------------------------------------------
def _conv_bn_stats_kernel(x_ref, w_ref, b_ref, sc_ref, sh_ref, y_ref, st_ref,
                          xp_ref, *, do_pool, pre_act, row_chunk):
    # x_ref : (1, 2, 2, H, W, Cin) bf16 when do_pool else (1, H, W, Cin) bf16
    # w_ref : (3, 3, Cin, Cout)    bf16 (channel-padded, lane-dense)
    # b_ref : (1, Cout)            f32  conv bias
    # sc_ref, sh_ref : (1, Cin)    f32  previous layer's BN scale/shift
    # y_ref : (1, H, W, Cout)      bf16 pre-BN conv output
    # st_ref: (1, 2, Cout)         f32  per-image [sum, sum of squares]
    # xp_ref: (H+2, W+2, Cin)      bf16 VMEM scratch: zero-padded input
    H, W, Cout = y_ref.shape[1], y_ref.shape[2], y_ref.shape[3]
    Cin = xp_ref.shape[2]

    # ---- load input tile (fused 2x2 max-pool for the first layer) -----------
    if do_pool:
        # Leading dims (2, 2) were split out by the wrapper; pooling is a
        # 4-way elementwise max of statically indexed slabs (no strided access).
        x = jnp.maximum(jnp.maximum(x_ref[0, 0, 0], x_ref[0, 0, 1]),
                        jnp.maximum(x_ref[0, 1, 0], x_ref[0, 1, 1]))
    else:
        x = x_ref[0]                                               # (H, W, Cin)

    # ---- fused previous-layer BatchNorm (affine) + ReLU ----------------------
    if pre_act:
        sc = sc_ref[...].reshape(1, 1, Cin)
        sh = sh_ref[...].reshape(1, 1, Cin)
        x = jnp.maximum(x.astype(jnp.float32) * sc + sh, 0.0).astype(jnp.bfloat16)

    # ---- in-kernel zero padding (padding=1) into VMEM scratch ----------------
    xp_ref[...] = jnp.zeros_like(xp_ref)
    xp_ref[1:H + 1, 1:W + 1, :] = x

    bias = b_ref[...]                                              # (1, Cout) f32

    # ---- 3x3 conv as 9 lane-dense MXU matmuls, row-chunked accumulation ------
    s_acc = jnp.zeros((1, Cout), jnp.float32)
    ss_acc = jnp.zeros((1, Cout), jnp.float32)
    for r0 in range(0, H, row_chunk):
        th = min(row_chunk, H - r0)
        acc = jnp.zeros((th * W, Cout), jnp.float32)
        for dy in range(3):
            for dx in range(3):
                patch = xp_ref[r0 + dy:r0 + dy + th, dx:dx + W, :]  # (th, W, Cin)
                acc = acc + jnp.dot(patch.reshape(th * W, Cin), w_ref[dy, dx],
                                    preferred_element_type=jnp.float32)
        acc = acc + bias                                           # conv bias
        # one-pass BN sufficient statistics (from the f32 accumulator)
        s_acc = s_acc + jnp.sum(acc, axis=0, keepdims=True)
        ss_acc = ss_acc + jnp.sum(acc * acc, axis=0, keepdims=True)
        y_ref[0, r0:r0 + th, :, :] = acc.reshape(th, W, Cout).astype(y_ref.dtype)

    st_ref[0, 0:1, :] = s_acc
    st_ref[0, 1:2, :] = ss_acc


def _conv_layer(x, w, bias, scale_in, shift_in, *, do_pool, pre_act):
    if do_pool:
        N = x.shape[0]
        H, W, Cin = x.shape[3], x.shape[4], x.shape[5]
        x_spec = pl.BlockSpec((1, 2, 2, H, W, Cin), lambda n: (n, 0, 0, 0, 0, 0))
        in_elems = 4 * H * W * Cin
    else:
        N, H, W, Cin = x.shape
        x_spec = pl.BlockSpec((1, H, W, Cin), lambda n: (n, 0, 0, 0))
        in_elems = H * W * Cin
    Cout = w.shape[-1]

    # bound the live f32 accumulator to ~2 MiB, but at most 16 unrolled chunks
    row_chunk = max(1, (2 * 1024 * 1024) // (W * Cout * 4))
    row_chunk = min(max(row_chunk, -(-H // 16)), H)

    flops = 2 * N * H * W * 9 * Cin * Cout
    bytes_accessed = (N * in_elems * 2 + 9 * Cin * Cout * 2
                      + N * H * W * Cout * 2 + N * 2 * Cout * 4)
    vmem_bytes = (2 * in_elems * 2                 # input block (double-buffered)
                  + 2 * 9 * Cin * Cout * 2         # weights
                  + 2 * H * W * Cout * 2           # output block (double-buffered)
                  + (H + 2) * (W + 2) * Cin * 2    # padded-input scratch
                  + 3 * row_chunk * W * Cout * 4   # accumulator headroom
                  + (2 << 20))
    vmem_limit = int(min(56 << 20, max(32 << 20, vmem_bytes)))   # v7x-safe cap

    kernel = partial(_conv_bn_stats_kernel, do_pool=do_pool, pre_act=pre_act,
                     row_chunk=row_chunk)
    y, stats = pl.pallas_call(
        kernel,
        out_shape=(jax.ShapeDtypeStruct((N, H, W, Cout), jnp.bfloat16),
                   jax.ShapeDtypeStruct((N, 2, Cout), jnp.float32)),
        grid_spec=pltpu.PrefetchScalarGridSpec(
            num_scalar_prefetch=0,
            grid=(N,),
            in_specs=[
                x_spec,
                pl.BlockSpec((3, 3, Cin, Cout), lambda n: (0, 0, 0, 0)),
                pl.BlockSpec((1, Cout), lambda n: (0, 0)),
                pl.BlockSpec((1, Cin), lambda n: (0, 0)),
                pl.BlockSpec((1, Cin), lambda n: (0, 0)),
            ],
            out_specs=(
                pl.BlockSpec((1, H, W, Cout), lambda n: (n, 0, 0, 0)),
                pl.BlockSpec((1, 2, Cout), lambda n: (n, 0, 0)),
            ),
            scratch_shapes=[pltpu.VMEM((H + 2, W + 2, Cin), jnp.bfloat16)],
        ),
        compiler_params=pltpu.CompilerParams(
            dimension_semantics=("parallel",),
            vmem_limit_bytes=vmem_limit),
        cost_estimate=pl.CostEstimate(flops=flops, transcendentals=0,
                                      bytes_accessed=bytes_accessed),
    )(x, w, bias, scale_in, shift_in)
    return y, stats


# -----------------------------------------------------------------------------
# Final BatchNorm (affine with batch stats) + ReLU for the last layer.
# -----------------------------------------------------------------------------
def _bn_relu_kernel(y_ref, sc_ref, sh_ref, o_ref):
    C = y_ref.shape[3]
    sc = sc_ref[...].reshape(1, 1, 1, C)
    sh = sh_ref[...].reshape(1, 1, 1, C)
    o_ref[...] = jnp.maximum(y_ref[...].astype(jnp.float32) * sc + sh, 0.0)


def _bn_relu(y, scale, shift):
    N, H, W, C = y.shape
    vmem_limit = int(min(56 << 20, max(32 << 20, 6 * H * W * C * 4)))
    return pl.pallas_call(
        _bn_relu_kernel,
        out_shape=jax.ShapeDtypeStruct((N, H, W, C), jnp.float32),
        grid_spec=pltpu.PrefetchScalarGridSpec(
            num_scalar_prefetch=0,
            grid=(N,),
            in_specs=[pl.BlockSpec((1, H, W, C), lambda n: (n, 0, 0, 0)),
                      pl.BlockSpec((1, C), lambda n: (0, 0)),
                      pl.BlockSpec((1, C), lambda n: (0, 0))],
            out_specs=pl.BlockSpec((1, H, W, C), lambda n: (n, 0, 0, 0)),
        ),
        compiler_params=pltpu.CompilerParams(
            dimension_semantics=("parallel",),
            vmem_limit_bytes=vmem_limit),
        cost_estimate=pl.CostEstimate(flops=2 * N * H * W * C, transcendentals=0,
                                      bytes_accessed=N * H * W * C * (2 + 4)),
    )(y, scale, shift)


# -----------------------------------------------------------------------------
# BatchNorm finalize (tiny JAX glue): sums -> mean/var -> per-channel affine.
# Training-mode semantics (PyTorch default): batch statistics, biased variance.
# -----------------------------------------------------------------------------
def _finalize_bn(stats, gamma, beta, *, count, eps):
    s = jnp.sum(stats[:, 0, :], axis=0)
    ss = jnp.sum(stats[:, 1, :], axis=0)
    mean = s / count
    var = jnp.maximum(ss / count - mean * mean, 0.0)
    inv = jax.lax.rsqrt(var + eps)
    scale = gamma * inv
    shift = beta - mean * scale
    return scale.reshape(1, -1), shift.reshape(1, -1)


# -----------------------------------------------------------------------------
# DownBlock forward
# -----------------------------------------------------------------------------
def init_down_block_params(key, in_channels, out_channels, nb_Conv):
    params = []
    cin = in_channels
    for i in range(nb_Conv):
        kw, kb = jax.random.split(jax.random.fold_in(key, i))
        w = 0.1 * jax.random.normal(kw, (3, 3, cin, out_channels), jnp.float32)  # HWIO
        b = 0.1 * jax.random.normal(kb, (out_channels,), jnp.float32)
        gamma = jnp.ones((out_channels,), jnp.float32)   # BN weight init (PyTorch)
        beta = jnp.zeros((out_channels,), jnp.float32)   # BN bias init (PyTorch)
        params.append((w, b, gamma, beta))
        cin = out_channels
    return params


def down_block_forward(x_nchw, params, *, eps=1e-5):
    N, Cin, _, _ = x_nchw.shape
    cp_in = _round_up(Cin, _LANE)

    # NCHW (PyTorch) -> NHWC, pad channels to a lane-dense multiple of 128, bf16
    x = jnp.transpose(x_nchw, (0, 2, 3, 1))
    x = jnp.pad(x, ((0, 0), (0, 0), (0, 0), (0, cp_in - Cin))).astype(jnp.bfloat16)

    # identity "previous-layer" normalization for layer 0
    scale = jnp.ones((1, cp_in), jnp.float32)
    shift = jnp.zeros((1, cp_in), jnp.float32)

    cur = x
    for li, (w, b, gamma, beta) in enumerate(params):
        cin, cout = w.shape[2], w.shape[3]
        cpi, cpo = _round_up(cin, _LANE), _round_up(cout, _LANE)
        wp = jnp.pad(w, ((0, 0), (0, 0), (0, cpi - cin), (0, cpo - cout)))
        wp = wp.astype(jnp.bfloat16)
        bp = jnp.pad(b, (0, cpo - cout)).reshape(1, cpo).astype(jnp.float32)
        gp = jnp.pad(gamma, (0, cpo - cout))
        bep = jnp.pad(beta, (0, cpo - cout))

        if li == 0:
            # MaxPool2d(2): regroup (N, 2H, 2W, C) -> (N, 2, 2, H, W, C) with an
            # XLA reshape/transpose (layout plumbing); the 4-way max runs inside
            # the conv kernel on statically indexed leading dims.
            Nc, Hc, Wc, Cc = cur.shape
            H, W = Hc // 2, Wc // 2
            xin = cur[:, :2 * H, :2 * W, :].reshape(Nc, H, 2, W, 2, Cc)
            xin = jnp.transpose(xin, (0, 2, 4, 1, 3, 5))   # (N, 2, 2, H, W, C)
            y, stats = _conv_layer(xin, wp, bp, scale, shift,
                                   do_pool=True, pre_act=False)
        else:
            y, stats = _conv_layer(cur, wp, bp, scale, shift,
                                   do_pool=False, pre_act=True)

        Hh, Ww = y.shape[1], y.shape[2]
        scale, shift = _finalize_bn(stats, gp, bep,
                                    count=y.shape[0] * Hh * Ww, eps=eps)
        cur = y

    out = _bn_relu(cur, scale, shift)                # (N, H, W, Cp) f32
    cout_last = params[-1][0].shape[3]
    out = out[..., :cout_last]                       # drop channel padding
    return jnp.transpose(out, (0, 3, 1, 2))          # NHWC -> NCHW


if __name__ == "__main__":
    key = jax.random.PRNGKey(0)
    k_x, k_p = jax.random.split(key)

    # DownBlock(in_channels=4, out_channels=8, nb_Conv=2); input (2, 4, 16, 16) NCHW
    in_channels, out_channels, nb_Conv = 4, 8, 2
    x = jax.random.normal(k_x, (2, in_channels, 16, 16), jnp.float32)
    params = init_down_block_params(k_p, in_channels, out_channels, nb_Conv)

    out = jax.jit(down_block_forward)(x, params)
    out = jax.block_until_ready(out)
    assert out.shape == (2, out_channels, 8, 8), out.shape
    print("KERNEL_OK")
</pallas_src>

<mosaic_0001>
module attributes {stable_mosaic.version = 11 : i64} {
  func.func @_conv_bn_stats_kernel(%arg0: i32, %arg1: memref<1x2x2x8x8x128xbf16, #tpu.memory_space<vmem>>, %arg2: memref<3x3x128x128xbf16, #tpu.memory_space<vmem>>, %arg3: memref<1x128xf32, #tpu.memory_space<vmem>>, %arg4: memref<1x128xf32, #tpu.memory_space<vmem>>, %arg5: memref<1x128xf32, #tpu.memory_space<vmem>>, %arg6: memref<1x8x8x128xbf16, #tpu.memory_space<vmem>>, %arg7: memref<1x2x128xf32, #tpu.memory_space<vmem>>, %arg8: memref<10x10x128xbf16, #tpu.memory_space<vmem>>) attributes {dimension_semantics = [#tpu.dimension_semantics<parallel>], iteration_bounds = array<i64: 2>, scalar_prefetch = 0 : i64, scratch_operands = 1 : i64, tpu.core_type = #tpu.core_type<tc>, window_params = [{transform_indices = @transform_0, window_bounds = array<i64: 1, 2, 2, 8, 8, 128>}, {pipeline_mode = #tpu.pipeline_mode<synchronous>, transform_indices = @transform_1, window_bounds = array<i64: 3, 3, 128, 128>}, {pipeline_mode = #tpu.pipeline_mode<synchronous>, transform_indices = @transform_2, window_bounds = array<i64: 1, 128>}, {pipeline_mode = #tpu.pipeline_mode<synchronous>, transform_indices = @transform_3, window_bounds = array<i64: 1, 128>}, {pipeline_mode = #tpu.pipeline_mode<synchronous>, transform_indices = @transform_4, window_bounds = array<i64: 1, 128>}, {transform_indices = @transform_5, window_bounds = array<i64: 1, 8, 8, 128>}, {transform_indices = @transform_6, window_bounds = array<i64: 1, 2, 128>}]} {
    %c0 = arith.constant 0 : index
    %c0_0 = arith.constant 0 : index
    %c0_1 = arith.constant 0 : index
    %c0_2 = arith.constant 0 : index
    %c0_3 = arith.constant 0 : index
    %c0_4 = arith.constant 0 : index
    %0 = vector.load %arg1[%c0, %c0_0, %c0_1, %c0_2, %c0_3, %c0_4] : memref<1x2x2x8x8x128xbf16, #tpu.memory_space<vmem>>, vector<1x1x1x8x8x128xbf16>
    %1 = vector.shape_cast %0 : vector<1x1x1x8x8x128xbf16> to vector<8x8x128xbf16>
    %c0_5 = arith.constant 0 : index
    %c0_6 = arith.constant 0 : index
    %c1 = arith.constant 1 : index
    %c0_7 = arith.constant 0 : index
    %c0_8 = arith.constant 0 : index
    %c0_9 = arith.constant 0 : index
    %2 = vector.load %arg1[%c0_5, %c0_6, %c1, %c0_7, %c0_8, %c0_9] : memref<1x2x2x8x8x128xbf16, #tpu.memory_space<vmem>>, vector<1x1x1x8x8x128xbf16>
    %3 = vector.shape_cast %2 : vector<1x1x1x8x8x128xbf16> to vector<8x8x128xbf16>
    %4 = arith.maximumf %1, %3 : vector<8x8x128xbf16>
    %c0_10 = arith.constant 0 : index
    %c1_11 = arith.constant 1 : index
    %c0_12 = arith.constant 0 : index
    %c0_13 = arith.constant 0 : index
    %c0_14 = arith.constant 0 : index
    %c0_15 = arith.constant 0 : index
    %5 = vector.load %arg1[%c0_10, %c1_11, %c0_12, %c0_13, %c0_14, %c0_15] : memref<1x2x2x8x8x128xbf16, #tpu.memory_space<vmem>>, vector<1x1x1x8x8x128xbf16>
    %6 = vector.shape_cast %5 : vector<1x1x1x8x8x128xbf16> to vector<8x8x128xbf16>
    %c0_16 = arith.constant 0 : index
    %c1_17 = arith.constant 1 : index
    %c1_18 = arith.constant 1 : index
    %c0_19 = arith.constant 0 : index
    %c0_20 = arith.constant 0 : index
    %c0_21 = arith.constant 0 : index
    %7 = vector.load %arg1[%c0_16, %c1_17, %c1_18, %c0_19, %c0_20, %c0_21] : memref<1x2x2x8x8x128xbf16, #tpu.memory_space<vmem>>, vector<1x1x1x8x8x128xbf16>
    %8 = vector.shape_cast %7 : vector<1x1x1x8x8x128xbf16> to vector<8x8x128xbf16>
    %9 = arith.maximumf %6, %8 : vector<8x8x128xbf16>
    %10 = arith.maximumf %4, %9 : vector<8x8x128xbf16>
    %cst = arith.constant 0.000000e+00 : bf16
    %11 = vector.broadcast %cst : bf16 to vector<10x10x128xbf16>
    %c0_22 = arith.constant 0 : index
    %c0_23 = arith.constant 0 : index
    %c0_24 = arith.constant 0 : index
    %12 = vector.load %arg8[%c0_22, %c0_23, %c0_24] : memref<10x10x128xbf16, #tpu.memory_space<vmem>>, vector<10x10x128xbf16>
    tpu.vector_store %arg8[%c0_22, %c0_23, %c0_24], %11 {strides = array<i32>} : memref<10x10x128xbf16, #tpu.memory_space<vmem>>, vector<10x10x128xbf16>,
    %c1_25 = arith.constant 1 : index
    %c1_26 = arith.constant 1 : index
    %c0_27 = arith.constant 0 : index
    %13 = vector.load %arg8[%c1_25, %c1_26, %c0_27] : memref<10x10x128xbf16, #tpu.memory_space<vmem>>, vector<8x8x128xbf16>
    tpu.vector_store %arg8[%c1_25, %c1_26, %c0_27], %10 {strides = array<i32>} : memref<10x10x128xbf16, #tpu.memory_space<vmem>>, vector<8x8x128xbf16>,
    %c0_28 = arith.constant 0 : index
    %c0_29 = arith.constant 0 : index
    %14 = vector.load %arg3[%c0_28, %c0_29] : memref<1x128xf32, #tpu.memory_space<vmem>>, vector<1x128xf32>
    %cst_30 = arith.constant 0.000000e+00 : f32
    %15 = vector.broadcast %cst_30 : f32 to vector<1x128xf32>
    %cst_31 = arith.constant 0.000000e+00 : f32
    %16 = vector.broadcast %cst_31 : f32 to vector<1x128xf32>
    %cst_32 = arith.constant 0.000000e+00 : f32
    %17 = vector.broadcast %cst_32 : f32 to vector<64x128xf32>
    %c0_33 = arith.constant 0 : index
    %c0_34 = arith.constant 0 : index
    %c0_35 = arith.constant 0 : index
    %18 = vector.load %arg8[%c0_33, %c0_34, %c0_35] : memref<10x10x128xbf16, #tpu.memory_space<vmem>>, vector<8x8x128xbf16>
    %19 = vector.shape_cast %18 : vector<8x8x128xbf16> to vector<64x128xbf16>
    %c0_36 = arith.constant 0 : index
    %c0_37 = arith.constant 0 : index
    %c0_38 = arith.constant 0 : index
    %c0_39 = arith.constant 0 : index
    %20 = vector.load %arg2[%c0_36, %c0_37, %c0_38, %c0_39] : memref<3x3x128x128xbf16, #tpu.memory_space<vmem>>, vector<1x1x128x128xbf16>
    %21 = vector.shape_cast %20 : vector<1x1x128x128xbf16> to vector<128x128xbf16>
    %cst_40 = arith.constant dense<0.000000e+00> : vector<64x128xf32>
    %22 = tpu.matmul %19, %21, %cst_40 {dimension_numbers = #tpu.dot_dimension_numbers<[1], [0], [0], [1], [0, 0, 1, 1], [], []>} : vector<64x128xbf16>, vector<128x128xbf16>, vector<64x128xf32> -> vector<64x128xf32>
    %23 = arith.addf %17, %22 : vector<64x128xf32>
    %c0_41 = arith.constant 0 : index
    %c1_42 = arith.constant 1 : index
    %c0_43 = arith.constant 0 : index
    %24 = vector.load %arg8[%c0_41, %c1_42, %c0_43] : memref<10x10x128xbf16, #tpu.memory_space<vmem>>, vector<8x8x128xbf16>
    %25 = vector.shape_cast %24 : vector<8x8x128xbf16> to vector<64x128xbf16>
    %c0_44 = arith.constant 0 : index
    %c1_45 = arith.constant 1 : index
    %c0_46 = arith.constant 0 : index
    %c0_47 = arith.constant 0 : index
    %26 = vector.load %arg2[%c0_44, %c1_45, %c0_46, %c0_47] : memref<3x3x128x128xbf16, #tpu.memory_space<vmem>>, vector<1x1x128x128xbf16>
    %27 = vector.shape_cast %26 : vector<1x1x128x128xbf16> to vector<128x128xbf16>
    %cst_48 = arith.constant dense<0.000000e+00> : vector<64x128xf32>
    %28 = tpu.matmul %25, %27, %cst_48 {dimension_numbers = #tpu.dot_dimension_numbers<[1], [0], [0], [1], [0, 0, 1, 1], [], []>} : vector<64x128xbf16>, vector<128x128xbf16>, vector<64x128xf32> -> vector<64x128xf32>
    %29 = arith.addf %23, %28 : vector<64x128xf32>
    %c0_49 = arith.constant 0 : index
    %c2 = arith.constant 2 : index
    %c0_50 = arith.constant 0 : index
    %30 = vector.load %arg8[%c0_49, %c2, %c0_50] : memref<10x10x128xbf16, #tpu.memory_space<vmem>>, vector<8x8x128xbf16>
    %31 = vector.shape_cast %30 : vector<8x8x128xbf16> to vector<64x128xbf16>
    %c0_51 = arith.constant 0 : index
    %c2_52 = arith.constant 2 : index
    %c0_53 = arith.constant 0 : index
    %c0_54 = arith.constant 0 : index
    %32 = vector.load %arg2[%c0_51, %c2_52, %c0_53, %c0_54] : memref<3x3x128x128xbf16, #tpu.memory_space<vmem>>, vector<1x1x128x128xbf16>
    %33 = vector.shape_cast %32 : vector<1x1x128x128xbf16> to vector<128x128xbf16>
    %cst_55 = arith.constant dense<0.000000e+00> : vector<64x128xf32>
    %34 = tpu.matmul %31, %33, %cst_55 {dimension_numbers = #tpu.dot_dimension_numbers<[1], [0], [0], [1], [0, 0, 1, 1], [], []>} : vector<64x128xbf16>, vector<128x128xbf16>, vector<64x128xf32> -> vector<64x128xf32>
    %35 = arith.addf %29, %34 : vector<64x128xf32>
    %c1_56 = arith.constant 1 : index
    %c0_57 = arith.constant 0 : index
    %c0_58 = arith.constant 0 : index
    %36 = vector.load %arg8[%c1_56, %c0_57, %c0_58] : memref<10x10x128xbf16, #tpu.memory_space<vmem>>, vector<8x8x128xbf16>
    %37 = vector.shape_cast %36 : vector<8x8x128xbf16> to vector<64x128xbf16>
    %c1_59 = arith.constant 1 : index
    %c0_60 = arith.constant 0 : index
    %c0_61 = arith.constant 0 : index
    %c0_62 = arith.constant 0 : index
    %38 = vector.load %arg2[%c1_59, %c0_60, %c0_61, %c0_62] : memref<3x3x128x128xbf16, #tpu.memory_space<vmem>>, vector<1x1x128x128xbf16>
    %39 = vector.shape_cast %38 : vector<1x1x128x128xbf16> to vector<128x128xbf16>
    %cst_63 = arith.constant dense<0.000000e+00> : vector<64x128xf32>
    %40 = tpu.matmul %37, %39, %cst_63 {dimension_numbers = #tpu.dot_dimension_numbers<[1], [0], [0], [1], [0, 0, 1, 1], [], []>} : vector<64x128xbf16>, vector<128x128xbf16>, vector<64x128xf32> -> vector<64x128xf32>
    %41 = arith.addf %35, %40 : vector<64x128xf32>
    %c1_64 = arith.constant 1 : index
    %c1_65 = arith.constant 1 : index
    %c0_66 = arith.constant 0 : index
    %42 = vector.load %arg8[%c1_64, %c1_65, %c0_66] : memref<10x10x128xbf16, #tpu.memory_space<vmem>>, vector<8x8x128xbf16>
    %43 = vector.shape_cast %42 : vector<8x8x128xbf16> to vector<64x128xbf16>
    %c1_67 = arith.constant 1 : index
    %c1_68 = arith.constant 1 : index
    %c0_69 = arith.constant 0 : index
    %c0_70 = arith.constant 0 : index
    %44 = vector.load %arg2[%c1_67, %c1_68, %c0_69, %c0_70] : memref<3x3x128x128xbf16, #tpu.memory_space<vmem>>, vector<1x1x128x128xbf16>
    %45 = vector.shape_cast %44 : vector<1x1x128x128xbf16> to vector<128x128xbf16>
    %cst_71 = arith.constant dense<0.000000e+00> : vector<64x128xf32>
    %46 = tpu.matmul %43, %45, %cst_71 {dimension_numbers = #tpu.dot_dimension_numbers<[1], [0], [0], [1], [0, 0, 1, 1], [], []>} : vector<64x128xbf16>, vector<128x128xbf16>, vector<64x128xf32> -> vector<64x128xf32>
    %47 = arith.addf %41, %46 : vector<64x128xf32>
    %c1_72 = arith.constant 1 : index
    %c2_73 = arith.constant 2 : index
    %c0_74 = arith.constant 0 : index
    %48 = vector.load %arg8[%c1_72, %c2_73, %c0_74] : memref<10x10x128xbf16, #tpu.memory_space<vmem>>, vector<8x8x128xbf16>
    %49 = vector.shape_cast %48 : vector<8x8x128xbf16> to vector<64x128xbf16>
    %c1_75 = arith.constant 1 : index
    %c2_76 = arith.constant 2 : index
    %c0_77 = arith.constant 0 : index
    %c0_78 = arith.constant 0 : index
    %50 = vector.load %arg2[%c1_75, %c2_76, %c0_77, %c0_78] : memref<3x3x128x128xbf16, #tpu.memory_space<vmem>>, vector<1x1x128x128xbf16>
    %51 = vector.shape_cast %50 : vector<1x1x128x128xbf16> to vector<128x128xbf16>
    %cst_79 = arith.constant dense<0.000000e+00> : vector<64x128xf32>
    %52 = tpu.matmul %49, %51, %cst_79 {dimension_numbers = #tpu.dot_dimension_numbers<[1], [0], [0], [1], [0, 0, 1, 1], [], []>} : vector<64x128xbf16>, vector<128x128xbf16>, vector<64x128xf32> -> vector<64x128xf32>
    %53 = arith.addf %47, %52 : vector<64x128xf32>
    %c2_80 = arith.constant 2 : index
    %c0_81 = arith.constant 0 : index
    %c0_82 = arith.constant 0 : index
    %54 = vector.load %arg8[%c2_80, %c0_81, %c0_82] : memref<10x10x128xbf16, #tpu.memory_space<vmem>>, vector<8x8x128xbf16>
    %55 = vector.shape_cast %54 : vector<8x8x128xbf16> to vector<64x128xbf16>
    %c2_83 = arith.constant 2 : index
    %c0_84 = arith.constant 0 : index
    %c0_85 = arith.constant 0 : index
    %c0_86 = arith.constant 0 : index
    %56 = vector.load %arg2[%c2_83, %c0_84, %c0_85, %c0_86] : memref<3x3x128x128xbf16, #tpu.memory_space<vmem>>, vector<1x1x128x128xbf16>
    %57 = vector.shape_cast %56 : vector<1x1x128x128xbf16> to vector<128x128xbf16>
    %cst_87 = arith.constant dense<0.000000e+00> : vector<64x128xf32>
    %58 = tpu.matmul %55, %57, %cst_87 {dimension_numbers = #tpu.dot_dimension_numbers<[1], [0], [0], [1], [0, 0, 1, 1], [], []>} : vector<64x128xbf16>, vector<128x128xbf16>, vector<64x128xf32> -> vector<64x128xf32>
    %59 = arith.addf %53, %58 : vector<64x128xf32>
    %c2_88 = arith.constant 2 : index
    %c1_89 = arith.constant 1 : index
    %c0_90 = arith.constant 0 : index
    %60 = vector.load %arg8[%c2_88, %c1_89, %c0_90] : memref<10x10x128xbf16, #tpu.memory_space<vmem>>, vector<8x8x128xbf16>
    %61 = vector.shape_cast %60 : vector<8x8x128xbf16> to vector<64x128xbf16>
    %c2_91 = arith.constant 2 : index
    %c1_92 = arith.constant 1 : index
    %c0_93 = arith.constant 0 : index
    %c0_94 = arith.constant 0 : index
    %62 = vector.load %arg2[%c2_91, %c1_92, %c0_93, %c0_94] : memref<3x3x128x128xbf16, #tpu.memory_space<vmem>>, vector<1x1x128x128xbf16>
    %63 = vector.shape_cast %62 : vector<1x1x128x128xbf16> to vector<128x128xbf16>
    %cst_95 = arith.constant dense<0.000000e+00> : vector<64x128xf32>
    %64 = tpu.matmul %61, %63, %cst_95 {dimension_numbers = #tpu.dot_dimension_numbers<[1], [0], [0], [1], [0, 0, 1, 1], [], []>} : vector<64x128xbf16>, vector<128x128xbf16>, vector<64x128xf32> -> vector<64x128xf32>
    %65 = arith.addf %59, %64 : vector<64x128xf32>
    %c2_96 = arith.constant 2 : index
    %c2_97 = arith.constant 2 : index
    %c0_98 = arith.constant 0 : index
    %66 = vector.load %arg8[%c2_96, %c2_97, %c0_98] : memref<10x10x128xbf16, #tpu.memory_space<vmem>>, vector<8x8x128xbf16>
    %67 = vector.shape_cast %66 : vector<8x8x128xbf16> to vector<64x128xbf16>
    %c2_99 = arith.constant 2 : index
    %c2_100 = arith.constant 2 : index
    %c0_101 = arith.constant 0 : index
    %c0_102 = arith.constant 0 : index
    %68 = vector.load %arg2[%c2_99, %c2_100, %c0_101, %c0_102] : memref<3x3x128x128xbf16, #tpu.memory_space<vmem>>, vector<1x1x128x128xbf16>
    %69 = vector.shape_cast %68 : vector<1x1x128x128xbf16> to vector<128x128xbf16>
    %cst_103 = arith.constant dense<0.000000e+00> : vector<64x128xf32>
    %70 = tpu.matmul %67, %69, %cst_103 {dimension_numbers = #tpu.dot_dimension_numbers<[1], [0], [0], [1], [0, 0, 1, 1], [], []>} : vector<64x128xbf16>, vector<128x128xbf16>, vector<64x128xf32> -> vector<64x128xf32>
    %71 = arith.addf %65, %70 : vector<64x128xf32>
    %72 = vector.broadcast %14 : vector<1x128xf32> to vector<64x128xf32>
    %73 = arith.addf %71, %72 : vector<64x128xf32>
    %cst_104 = arith.constant dense<0.000000e+00> : vector<128xf32>
    %74 = vector.multi_reduction <add>, %73, %cst_104 [0] : vector<64x128xf32> to vector<128xf32>
    %75 = vector.shape_cast %74 : vector<128xf32> to vector<1x128xf32>
    %76 = arith.addf %15, %75 : vector<1x128xf32>
    %77 = arith.mulf %73, %73 : vector<64x128xf32>
    %cst_105 = arith.constant dense<0.000000e+00> : vector<128xf32>
    %78 = vector.multi_reduction <add>, %77, %cst_105 [0] : vector<64x128xf32> to vector<128xf32>
    %79 = vector.shape_cast %78 : vector<128xf32> to vector<1x128xf32>
    %80 = arith.addf %16, %79 : vector<1x128xf32>
    %81 = vector.shape_cast %73 : vector<64x128xf32> to vector<8x8x128xf32>
    %82 = arith.truncf %81 : vector<8x8x128xf32> to vector<8x8x128xbf16>
    %c0_106 = arith.constant 0 : index
    %c0_107 = arith.constant 0 : index
    %c0_108 = arith.constant 0 : index
    %c0_109 = arith.constant 0 : index
    %83 = vector.load %arg6[%c0_106, %c0_107, %c0_108, %c0_109] : memref<1x8x8x128xbf16, #tpu.memory_space<vmem>>, vector<1x8x8x128xbf16>
    %84 = vector.shape_cast %83 : vector<1x8x8x128xbf16> to vector<8x8x128xbf16>
    %85 = vector.shape_cast %82 : vector<8x8x128xbf16> to vector<1x8x8x128xbf16>
    tpu.vector_store %arg6[%c0_106, %c0_107, %c0_108, %c0_109], %85 {strides = array<i32>} : memref<1x8x8x128xbf16, #tpu.memory_space<vmem>>, vector<1x8x8x128xbf16>,
    %c0_110 = arith.constant 0 : index
    %c0_111 = arith.constant 0 : index
    %c0_112 = arith.constant 0 : index
    %86 = vector.load %arg7[%c0_110, %c0_111, %c0_112] : memref<1x2x128xf32, #tpu.memory_space<vmem>>, vector<1x1x128xf32>
    %87 = vector.shape_cast %86 : vector<1x1x128xf32> to vector<1x128xf32>
    %88 = vector.shape_cast %76 : vector<1x128xf32> to vector<1x1x128xf32>
    tpu.vector_store %arg7[%c0_110, %c0_111, %c0_112], %88 {strides = array<i32>} : memref<1x2x128xf32, #tpu.memory_space<vmem>>, vector<1x1x128xf32>,
    %c0_113 = arith.constant 0 : index
    %c1_114 = arith.constant 1 : index
    %c0_115 = arith.constant 0 : index
    %89 = vector.load %arg7[%c0_113, %c1_114, %c0_115] : memref<1x2x128xf32, #tpu.memory_space<vmem>>, vector<1x1x128xf32>
    %90 = vector.shape_cast %89 : vector<1x1x128xf32> to vector<1x128xf32>
    %91 = vector.shape_cast %80 : vector<1x128xf32> to vector<1x1x128xf32>
    tpu.vector_store %arg7[%c0_113, %c1_114, %c0_115], %91 {strides = array<i32>} : memref<1x2x128xf32, #tpu.memory_space<vmem>>, vector<1x1x128xf32>,
    return
  }
  func.func @transform_0(%arg0: i32) -> (i32, i32, i32, i32, i32, i32) {
    %c0_i32 = arith.constant 0 : i32
    %c0_i32_0 = arith.constant 0 : i32
    %c0_i32_1 = arith.constant 0 : i32
    %c0_i32_2 = arith.constant 0 : i32
    %c0_i32_3 = arith.constant 0 : i32
    %c0_i32_4 = arith.constant 0 : i32
    return %arg0, %c0_i32, %c0_i32_0, %c0_i32_1, %c0_i32_2, %c0_i32_3 : i32, i32, i32, i32, i32, i32
  }
  func.func @transform_1(%arg0: i32) -> (i32, i32, i32, i32) {
    %c0_i32 = arith.constant 0 : i32
    %c0_i32_0 = arith.constant 0 : i32
    %c0_i32_1 = arith.constant 0 : i32
    %c0_i32_2 = arith.constant 0 : i32
    %c0_i32_3 = arith.constant 0 : i32
    return %c0_i32, %c0_i32_0, %c0_i32_1, %c0_i32_2 : i32, i32, i32, i32
  }
  func.func @transform_2(%arg0: i32) -> (i32, i32) {
    %c0_i32 = arith.constant 0 : i32
    %c0_i32_0 = arith.constant 0 : i32
    %c0_i32_1 = arith.constant 0 : i32
    return %c0_i32, %c0_i32_0 : i32, i32
  }
  func.func @transform_3(%arg0: i32) -> (i32, i32) {
    %c0_i32 = arith.constant 0 : i32
    %c0_i32_0 = arith.constant 0 : i32
    %c0_i32_1 = arith.constant 0 : i32
    return %c0_i32, %c0_i32_0 : i32, i32
  }
  func.func @transform_4(%arg0: i32) -> (i32, i32) {
    %c0_i32 = arith.constant 0 : i32
    %c0_i32_0 = arith.constant 0 : i32
    %c0_i32_1 = arith.constant 0 : i32
    return %c0_i32, %c0_i32_0 : i32, i32
  }
  func.func @transform_5(%arg0: i32) -> (i32, i32, i32, i32) {
    %c0_i32 = arith.constant 0 : i32
    %c0_i32_0 = arith.constant 0 : i32
    %c0_i32_1 = arith.constant 0 : i32
    %c0_i32_2 = arith.constant 0 : i32
    return %arg0, %c0_i32, %c0_i32_0, %c0_i32_1 : i32, i32, i32, i32
  }
  func.func @transform_6(%arg0: i32) -> (i32, i32, i32) {
    %c0_i32 = arith.constant 0 : i32
    %c0_i32_0 = arith.constant 0 : i32
    %c0_i32_1 = arith.constant 0 : i32
    return %arg0, %c0_i32, %c0_i32_0 : i32, i32, i32
  }
}

module attributes {stable_mosaic.version = 11 : i64} {
  func.func @_conv_bn_stats_kernel(%arg0: i32, %arg1: memref<1x8x8x128xbf16, #tpu.memory_space<vmem>>, %arg2: memref<3x3x128x128xbf16, #tpu.memory_space<vmem>>, %arg3: memref<1x128xf32, #tpu.memory_space<vmem>>, %arg4: memref<1x128xf32, #tpu.memory_space<vmem>>, %arg5: memref<1x128xf32, #tpu.memory_space<vmem>>, %arg6: memref<1x8x8x128xbf16, #tpu.memory_space<vmem>>, %arg7: memref<1x2x128xf32, #tpu.memory_space<vmem>>, %arg8: memref<10x10x128xbf16, #tpu.memory_space<vmem>>) attributes {dimension_semantics = [#tpu.dimension_semantics<parallel>], iteration_bounds = array<i64: 2>, scalar_prefetch = 0 : i64, scratch_operands = 1 : i64, tpu.core_type = #tpu.core_type<tc>, window_params = [{transform_indices = @transform_0, window_bounds = array<i64: 1, 8, 8, 128>}, {pipeline_mode = #tpu.pipeline_mode<synchronous>, transform_indices = @transform_1, window_bounds = array<i64: 3, 3, 128, 128>}, {pipeline_mode = #tpu.pipeline_mode<synchronous>, transform_indices = @transform_2, window_bounds = array<i64: 1, 128>}, {pipeline_mode = #tpu.pipeline_mode<synchronous>, transform_indices = @transform_3, window_bounds = array<i64: 1, 128>}, {pipeline_mode = #tpu.pipeline_mode<synchronous>, transform_indices = @transform_4, window_bounds = array<i64: 1, 128>}, {transform_indices = @transform_5, window_bounds = array<i64: 1, 8, 8, 128>}, {transform_indices = @transform_6, window_bounds = array<i64: 1, 2, 128>}]} {
    %c0 = arith.constant 0 : index
    %c0_0 = arith.constant 0 : index
    %c0_1 = arith.constant 0 : index
    %c0_2 = arith.constant 0 : index
    %0 = vector.load %arg1[%c0, %c0_0, %c0_1, %c0_2] : memref<1x8x8x128xbf16, #tpu.memory_space<vmem>>, vector<1x8x8x128xbf16>
    %1 = vector.shape_cast %0 : vector<1x8x8x128xbf16> to vector<8x8x128xbf16>
    %c0_3 = arith.constant 0 : index
    %c0_4 = arith.constant 0 : index
    %2 = vector.load %arg4[%c0_3, %c0_4] : memref<1x128xf32, #tpu.memory_space<vmem>>, vector<1x128xf32>
    %3 = vector.shape_cast %2 : vector<1x128xf32> to vector<1x1x128xf32>
    %c0_5 = arith.constant 0 : index
    %c0_6 = arith.constant 0 : index
    %4 = vector.load %arg5[%c0_5, %c0_6] : memref<1x128xf32, #tpu.memory_space<vmem>>, vector<1x128xf32>
    %5 = vector.shape_cast %4 : vector<1x128xf32> to vector<1x1x128xf32>
    %6 = arith.extf %1 : vector<8x8x128xbf16> to vector<8x8x128xf32>
    %7 = vector.broadcast %3 : vector<1x1x128xf32> to vector<8x8x128xf32>
    %8 = arith.mulf %6, %7 : vector<8x8x128xf32>
    %9 = vector.broadcast %5 : vector<1x1x128xf32> to vector<8x8x128xf32>
    %10 = arith.addf %8, %9 : vector<8x8x128xf32>
    %cst = arith.constant 0.000000e+00 : f32
    %11 = vector.broadcast %cst : f32 to vector<8x8x128xf32>
    %12 = arith.maximumf %10, %11 : vector<8x8x128xf32>
    %13 = arith.truncf %12 : vector<8x8x128xf32> to vector<8x8x128xbf16>
    %cst_7 = arith.constant 0.000000e+00 : bf16
    %14 = vector.broadcast %cst_7 : bf16 to vector<10x10x128xbf16>
    %c0_8 = arith.constant 0 : index
    %c0_9 = arith.constant 0 : index
    %c0_10 = arith.constant 0 : index
    %15 = vector.load %arg8[%c0_8, %c0_9, %c0_10] : memref<10x10x128xbf16, #tpu.memory_space<vmem>>, vector<10x10x128xbf16>
    tpu.vector_store %arg8[%c0_8, %c0_9, %c0_10], %14 {strides = array<i32>} : memref<10x10x128xbf16, #tpu.memory_space<vmem>>, vector<10x10x128xbf16>,
    %c1 = arith.constant 1 : index
    %c1_11 = arith.constant 1 : index
    %c0_12 = arith.constant 0 : index
    %16 = vector.load %arg8[%c1, %c1_11, %c0_12] : memref<10x10x128xbf16, #tpu.memory_space<vmem>>, vector<8x8x128xbf16>
    tpu.vector_store %arg8[%c1, %c1_11, %c0_12], %13 {strides = array<i32>} : memref<10x10x128xbf16, #tpu.memory_space<vmem>>, vector<8x8x128xbf16>,
    %c0_13 = arith.constant 0 : index
    %c0_14 = arith.constant 0 : index
    %17 = vector.load %arg3[%c0_13, %c0_14] : memref<1x128xf32, #tpu.memory_space<vmem>>, vector<1x128xf32>
    %cst_15 = arith.constant 0.000000e+00 : f32
    %18 = vector.broadcast %cst_15 : f32 to vector<1x128xf32>
    %cst_16 = arith.constant 0.000000e+00 : f32
    %19 = vector.broadcast %cst_16 : f32 to vector<1x128xf32>
    %cst_17 = arith.constant 0.000000e+00 : f32
    %20 = vector.broadcast %cst_17 : f32 to vector<64x128xf32>
    %c0_18 = arith.constant 0 : index
    %c0_19 = arith.constant 0 : index
    %c0_20 = arith.constant 0 : index
    %21 = vector.load %arg8[%c0_18, %c0_19, %c0_20] : memref<10x10x128xbf16, #tpu.memory_space<vmem>>, vector<8x8x128xbf16>
    %22 = vector.shape_cast %21 : vector<8x8x128xbf16> to vector<64x128xbf16>
    %c0_21 = arith.constant 0 : index
    %c0_22 = arith.constant 0 : index
    %c0_23 = arith.constant 0 : index
    %c0_24 = arith.constant 0 : index
    %23 = vector.load %arg2[%c0_21, %c0_22, %c0_23, %c0_24] : memref<3x3x128x128xbf16, #tpu.memory_space<vmem>>, vector<1x1x128x128xbf16>
    %24 = vector.shape_cast %23 : vector<1x1x128x128xbf16> to vector<128x128xbf16>
    %cst_25 = arith.constant dense<0.000000e+00> : vector<64x128xf32>
    %25 = tpu.matmul %22, %24, %cst_25 {dimension_numbers = #tpu.dot_dimension_numbers<[1], [0], [0], [1], [0, 0, 1, 1], [], []>} : vector<64x128xbf16>, vector<128x128xbf16>, vector<64x128xf32> -> vector<64x128xf32>
    %26 = arith.addf %20, %25 : vector<64x128xf32>
    %c0_26 = arith.constant 0 : index
    %c1_27 = arith.constant 1 : index
    %c0_28 = arith.constant 0 : index
    %27 = vector.load %arg8[%c0_26, %c1_27, %c0_28] : memref<10x10x128xbf16, #tpu.memory_space<vmem>>, vector<8x8x128xbf16>
    %28 = vector.shape_cast %27 : vector<8x8x128xbf16> to vector<64x128xbf16>
    %c0_29 = arith.constant 0 : index
    %c1_30 = arith.constant 1 : index
    %c0_31 = arith.constant 0 : index
    %c0_32 = arith.constant 0 : index
    %29 = vector.load %arg2[%c0_29, %c1_30, %c0_31, %c0_32] : memref<3x3x128x128xbf16, #tpu.memory_space<vmem>>, vector<1x1x128x128xbf16>
    %30 = vector.shape_cast %29 : vector<1x1x128x128xbf16> to vector<128x128xbf16>
    %cst_33 = arith.constant dense<0.000000e+00> : vector<64x128xf32>
    %31 = tpu.matmul %28, %30, %cst_33 {dimension_numbers = #tpu.dot_dimension_numbers<[1], [0], [0], [1], [0, 0, 1, 1], [], []>} : vector<64x128xbf16>, vector<128x128xbf16>, vector<64x128xf32> -> vector<64x128xf32>
    %32 = arith.addf %26, %31 : vector<64x128xf32>
    %c0_34 = arith.constant 0 : index
    %c2 = arith.constant 2 : index
    %c0_35 = arith.constant 0 : index
    %33 = vector.load %arg8[%c0_34, %c2, %c0_35] : memref<10x10x128xbf16, #tpu.memory_space<vmem>>, vector<8x8x128xbf16>
    %34 = vector.shape_cast %33 : vector<8x8x128xbf16> to vector<64x128xbf16>
    %c0_36 = arith.constant 0 : index
    %c2_37 = arith.constant 2 : index
    %c0_38 = arith.constant 0 : index
    %c0_39 = arith.constant 0 : index
    %35 = vector.load %arg2[%c0_36, %c2_37, %c0_38, %c0_39] : memref<3x3x128x128xbf16, #tpu.memory_space<vmem>>, vector<1x1x128x128xbf16>
    %36 = vector.shape_cast %35 : vector<1x1x128x128xbf16> to vector<128x128xbf16>
    %cst_40 = arith.constant dense<0.000000e+00> : vector<64x128xf32>
    %37 = tpu.matmul %34, %36, %cst_40 {dimension_numbers = #tpu.dot_dimension_numbers<[1], [0], [0], [1], [0, 0, 1, 1], [], []>} : vector<64x128xbf16>, vector<128x128xbf16>, vector<64x128xf32> -> vector<64x128xf32>
    %38 = arith.addf %32, %37 : vector<64x128xf32>
    %c1_41 = arith.constant 1 : index
    %c0_42 = arith.constant 0 : index
    %c0_43 = arith.constant 0 : index
    %39 = vector.load %arg8[%c1_41, %c0_42, %c0_43] : memref<10x10x128xbf16, #tpu.memory_space<vmem>>, vector<8x8x128xbf16>
    %40 = vector.shape_cast %39 : vector<8x8x128xbf16> to vector<64x128xbf16>
    %c1_44 = arith.constant 1 : index
    %c0_45 = arith.constant 0 : index
    %c0_46 = arith.constant 0 : index
    %c0_47 = arith.constant 0 : index
    %41 = vector.load %arg2[%c1_44, %c0_45, %c0_46, %c0_47] : memref<3x3x128x128xbf16, #tpu.memory_space<vmem>>, vector<1x1x128x128xbf16>
    %42 = vector.shape_cast %41 : vector<1x1x128x128xbf16> to vector<128x128xbf16>
    %cst_48 = arith.constant dense<0.000000e+00> : vector<64x128xf32>
    %43 = tpu.matmul %40, %42, %cst_48 {dimension_numbers = #tpu.dot_dimension_numbers<[1], [0], [0], [1], [0, 0, 1, 1], [], []>} : vector<64x128xbf16>, vector<128x128xbf16>, vector<64x128xf32> -> vector<64x128xf32>
    %44 = arith.addf %38, %43 : vector<64x128xf32>
    %c1_49 = arith.constant 1 : index
    %c1_50 = arith.constant 1 : index
    %c0_51 = arith.constant 0 : index
    %45 = vector.load %arg8[%c1_49, %c1_50, %c0_51] : memref<10x10x128xbf16, #tpu.memory_space<vmem>>, vector<8x8x128xbf16>
    %46 = vector.shape_cast %45 : vector<8x8x128xbf16> to vector<64x128xbf16>
    %c1_52 = arith.constant 1 : index
    %c1_53 = arith.constant 1 : index
    %c0_54 = arith.constant 0 : index
    %c0_55 = arith.constant 0 : index
    %47 = vector.load %arg2[%c1_52, %c1_53, %c0_54, %c0_55] : memref<3x3x128x128xbf16, #tpu.memory_space<vmem>>, vector<1x1x128x128xbf16>
    %48 = vector.shape_cast %47 : vector<1x1x128x128xbf16> to vector<128x128xbf16>
    %cst_56 = arith.constant dense<0.000000e+00> : vector<64x128xf32>
    %49 = tpu.matmul %46, %48, %cst_56 {dimension_numbers = #tpu.dot_dimension_numbers<[1], [0], [0], [1], [0, 0, 1, 1], [], []>} : vector<64x128xbf16>, vector<128x128xbf16>, vector<64x128xf32> -> vector<64x128xf32>
    %50 = arith.addf %44, %49 : vector<64x128xf32>
    %c1_57 = arith.constant 1 : index
    %c2_58 = arith.constant 2 : index
    %c0_59 = arith.constant 0 : index
    %51 = vector.load %arg8[%c1_57, %c2_58, %c0_59] : memref<10x10x128xbf16, #tpu.memory_space<vmem>>, vector<8x8x128xbf16>
    %52 = vector.shape_cast %51 : vector<8x8x128xbf16> to vector<64x128xbf16>
    %c1_60 = arith.constant 1 : index
    %c2_61 = arith.constant 2 : index
    %c0_62 = arith.constant 0 : index
    %c0_63 = arith.constant 0 : index
    %53 = vector.load %arg2[%c1_60, %c2_61, %c0_62, %c0_63] : memref<3x3x128x128xbf16, #tpu.memory_space<vmem>>, vector<1x1x128x128xbf16>
    %54 = vector.shape_cast %53 : vector<1x1x128x128xbf16> to vector<128x128xbf16>
    %cst_64 = arith.constant dense<0.000000e+00> : vector<64x128xf32>
    %55 = tpu.matmul %52, %54, %cst_64 {dimension_numbers = #tpu.dot_dimension_numbers<[1], [0], [0], [1], [0, 0, 1, 1], [], []>} : vector<64x128xbf16>, vector<128x128xbf16>, vector<64x128xf32> -> vector<64x128xf32>
    %56 = arith.addf %50, %55 : vector<64x128xf32>
    %c2_65 = arith.constant 2 : index
    %c0_66 = arith.constant 0 : index
    %c0_67 = arith.constant 0 : index
    %57 = vector.load %arg8[%c2_65, %c0_66, %c0_67] : memref<10x10x128xbf16, #tpu.memory_space<vmem>>, vector<8x8x128xbf16>
    %58 = vector.shape_cast %57 : vector<8x8x128xbf16> to vector<64x128xbf16>
    %c2_68 = arith.constant 2 : index
    %c0_69 = arith.constant 0 : index
    %c0_70 = arith.constant 0 : index
    %c0_71 = arith.constant 0 : index
    %59 = vector.load %arg2[%c2_68, %c0_69, %c0_70, %c0_71] : memref<3x3x128x128xbf16, #tpu.memory_space<vmem>>, vector<1x1x128x128xbf16>
    %60 = vector.shape_cast %59 : vector<1x1x128x128xbf16> to vector<128x128xbf16>
    %cst_72 = arith.constant dense<0.000000e+00> : vector<64x128xf32>
    %61 = tpu.matmul %58, %60, %cst_72 {dimension_numbers = #tpu.dot_dimension_numbers<[1], [0], [0], [1], [0, 0, 1, 1], [], []>} : vector<64x128xbf16>, vector<128x128xbf16>, vector<64x128xf32> -> vector<64x128xf32>
    %62 = arith.addf %56, %61 : vector<64x128xf32>
    %c2_73 = arith.constant 2 : index
    %c1_74 = arith.constant 1 : index
    %c0_75 = arith.constant 0 : index
    %63 = vector.load %arg8[%c2_73, %c1_74, %c0_75] : memref<10x10x128xbf16, #tpu.memory_space<vmem>>, vector<8x8x128xbf16>
    %64 = vector.shape_cast %63 : vector<8x8x128xbf16> to vector<64x128xbf16>
    %c2_76 = arith.constant 2 : index
    %c1_77 = arith.constant 1 : index
    %c0_78 = arith.constant 0 : index
    %c0_79 = arith.constant 0 : index
    %65 = vector.load %arg2[%c2_76, %c1_77, %c0_78, %c0_79] : memref<3x3x128x128xbf16, #tpu.memory_space<vmem>>, vector<1x1x128x128xbf16>
    %66 = vector.shape_cast %65 : vector<1x1x128x128xbf16> to vector<128x128xbf16>
    %cst_80 = arith.constant dense<0.000000e+00> : vector<64x128xf32>
    %67 = tpu.matmul %64, %66, %cst_80 {dimension_numbers = #tpu.dot_dimension_numbers<[1], [0], [0], [1], [0, 0, 1, 1], [], []>} : vector<64x128xbf16>, vector<128x128xbf16>, vector<64x128xf32> -> vector<64x128xf32>
    %68 = arith.addf %62, %67 : vector<64x128xf32>
    %c2_81 = arith.constant 2 : index
    %c2_82 = arith.constant 2 : index
    %c0_83 = arith.constant 0 : index
    %69 = vector.load %arg8[%c2_81, %c2_82, %c0_83] : memref<10x10x128xbf16, #tpu.memory_space<vmem>>, vector<8x8x128xbf16>
    %70 = vector.shape_cast %69 : vector<8x8x128xbf16> to vector<64x128xbf16>
    %c2_84 = arith.constant 2 : index
    %c2_85 = arith.constant 2 : index
    %c0_86 = arith.constant 0 : index
    %c0_87 = arith.constant 0 : index
    %71 = vector.load %arg2[%c2_84, %c2_85, %c0_86, %c0_87] : memref<3x3x128x128xbf16, #tpu.memory_space<vmem>>, vector<1x1x128x128xbf16>
    %72 = vector.shape_cast %71 : vector<1x1x128x128xbf16> to vector<128x128xbf16>
    %cst_88 = arith.constant dense<0.000000e+00> : vector<64x128xf32>
    %73 = tpu.matmul %70, %72, %cst_88 {dimension_numbers = #tpu.dot_dimension_numbers<[1], [0], [0], [1], [0, 0, 1, 1], [], []>} : vector<64x128xbf16>, vector<128x128xbf16>, vector<64x128xf32> -> vector<64x128xf32>
    %74 = arith.addf %68, %73 : vector<64x128xf32>
    %75 = vector.broadcast %17 : vector<1x128xf32> to vector<64x128xf32>
    %76 = arith.addf %74, %75 : vector<64x128xf32>
    %cst_89 = arith.constant dense<0.000000e+00> : vector<128xf32>
    %77 = vector.multi_reduction <add>, %76, %cst_89 [0] : vector<64x128xf32> to vector<128xf32>
    %78 = vector.shape_cast %77 : vector<128xf32> to vector<1x128xf32>
    %79 = arith.addf %18, %78 : vector<1x128xf32>
    %80 = arith.mulf %76, %76 : vector<64x128xf32>
    %cst_90 = arith.constant dense<0.000000e+00> : vector<128xf32>
    %81 = vector.multi_reduction <add>, %80, %cst_90 [0] : vector<64x128xf32> to vector<128xf32>
    %82 = vector.shape_cast %81 : vector<128xf32> to vector<1x128xf32>
    %83 = arith.addf %19, %82 : vector<1x128xf32>
    %84 = vector.shape_cast %76 : vector<64x128xf32> to vector<8x8x128xf32>
    %85 = arith.truncf %84 : vector<8x8x128xf32> to vector<8x8x128xbf16>
    %c0_91 = arith.constant 0 : index
    %c0_92 = arith.constant 0 : index
    %c0_93 = arith.constant 0 : index
    %c0_94 = arith.constant 0 : index
    %86 = vector.load %arg6[%c0_91, %c0_92, %c0_93, %c0_94] : memref<1x8x8x128xbf16, #tpu.memory_space<vmem>>, vector<1x8x8x128xbf16>
    %87 = vector.shape_cast %86 : vector<1x8x8x128xbf16> to vector<8x8x128xbf16>
    %88 = vector.shape_cast %85 : vector<8x8x128xbf16> to vector<1x8x8x128xbf16>
    tpu.vector_store %arg6[%c0_91, %c0_92, %c0_93, %c0_94], %88 {strides = array<i32>} : memref<1x8x8x128xbf16, #tpu.memory_space<vmem>>, vector<1x8x8x128xbf16>,
    %c0_95 = arith.constant 0 : index
    %c0_96 = arith.constant 0 : index
    %c0_97 = arith.constant 0 : index
    %89 = vector.load %arg7[%c0_95, %c0_96, %c0_97] : memref<1x2x128xf32, #tpu.memory_space<vmem>>, vector<1x1x128xf32>
    %90 = vector.shape_cast %89 : vector<1x1x128xf32> to vector<1x128xf32>
    %91 = vector.shape_cast %79 : vector<1x128xf32> to vector<1x1x128xf32>
    tpu.vector_store %arg7[%c0_95, %c0_96, %c0_97], %91 {strides = array<i32>} : memref<1x2x128xf32, #tpu.memory_space<vmem>>, vector<1x1x128xf32>,
    %c0_98 = arith.constant 0 : index
    %c1_99 = arith.constant 1 : index
    %c0_100 = arith.constant 0 : index
    %92 = vector.load %arg7[%c0_98, %c1_99, %c0_100] : memref<1x2x128xf32, #tpu.memory_space<vmem>>, vector<1x1x128xf32>
    %93 = vector.shape_cast %92 : vector<1x1x128xf32> to vector<1x128xf32>
    %94 = vector.shape_cast %83 : vector<1x128xf32> to vector<1x1x128xf32>
    tpu.vector_store %arg7[%c0_98, %c1_99, %c0_100], %94 {strides = array<i32>} : memref<1x2x128xf32, #tpu.memory_space<vmem>>, vector<1x1x128xf32>,
    return
  }
  func.func @transform_0(%arg0: i32) -> (i32, i32, i32, i32) {
    %c0_i32 = arith.constant 0 : i32
    %c0_i32_0 = arith.constant 0 : i32
    %c0_i32_1 = arith.constant 0 : i32
    %c0_i32_2 = arith.constant 0 : i32
    return %arg0, %c0_i32, %c0_i32_0, %c0_i32_1 : i32, i32, i32, i32
  }
  func.func @transform_1(%arg0: i32) -> (i32, i32, i32, i32) {
    %c0_i32 = arith.constant 0 : i32
    %c0_i32_0 = arith.constant 0 : i32
    %c0_i32_1 = arith.constant 0 : i32
    %c0_i32_2 = arith.constant 0 : i32
    %c0_i32_3 = arith.constant 0 : i32
    return %c0_i32, %c0_i32_0, %c0_i32_1, %c0_i32_2 : i32, i32, i32, i32
  }
  func.func @transform_2(%arg0: i32) -> (i32, i32) {
    %c0_i32 = arith.constant 0 : i32
    %c0_i32_0 = arith.constant 0 : i32
    %c0_i32_1 = arith.constant 0 : i32
    return %c0_i32, %c0_i32_0 : i32, i32
  }
  func.func @transform_3(%arg0: i32) -> (i32, i32) {
    %c0_i32 = arith.constant 0 : i32
    %c0_i32_0 = arith.constant 0 : i32
    %c0_i32_1 = arith.constant 0 : i32
    return %c0_i32, %c0_i32_0 : i32, i32
  }
  func.func @transform_4(%arg0: i32) -> (i32, i32) {
    %c0_i32 = arith.constant 0 : i32
    %c0_i32_0 = arith.constant 0 : i32
    %c0_i32_1 = arith.constant 0 : i32
    return %c0_i32, %c0_i32_0 : i32, i32
  }
  func.func @transform_5(%arg0: i32) -> (i32, i32, i32, i32) {
    %c0_i32 = arith.constant 0 : i32
    %c0_i32_0 = arith.constant 0 : i32
    %c0_i32_1 = arith.constant 0 : i32
    %c0_i32_2 = arith.constant 0 : i32
    return %arg0, %c0_i32, %c0_i32_0, %c0_i32_1 : i32, i32, i32, i32
  }
  func.func @transform_6(%arg0: i32) -> (i32, i32, i32) {
    %c0_i32 = arith.constant 0 : i32
    %c0_i32_0 = arith.constant 0 : i32
    %c0_i32_1 = arith.constant 0 : i32
    return %arg0, %c0_i32, %c0_i32_0 : i32, i32, i32
  }
}

module attributes {stable_mosaic.version = 11 : i64} {
  func.func @_bn_relu_kernel(%arg0: i32, %arg1: memref<1x8x8x128xbf16, #tpu.memory_space<vmem>>, %arg2: memref<1x128xf32, #tpu.memory_space<vmem>>, %arg3: memref<1x128xf32, #tpu.memory_space<vmem>>, %arg4: memref<1x8x8x128xf32, #tpu.memory_space<vmem>>) attributes {dimension_semantics = [#tpu.dimension_semantics<parallel>], iteration_bounds = array<i64: 2>, scalar_prefetch = 0 : i64, scratch_operands = 0 : i64, tpu.core_type = #tpu.core_type<tc>, window_params = [{transform_indices = @transform_0, window_bounds = array<i64: 1, 8, 8, 128>}, {pipeline_mode = #tpu.pipeline_mode<synchronous>, transform_indices = @transform_1, window_bounds = array<i64: 1, 128>}, {pipeline_mode = #tpu.pipeline_mode<synchronous>, transform_indices = @transform_2, window_bounds = array<i64: 1, 128>}, {transform_indices = @transform_3, window_bounds = array<i64: 1, 8, 8, 128>}]} {
    %c0 = arith.constant 0 : index
    %c0_0 = arith.constant 0 : index
    %0 = vector.load %arg2[%c0, %c0_0] : memref<1x128xf32, #tpu.memory_space<vmem>>, vector<1x128xf32>
    %1 = vector.shape_cast %0 : vector<1x128xf32> to vector<1x1x1x128xf32>
    %c0_1 = arith.constant 0 : index
    %c0_2 = arith.constant 0 : index
    %2 = vector.load %arg3[%c0_1, %c0_2] : memref<1x128xf32, #tpu.memory_space<vmem>>, vector<1x128xf32>
    %3 = vector.shape_cast %2 : vector<1x128xf32> to vector<1x1x1x128xf32>
    %c0_3 = arith.constant 0 : index
    %c0_4 = arith.constant 0 : index
    %c0_5 = arith.constant 0 : index
    %c0_6 = arith.constant 0 : index
    %4 = vector.load %arg1[%c0_3, %c0_4, %c0_5, %c0_6] : memref<1x8x8x128xbf16, #tpu.memory_space<vmem>>, vector<1x8x8x128xbf16>
    %5 = arith.extf %4 : vector<1x8x8x128xbf16> to vector<1x8x8x128xf32>
    %6 = vector.broadcast %1 : vector<1x1x1x128xf32> to vector<1x8x8x128xf32>
    %7 = arith.mulf %5, %6 : vector<1x8x8x128xf32>
    %8 = vector.broadcast %3 : vector<1x1x1x128xf32> to vector<1x8x8x128xf32>
    %9 = arith.addf %7, %8 : vector<1x8x8x128xf32>
    %cst = arith.constant 0.000000e+00 : f32
    %10 = vector.broadcast %cst : f32 to vector<1x8x8x128xf32>
    %11 = arith.maximumf %9, %10 : vector<1x8x8x128xf32>
    %c0_7 = arith.constant 0 : index
    %c0_8 = arith.constant 0 : index
    %c0_9 = arith.constant 0 : index
    %c0_10 = arith.constant 0 : index
    %12 = vector.load %arg4[%c0_7, %c0_8, %c0_9, %c0_10] : memref<1x8x8x128xf32, #tpu.memory_space<vmem>>, vector<1x8x8x128xf32>
    tpu.vector_store %arg4[%c0_7, %c0_8, %c0_9, %c0_10], %11 {strides = array<i32>} : memref<1x8x8x128xf32, #tpu.memory_space<vmem>>, vector<1x8x8x128xf32>,
    return
  }
  func.func @transform_0(%arg0: i32) -> (i32, i32, i32, i32) {
    %c0_i32 = arith.constant 0 : i32
    %c0_i32_0 = arith.constant 0 : i32
    %c0_i32_1 = arith.constant 0 : i32
    %c0_i32_2 = arith.constant 0 : i32
    return %arg0, %c0_i32, %c0_i32_0, %c0_i32_1 : i32, i32, i32, i32
  }
  func.func @transform_1(%arg0: i32) -> (i32, i32) {
    %c0_i32 = arith.constant 0 : i32
    %c0_i32_0 = arith.constant 0 : i32
    %c0_i32_1 = arith.constant 0 : i32
    return %c0_i32, %c0_i32_0 : i32, i32
  }
  func.func @transform_2(%arg0: i32) -> (i32, i32) {
    %c0_i32 = arith.constant 0 : i32
    %c0_i32_0 = arith.constant 0 : i32
    %c0_i32_1 = arith.constant 0 : i32
    return %c0_i32, %c0_i32_0 : i32, i32
  }
  func.func @transform_3(%arg0: i32) -> (i32, i32, i32, i32) {
    %c0_i32 = arith.constant 0 : i32
    %c0_i32_0 = arith.constant 0 : i32
    %c0_i32_1 = arith.constant 0 : i32
    %c0_i32_2 = arith.constant 0 : i32
    return %arg0, %c0_i32, %c0_i32_0, %c0_i32_1 : i32, i32, i32, i32
  }
}

</mosaic_0001>

<bundles_post_ra>
// kernel: down_block_forward.5
= control target key start
LH: loop header
LB: loop body
LE: loop exit
PB: predicated region body
PF: predicated region fallthrough
CT: control target
= control target key end

     0   :  { %s358_s12 = smov 0   ;;  %s385_s0 = inlined_call_operand.vmem [shape: bf16[2,8,8,128], index: 0, kind: input, shape index: {}]   ;;  %s386_s1 = inlined_call_operand.vmem [shape: f32[1,128], index: 1, kind: input, shape index: {}]   ;;  %s387_s2 = inlined_call_operand.vmem [shape: f32[1,128], index: 2, kind: input, shape index: {}]   ;;  %s388_s3 = inlined_call_operand.vmem [shape: f32[2,8,8,128], index: 3, kind: output, shape index: {}]  }
   0x1 LB: > { %s288_s13 = sadd.s32 4294967295, %s336_s12   ;;  %p292_p0 = scmp.ge.s32.totalorder %s336_s12, 1  ;;  %s336_s12 = sphi %s358_s12, %s13_s12  }
   0x2   : > { %p137_p1 = scmp.lt.s32.totalorder %s336_s12, 3 }
   0x4   : > { %p138_p2 = pnand %p292_p0, %p137_p1 }
   0x5   : > { %p161_p3 = scmp.lt.s32.totalorder (!%p138_p2), %s288_s13, 1  ;;  %v297_v0 = vld [vmem:[%s386_s1] ss:$0 sm:$0xff] (!%p138_p2) }
   0x6   : > { %141 = sbr.rel (%p138_p2) target bundleno = 29 (0x1d), region = 32  ;;  %v298_v9 = vld [vmem:[%s387_s2] ss:$0 sm:$0xff] (!%p138_p2) }
   0xd   : > { %s390_s13 = smov (!%p161_p3, %s288_s13), 1 }
   0xe   : > { %s301_s14 = sshll.u32 %s390_s13, 5  ;;  %s302_s22 = sshll.u32 %s390_s13, 6 }
   0xf   : > { %s165_s17 = scalar_lea.vmem %s385_s0, %s301_s14  ;;  %s170_s25 = scalar_lea.vmem %s388_s3, %s302_s22 }
  0x10   : > { %v304_v1 = vld [vmem:[%s165_s17] sm:$0xff]   ;;  %v319_v2 = vld [vmem:[%s165_s17 + $0x8] sm:$0xff]   ;;  %v320_v3 = vld [vmem:[%s165_s17 + $0x10] sm:$0xff]  }
  0x11   : > { %v305_v4 = vunpack.c.l.bf16 %v304_v1  ;;  %v306_v5 = vunpack.c.h.bf16 %v304_v1  ;;  %v309_v6 = vunpack.c.l.bf16 %v319_v2  ;;  %v310_v7 = vunpack.c.h.bf16 %v319_v2  ;;  %v321_v8 = vld [vmem:[%s165_s17 + $0x18] sm:$0xff]  }
  0x12   : > { %v313_v10 = vunpack.c.l.bf16 %v320_v3  ;;  %v314_v11 = vunpack.c.h.bf16 %v320_v3  ;;  %v317_v12 = vunpack.c.l.bf16 %v321_v8  ;;  %v318_v13 = vunpack.c.h.bf16 %v321_v8 }
  0x13   : > { %v195_v14 = vmul.f32 %v305_v4, %v297_v0  ;;  %v196_v15 = vmul.f32 %v306_v5, %v297_v0  ;;  %v197_v16 = vmul.f32 %v309_v6, %v297_v0  ;;  %v198_v17 = vmul.f32 %v310_v7, %v297_v0 }
  0x14   : > { %v199_v18 = vmul.f32 %v313_v10, %v297_v0  ;;  %v200_v19 = vmul.f32 %v314_v11, %v297_v0  ;;  %v201_v20 = vmul.f32 %v317_v12, %v297_v0  ;;  %v202_v21 = vmul.f32 %v318_v13, %v297_v0 }
  0x15   : > { %v209_v22 = vadd.f32 %v298_v9, %v195_v14  ;;  %v210_v23 = vadd.f32 %v298_v9, %v196_v15  ;;  %v211_v24 = vadd.f32 %v298_v9, %v197_v16  ;;  %v212_v25 = vadd.f32 %v298_v9, %v198_v17 }
  0x16   : > { %v213_v26 = vadd.f32 %v298_v9, %v199_v18  ;;  %v214_v27 = vadd.f32 %v298_v9, %v200_v19  ;;  %v215_v28 = vadd.f32 %v298_v9, %v201_v20  ;;  %v216_v29 = vadd.f32 %v298_v9, %v202_v21 }
  0x17   : > { %v217_v30 = vmax.f32 %v209_v22, 0.0  ;;  %v218_v31 = vmax.f32 %v210_v23, 0.0  ;;  %v219_v32 = vmax.f32 %v211_v24, 0.0  ;;  %v220_v33 = vmax.f32 %v212_v25, 0.0 }
  0x18   : > { %v221_v34 = vmax.f32 %v213_v26, 0.0  ;;  %v222_v35 = vmax.f32 %v214_v27, 0.0  ;;  %v223_v36 = vmax.f32 %v215_v28, 0.0  ;;  %v224_v37 = vmax.f32 %v216_v29, 0.0 }
  0x19   : > { %225 = vst [vmem:[%s170_s25] sm:$0xff] %v217_v30  ;;  %226 = vst [vmem:[%s170_s25 + $0x8] sm:$0xff] %v218_v31 }
  0x1a   : > { %227 = vst [vmem:[%s170_s25 + $0x10] sm:$0xff] %v219_v32  ;;  %228 = vst [vmem:[%s170_s25 + $0x18] sm:$0xff] %v220_v33 }
  0x1b   : > { %229 = vst [vmem:[%s170_s25 + $0x20] sm:$0xff] %v221_v34  ;;  %230 = vst [vmem:[%s170_s25 + $0x28] sm:$0xff] %v222_v35 }
  0x1c   : > { %231 = vst [vmem:[%s170_s25 + $0x30] sm:$0xff] %v223_v36  ;;  %232 = vst [vmem:[%s170_s25 + $0x38] sm:$0xff] %v224_v37 }
  0x1d PF: > { %s13_s12 = sadd.s32 1, %s336_s12  }
  0x1e   : > { %p10_p4 = scmp.ge.s32.totalorder %s13_s12, 4  }
  0x20   :  { %12 = sbr.rel (!%p10_p4) target bundleno = 1 (0x1), region = 62 }

// kernel: down_block_forward.4
= control target key start
LH: loop header
LB: loop body
LE: loop exit
PB: predicated region body
PF: predicated region fallthrough
CT: control target
= control target key end

     0   :  { %s3504_s21 = smov 0   ;;  %s4152_s0 = inlined_call_operand.vmem [shape: bf16[2,8,8,128], index: 0, kind: input, shape index: {}]   ;;  %s4153_s1 = inlined_call_operand.vmem [shape: bf16[3,3,128,128], index: 1, kind: input, shape index: {}]   ;;  %s4154_s2 = inlined_call_operand.vmem [shape: f32[1,128], index: 2, kind: input, shape index: {}]   ;;  %s4155_s3 = inlined_call_operand.vmem [shape: f32[1,128], index: 3, kind: input, shape index: {}]   ;;  %s4156_s4 = inlined_call_operand.vmem [shape: f32[1,128], index: 4, kind: input, shape index: {}]   ;;  %s4157_s5 = inlined_call_operand.vmem [shape: bf16[2,8,8,128], index: 5, kind: output, shape index: {0}]   ;;  %s4158_s6 = inlined_call_operand.vmem [shape: f32[2,2,128], index: 6, kind: output, shape index: {1}]  }
   0x1 LB: > { %s2628_s22 = sadd.s32 4294967295, %s3466_s21   ;;  %p2632_p0 = scmp.ge.s32.totalorder %s3466_s21, 1  ;;  %s3466_s21 = sphi %s3504_s21, %s17_s21  }
   0x2   : > { %p215_p1 = scmp.lt.s32.totalorder %s3466_s21, 3 }
   0x4   : > { %p216_p2 = pnand %p2632_p0, %p215_p1 }
   0x5   : > { %v3376_v0 = vld [vmem:[%s4153_s1 + $0x40] sm:$0xff] (!%p216_p2)   ;;  %v3378_v2 = vld [vmem:[%s4153_s1 + $0x48] sm:$0xff] (!%p216_p2)   ;;  %p3523_p3 = scmp.lt.s32.totalorder (!%p216_p2), %s2628_s22, 1  ;;  %v3468_v3 = vmov (!%p216_p2), 0   ;;  %v3380_v5 = vld [vmem:[%s4153_s1 + $0x50] sm:$0xff] (!%p216_p2)   ;;  %vm451_vm0 = vcmask (!%p216_p2), 1043456  }
   0x6   : > { %219 = sbr.rel (%p216_p2) target bundleno = 455 (0x1c7), region = 40  ;;  %v3377_v1 = vld [vmem:[%s4153_s1 + $0x100] sm:$0xff] (!%p216_p2)   ;;  %3071 = vmatprep.subr.bf16.mxu1 (!%p216_p2), %v3376_v0  ;;  %326 = vst [vmem:[#allocation2] sm:$0xf] (!%p216_p2), %v3468_v3  ;;  %327 = vst [vmem:[#allocation2 + $0x4] sm:$0x1] (!%p216_p2), %v3468_v3 }
   0x7   : > { %328 = vst [vmem:[#allocation2 + $0x8] sm:$0xf] (!%p216_p2), %v3468_v3  ;;  %329 = vst [vmem:[#allocation2 + $0xc] sm:$0x1] (!%p216_p2), %v3468_v3  ;;  %3167 = vmatprep.subr.bf16.mxu0 (!%p216_p2), %v3377_v1  ;;  %3072 = vmatpush3.bf16.msra.mxu1 (!%p216_p2), %v3376_v0  ;;  %v3379_v4 = vld [vmem:[%s4153_s1 + $0x108] sm:$0xff] (!%p216_p2)   ;;  %v3381_v6 = vld [vmem:[%s4153_s1 + $0x110] sm:$0xff] (!%p216_p2)  }
   0x8   : > { %330 = vst [vmem:[#allocation2 + $0x10] sm:$0xf] (!%p216_p2), %v3468_v3  ;;  %331 = vst [vmem:[#allocation2 + $0x14] sm:$0x1] (!%p216_p2), %v3468_v3  ;;  %3168 = vmatpush3.bf16.msra.mxu0 (!%p216_p2), %v3377_v1  ;;  %3073 = vmatprep.subr.bf16.mxu1 (!%p216_p2), %v3378_v2  ;;  %v3382_v7 = vld [vmem:[%s4153_s1 + $0x58] sm:$0xff] (!%p216_p2)   ;;  %v3384_v9 = vld [vmem:[%s4153_s1 + $0x60] sm:$0xff] (!%p216_p2)  }
   0x9   : > { %332 = vst [vmem:[#allocation2 + $0x18] sm:$0xf] (!%p216_p2), %v3468_v3  ;;  %333 = vst [vmem:[#allocation2 + $0x1c] sm:$0x1] (!%p216_p2), %v3468_v3  ;;  %3169 = vmatprep.subr.bf16.mxu0 (!%p216_p2), %v3379_v4  ;;  %v3383_v8 = vld [vmem:[%s4153_s1 + $0x118] sm:$0xff] (!%p216_p2)   ;;  %v3385_v10 = vld [vmem:[%s4153_s1 + $0x120] sm:$0xff] (!%p216_p2)  }
   0xa   : > { %334 = vst [vmem:[#allocation2 + $0x20] sm:$0xf] (!%p216_p2), %v3468_v3  ;;  %335 = vst [vmem:[#allocation2 + $0x24] sm:$0x1] (!%p216_p2), %v3468_v3  ;;  %v3386_v11 = vld [vmem:[%s4153_s1 + $0x68] sm:$0xff] (!%p216_p2)   ;;  %v3388_v20 = vld [vmem:[%s4153_s1 + $0x70] sm:$0xff] (!%p216_p2)  }
   0xb   : > { %336 = vst [vmem:[#allocation2 + $0x28] sm:$0xf] (!%p216_p2), %v3468_v3  ;;  %337 = vst [vmem:[#allocation2 + $0x2c] sm:$0x1] (!%p216_p2), %v3468_v3  ;;  %3074 = vmatpush3.bf16.msra.mxu1 (!%p216_p2), %v3378_v2  ;;  %v3569_v13 = vld [vmem:[%s4155_s3] ss:$0 sm:$0xff] (!%p216_p2) }
   0xc   : > { %338 = vst [vmem:[#allocation2 + $0x30] sm:$0xf] (!%p216_p2), %v3468_v3  ;;  %339 = vst [vmem:[#allocation2 + $0x34] sm:$0x1] (!%p216_p2), %v3468_v3  ;;  %3170 = vmatpush3.bf16.msra.mxu0 (!%p216_p2), %v3379_v4  ;;  %3075 = vmatprep.subr.bf16.mxu1 (!%p216_p2), %v3380_v5  ;;  %v3387_v14 = vld [vmem:[%s4153_s1 + $0x128] sm:$0xff] (!%p216_p2)   ;;  %v3389_v23 = vld [vmem:[%s4153_s1 + $0x130] sm:$0xff] (!%p216_p2)  }
   0xd   : > { %340 = vst [vmem:[#allocation2 + $0x38] sm:$0xf] %v3468_v3  ;;  %341 = vst [vmem:[#allocation2 + $0x3c] sm:$0x1] %v3468_v3  ;;  %s4169_s22 = smov (!%p3523_p3, %s2628_s22), 1  ;;  %3171 = vmatprep.subr.bf16.mxu0 %v3381_v6  ;;  %v3390_v28 = vld [vmem:[%s4153_s1 + $0x78] sm:$0xff]  }
   0xe   : > { %342 = vst [vmem:[#allocation2 + $0x40] sm:$0xf] %v3468_v3  ;;  %343 = vst [vmem:[#allocation2 + $0x44] sm:$0x1] %v3468_v3  ;;  %s2911_s16 = sshll.u32 %s4169_s22, 5  ;;  %vm457_vm1 = vcmask 1040384  }
   0xf   : > { %344 = vst [vmem:[#allocation2 + $0x48] sm:$0xf] %v3468_v3  ;;  %345 = vst [vmem:[#allocation2 + $0x4c] sm:$0x1] %v3468_v3  ;;  %3076 = vmatpush3.bf16.msra.mxu1 %v3380_v5  ;;  %s3560_s25 = scalar_lea.vmem %s4152_s0, %s2911_s16  ;;  %v3577_v17 = vld [vmem:[%s4156_s4] ss:$0 sm:$0xff]  ;;  %s258_s8 = scalar_lea.vmem %s4157_s5, %s2911_s16 }
  0x10   : > { %3172 = vmatpush3.bf16.msra.mxu0 %v3381_v6  ;;  %3077 = vmatprep.subr.bf16.mxu1 %v3382_v7  ;;  %v2922_v12 = vld [vmem:[%s3560_s25] sm:$0xff]   ;;  %v2957_v27 = vld [vmem:[%s3560_s25 + $0x8] sm:$0xff]   ;;  %vm452_vm2 = vsmask.f32 7938  ;;  %vm458_vm3 = vsmask.f32 256 }
  0x11   : > { %3173 = vmatprep.subr.bf16.mxu0 %v3383_v8  ;;  %v2923_v15 = vunpack.c.l.bf16 %v2922_v12  ;;  %v2924_v16 = vunpack.c.h.bf16 %v2922_v12  ;;  %v3579_v18 = vld [vmem:[#allocation2] sm:$0xf]  ;;  %v2927_v30 = vunpack.c.l.bf16 %v2957_v27  ;;  %v2928_v31 = vunpack.c.h.bf16 %v2957_v27  ;;  %v3391_v34 = vld [vmem:[%s4153_s1 + $0x138] sm:$0xff]   ;;  %v3604_v39 = vld [vmem:[#allocation2 + $0x4] sm:$0x1]  ;;  %s2637_s16 = sshll.u32 %s4169_s22, 1 }
  0x12   : > { %v542_v21 = vshrl.u32 %v3579_v18, 16  ;;  %v545_v25 = vshll.u32 %v3579_v18, 16  ;;  %v3609_v40 = vld [vmem:[%s4153_s1] sm:$0xff]   ;;  %v454_v46 = vld [vmem:[#allocation2 + $0x8] sm:$0xf]  ;;  %vm3620_vm6 = vmand %vm451_vm0, %vm452_vm2  ;;  %v551_v61 = vshll.u32 %v3604_v39, 16  ;;  %s262_s11 = scalar_lea.vmem %s4158_s6, %s2637_s16 }
  0x13   : > { %3078 = vmatpush3.bf16.msra.mxu1 %v3382_v7  ;;  %v288_v19 = vmul.f32 %v2923_v15, %v3569_v13  ;;  %v289_v22 = vmul.f32 %v2924_v16, %v3569_v13  ;;  %v290_v37 = vmul.f32 %v2927_v30, %v3569_v13  ;;  %v291_v38 = vmul.f32 %v2928_v31, %v3569_v13  ;;  %v3614_v44 = vld [vmem:[%s4153_s1 + $0x140] sm:$0xff]   ;;  %v460_v47 = vld [vmem:[#allocation2 + $0xc] sm:$0x1]  ;;  %v463_v53 = vld [vmem:[#allocation2 + $0x10] sm:$0xf] }
  0x14   : > { %3174 = vmatpush3.bf16.msra.mxu0 %v3383_v8  ;;  %3079 = vmatprep.subr.bf16.mxu1 %v3384_v9  ;;  %v3597_v32 = vrot.slane %v542_v21, 4  ;;  %v547_v36 = vrot.slane %v545_v25, 5  ;;  %vm538_vm4 = vsmask.f32 3328  ;;  %vm539_vm5 = vsmask.f32 7440  ;;  %vm3626_vm7 = vmand %vm457_vm1, %vm458_vm3 }
  0x15   : > { %3175 = vmatprep.subr.bf16.mxu0 %v3385_v10  ;;  %v302_v24 = vadd.f32 %v3577_v17, %v288_v19  ;;  %v303_v26 = vadd.f32 %v3577_v17, %v289_v22  ;;  %v304_v45 = vadd.f32 %v3577_v17, %v290_v37  ;;  %v305_v50 = vadd.f32 %v3577_v17, %v291_v38  ;;  %v466_v54 = vld [vmem:[#allocation2 + $0x14] sm:$0x1]  ;;  %v475_v16 = vld [vmem:[#allocation2 + $0x20] sm:$0xf]  ;;  %v478_v19 = vld [vmem:[#allocation2 + $0x24] sm:$0x1] }
  0x16   : > { %v548_v63 = vor.u32 %v547_v36, %v3597_v32  ;;  %vm3649_vm8 = vmor %vm538_vm4, %vm539_vm5  ;;  %v965_v32 = vrot.slane %v3604_v39, 5  ;;  %vm960_vm9 = vcmask 1042432   ;;  %vm961_vm10 = vcmask 1046532   ;;  %v3416_v39 = vld [vmem:[%s4153_s1 + $0x98] sm:$0xff]   ;;  %v3456_v27 = vld [vmem:[%s4153_s1 + $0x220] sm:$0xff]  }
  0x17   : > { %3080 = vmatpush3.bf16.msra.mxu1 %v3384_v9  ;;  %v310_v29 = vmax.f32 %v302_v24, 0.0  ;;  %v311_v33 = vmax.f32 %v303_v26, 0.0  ;;  %v312_v55 = vmax.f32 %v304_v45, 0.0  ;;  %v313_v58 = vmax.f32 %v305_v50, 0.0  ;;  %v469_v9 = vld [vmem:[#allocation2 + $0x18] sm:$0xf]  ;;  %vm3868_vm11 = vmor %vm960_vm9, %vm961_vm10 }
  0x18   : > { %3176 = vmatpush3.bf16.msra.mxu0 %v3385_v10  ;;  %3081 = vmatprep.subr.bf16.mxu1 %v3386_v11  ;;  %v472_v10 = vld [vmem:[#allocation2 + $0x1c] sm:$0x1]  ;;  %v3645_v24 = vrot.slane %v551_v61, 5 }
  0x19   : > { %3177 = vmatprep.subr.bf16.mxu0 %v3387_v14  ;;  %v2913_v35 = vpack.c.bf16 %v310_v29, %v310_v29  ;;  %v2914_v41 = vpack.c.bf16 %v311_v33, %v311_v33  ;;  %v2915_v62 = vpack.c.bf16 %v312_v55, %v312_v55  ;;  %v2916_v2 = vpack.c.bf16 %v313_v58, %v313_v58 }
  0x1b   : > { %3082 = vmatpush3.bf16.msra.mxu1 %v3386_v11  ;;  %v371_v42 = vshrl.u32 %v2913_v35, 16  ;;  %v374_v43 = vshll.u32 %v2913_v35, 16  ;;  %v379_v48 = vshrl.u32 %v2914_v41, 16  ;;  %v382_v49 = vshll.u32 %v2914_v41, 16  ;;  %v3663_v35 = vld [vmem:[%s3560_s25 + $0x18] sm:$0xff]  }
  0x1c   : > { %3178 = vmatpush3.bf16.msra.mxu0 %v3387_v14  ;;  %3083 = vmatprep.subr.bf16.mxu1 %v3388_v20  ;;  %v387_v5 = vshrl.u32 %v2915_v62, 16  ;;  %v390_v6 = vshll.u32 %v2915_v62, 16  ;;  %v395_v11 = vshrl.u32 %v2916_v2, 16  ;;  %v398_v12 = vshll.u32 %v2916_v2, 16 }
  0x1d   : > { %3179 = vmatprep.subr.bf16.mxu0 %v3389_v23  ;;  %v373_v51 = vrot.slane %v371_v42, 7  ;;  %v381_v57 = vrot.slane %v379_v48, 7  ;;  %v2935_v58 = vunpack.c.l.bf16 %v3663_v35 }
  0x1e   : > { %v389_v14 = vrot.slane %v387_v5, 7  ;;  %v397_v15 = vrot.slane %v395_v11, 7 }
  0x1f   : > { %3084 = vmatpush3.bf16.msra.mxu1 %v3388_v20  ;;  %v376_v59 = vor.u32 %v374_v43, %v373_v51  ;;  %v377_v60 = vrot.slane %v373_v51, 4  ;;  %v384_v0 = vor.u32 %v382_v49, %v381_v57  ;;  %v385_v1 = vrot.slane %v381_v57, 4  ;;  %v2958_v20 = vld [vmem:[%s3560_s25 + $0x10] sm:$0xff]  }
  0x20   : > { %3180 = vmatpush3.bf16.msra.mxu0 %v3389_v23  ;;  %3085 = vmatprep.subr.bf16.mxu1 %v3390_v28  ;;  %v392_v21 = vor.u32 %v390_v6, %v389_v14  ;;  %v393_v22 = vrot.slane %v389_v14, 4  ;;  %v3643_v23 = vrot.slane %v548_v63, 4  ;;  %v400_v25 = vor.u32 %v398_v12, %v397_v15 }
  0x21   : > { %3181 = vmatprep.subr.bf16.mxu0 %v3391_v34  ;;  %v455_v3 = vsel %vm3620_vm6, %v376_v59, %v454_v46  ;;  %v461_v4 = vsel %vm3626_vm7, %v377_v60, %v460_v47  ;;  %v464_v7 = vsel %vm3620_vm6, %v384_v0, %v463_v53  ;;  %v467_v8 = vsel %vm3626_vm7, %v385_v1, %v466_v54 }
  0x22   : > { %456 = vst [vmem:[#allocation2 + $0x8] sm:$0xf] %v455_v3  ;;  %462 = vst [vmem:[#allocation2 + $0xc] sm:$0x1] %v461_v4  ;;  %v401_v26 = vrot.slane %v397_v15, 4  ;;  %v473_v29 = vsel %vm3626_vm7, %v393_v22, %v472_v10  ;;  %v2931_v30 = vunpack.c.l.bf16 %v2958_v20  ;;  %v2932_v31 = vunpack.c.h.bf16 %v2958_v20 }
  0x23   : > { %3086 = vmatpush3.bf16.msra.mxu1 %v3390_v28  ;;  %465 = vst [vmem:[#allocation2 + $0x10] sm:$0xf] %v464_v7  ;;  %468 = vst [vmem:[#allocation2 + $0x14] sm:$0x1] %v467_v8  ;;  %v470_v28 = vsel %vm3620_vm6, %v392_v21, %v469_v9  ;;  %v476_v33 = vsel %vm3620_vm6, %v400_v25, %v475_v16  ;;  %v554_v41 = vsel %vm3649_vm8, %v3643_v23, %v3645_v24 }
  0x24   : > { %3182 = vmatpush3.bf16.msra.mxu0 %v3391_v34  ;;  %3095 = vmatprep.subr.bf16.mxu1 %v3609_v40  ;;  %471 = vst [vmem:[#allocation2 + $0x18] sm:$0xf] %v470_v28  ;;  %474 = vst [vmem:[#allocation2 + $0x1c] sm:$0x1] %v473_v29  ;;  %v479_v34 = vsel %vm3626_vm7, %v401_v26, %v478_v19  ;;  %v292_v51 = vmul.f32 %v2931_v30, %v3569_v13  ;;  %v2936_v4 = vunpack.c.h.bf16 %v3663_v35 }
  0x25   : > { %3191 = vmatprep.subr.bf16.mxu0 %v3614_v44  ;;  %477 = vst [vmem:[#allocation2 + $0x20] sm:$0xf] %v476_v33  ;;  %480 = vst [vmem:[#allocation2 + $0x24] sm:$0x1] %v479_v34  ;;  %v293_v53 = vmul.f32 %v2932_v31, %v3569_v13 }
  0x29   : > { %v3665_v36 = vld [vmem:[#allocation2 + $0x8] sm:$0xf]  ;;  %v3667_v37 = vld [vmem:[#allocation2 + $0xc] sm:$0x1] }
  0x2a   : > { %v1319_v38 = vld [vmem:[#allocation2 + $0x8] sm:$0xf]  ;;  %v556_v42 = vshrl.u32 %v3665_v36, 16  ;;  %v559_v43 = vshll.u32 %v3665_v36, 16  ;;  %v565_v45 = vshll.u32 %v3667_v37, 16 }
  0x2b   : > { %v3676_v46 = vld [vmem:[#allocation2 + $0xc] sm:$0x1]  ;;  %v1321_v47 = vld [vmem:[#allocation2 + $0x10] sm:$0xf]  ;;  %v3678_v48 = vld [vmem:[#allocation2 + $0x14] sm:$0x1] }
  0x2c   : > { %v1336_v49 = vshrl.u32 %v1319_v38, 16  ;;  %v1339_v50 = vshll.u32 %v1319_v38, 16  ;;  %v558_v54 = vrot.slane %v556_v42, 4  ;;  %v561_v55 = vrot.slane %v559_v43, 5  ;;  %v3684_v63 = vld [vmem:[#allocation2 + $0x10] sm:$0xf] }
  0x2d   : > { %v1345_v57 = vshll.u32 %v3676_v46, 16  ;;  %v1350_v61 = vshrl.u32 %v1321_v47, 16  ;;  %v1353_v62 = vshll.u32 %v1321_v47, 16  ;;  %v567_v1 = vrot.slane %v565_v45, 5  ;;  %v3687_v3 = vld [vmem:[#allocation2 + $0x14] sm:$0x1] }
  0x2e   : > { %v1338_v59 = vrot.slane %v1336_v49, 4  ;;  %v1341_v60 = vrot.slane %v1339_v50, 5  ;;  %v562_v0 = vor.u32 %v561_v55, %v558_v54  ;;  %v1359_v2 = vshll.u32 %v3678_v48, 16  ;;  %v3690_v9 = vld [vmem:[#allocation2 + $0x18] sm:$0xf] }
  0x2f   : > { %v1347_v6 = vrot.slane %v1345_v57, 5  ;;  %v1352_v7 = vrot.slane %v1350_v61, 4  ;;  %v1355_v8 = vrot.slane %v1353_v62, 5  ;;  %v570_v12 = vshrl.u32 %v3684_v63, 16  ;;  %v3694_v19 = vld [vmem:[#allocation2 + $0x1c] sm:$0x1] }
  0x30   : > { %v1342_v5 = vor.u32 %v1341_v60, %v1338_v59  ;;  %v563_v10 = vrot.slane %v562_v0, 4  ;;  %v1361_v11 = vrot.slane %v1359_v2, 5  ;;  %v573_v14 = vshll.u32 %v3684_v63, 16  ;;  %v1323_v26 = vld [vmem:[#allocation2 + $0x18] sm:$0xf] }
  0x31   : > { %v1356_v16 = vor.u32 %v1355_v8, %v1352_v7  ;;  %v579_v20 = vshll.u32 %v3687_v3, 16  ;;  %v584_v21 = vshrl.u32 %v3690_v9, 16  ;;  %v572_v23 = vrot.slane %v570_v12, 4  ;;  %v3703_v33 = vld [vmem:[#allocation2 + $0x1c] sm:$0x1] }
  0x32   : > { %v1343_v15 = vrot.slane %v1342_v5, 4  ;;  %v568_v22 = vsel %vm3649_vm8, %v563_v10, %v567_v1  ;;  %v575_v24 = vrot.slane %v573_v14, 5  ;;  %v587_v25 = vshll.u32 %v3690_v9, 16  ;;  %v1325_v43 = vld [vmem:[#allocation2 + $0x20] sm:$0xf] }
  0x33   : > { %v2664_v28 = vcombine.low %v554_v41, %v568_v22  ;;  %v1357_v30 = vrot.slane %v1356_v16, 4  ;;  %v581_v31 = vrot.slane %v579_v20, 5  ;;  %v586_v35 = vrot.slane %v584_v21, 4  ;;  %v3708_v47 = vld [vmem:[#allocation2 + $0x24] sm:$0x1]  ;;  %v3394_v21 = vld [vmem:[%s4153_s1 + $0x8] sm:$0xff]  }
  0x34   : > { %v1348_v29 = vsel %vm3649_vm8, %v1343_v15, %v1347_v6  ;;  %v576_v34 = vor.u32 %v575_v24, %v572_v23  ;;  %v589_v38 = vrot.slane %v587_v25, 5  ;;  %v593_v42 = vshll.u32 %v3694_v19, 16  ;;  %v3725_v23 = vld [vmem:[#allocation2 + $0x20] sm:$0xf] }
  0x35   : > { %3087 = vmatprep.mubr.bf16.mxu1 %v2664_v28  ;;  %v1362_v45 = vsel %vm3649_vm8, %v1357_v30, %v1361_v11  ;;  %v1364_v41 = vshrl.u32 %v1323_v26, 16  ;;  %v306_v49 = vadd.f32 %v3577_v17, %v292_v51  ;;  %v307_v50 = vadd.f32 %v3577_v17, %v293_v53 }
  0x36   : > { %v2768_v54 = vcombine.low %v1348_v29, %v1362_v45  ;;  %v577_v55 = vrot.slane %v576_v34, 4  ;;  %v590_v57 = vor.u32 %v589_v38, %v586_v35  ;;  %v595_v59 = vrot.slane %v593_v42, 5 }
  0x37   : > { %v1366_v60 = vrot.slane %v1364_v41, 4  ;;  %v1367_v61 = vshll.u32 %v1323_v26, 16  ;;  %v1373_v62 = vshll.u32 %v3703_v33, 16  ;;  %v1378_v0 = vshrl.u32 %v1325_v43, 16 }
  0x38   : > { %3183 = vmatprep.mubr.bf16.mxu0 %v2768_v54  ;;  %v582_v1 = vsel %vm3649_vm8, %v577_v55, %v581_v31  ;;  %v591_v2 = vrot.slane %v590_v57, 4  ;;  %v1381_v5 = vshll.u32 %v1325_v43, 16  ;;  %v1387_v6 = vshll.u32 %v3708_v47, 16  ;;  %v3731_v31 = vld [vmem:[#allocation2 + $0x24] sm:$0x1]  ;;  %v3396_v43 = vld [vmem:[%s4153_s1 + $0x10] sm:$0xff]  }
  0x39   : > { %v969_v51 = vrot.slane %v3667_v37, 5  ;;  %v1369_v53 = vrot.slane %v1367_v61, 5  ;;  %v1380_v7 = vrot.slane %v1378_v0, 4  ;;  %v294_v8 = vmul.f32 %v2935_v58, %v3569_v13  ;;  %v484_v54 = vld [vmem:[#allocation2 + $0x2c] sm:$0x1] }
  0x3a   : > { %v1627_v10 = vrot.slane %v3676_v46, 5  ;;  %v596_v11 = vsel %vm3649_vm8, %v591_v2, %v595_v59  ;;  %v1383_v12 = vrot.slane %v1381_v5, 5  ;;  %v295_v14 = vmul.f32 %v2936_v4, %v3569_v13  ;;  %v490_v0 = vld [vmem:[#allocation2 + $0x34] sm:$0x1] }
  0x3b   : > { %v2665_v15 = vcombine.low %v582_v1, %v596_v11  ;;  %v1370_v16 = vor.u32 %v1369_v53, %v1366_v60  ;;  %v1375_v20 = vrot.slane %v1373_v62, 5  ;;  %v314_v22 = vmax.f32 %v306_v49, 0.0  ;;  %v3395_v60 = vld [vmem:[%s4153_s1 + $0x148] sm:$0xff]   ;;  %v487_v62 = vld [vmem:[#allocation2 + $0x30] sm:$0xf]  ;;  %v3398_v11 = vld [vmem:[%s4153_s1 + $0x18] sm:$0xff]  }
  0x3c   : > { %v1631_v58 = vrot.slane %v3678_v48, 5  ;;  %v1384_v24 = vor.u32 %v1383_v12, %v1380_v7  ;;  %v1389_v25 = vrot.slane %v1387_v6, 5  ;;  %v315_v26 = vmax.f32 %v307_v50, 0.0  ;;  %v481_v50 = vld [vmem:[#allocation2 + $0x28] sm:$0xf] }
  0x3d   : > { %3088 = vmatmul.mubr.bf16.vlgmr.msra.gmra.mrb[0].mxu1 %v2665_v15  ;;  %v973_v28 = vrot.slane %v3687_v3, 5  ;;  %v1371_v29 = vrot.slane %v1370_v16, 4  ;;  %v2917_v13 = vpack.c.bf16 %v314_v22, %v314_v22  ;;  %v308_v4 = vadd.f32 %v3577_v17, %v294_v8  ;;  %v3397_v8 = vld [vmem:[%s4153_s1 + $0x150] sm:$0xff]  }
  0x3e   : > { %3096 = vmatpush3.bf16.msra.mxu1 %v3609_v40  ;;  %v1385_v30 = vrot.slane %v1384_v24, 4  ;;  %v598_v34 = vshrl.u32 %v3725_v23, 16  ;;  %v601_v35 = vshll.u32 %v3725_v23, 16  ;;  %v2918_v38 = vpack.c.bf16 %v315_v26, %v315_v26 }
  0x3f   : > { %v1376_v42 = vsel %vm3649_vm8, %v1371_v29, %v1375_v20  ;;  %3097 = vmatprep.subr.bf16.mxu1 %v3394_v21  ;;  %v403_v45 = vshrl.u32 %v2917_v13, 16  ;;  %v406_v41 = vshll.u32 %v2917_v13, 16  ;;  %v316_v49 = vmax.f32 %v308_v4, 0.0 }
  0x40   : > { %v1390_v40 = vsel %vm3649_vm8, %v1385_v30, %v1389_v25  ;;  %v411_v55 = vshrl.u32 %v2918_v38, 16  ;;  %v414_v57 = vshll.u32 %v2918_v38, 16  ;;  %v309_v2 = vadd.f32 %v3577_v17, %v295_v14  ;;  %v3400_v25 = vld [vmem:[%s4153_s1 + $0x20] sm:$0xff]  }
  0x41   : > { %v2769_v59 = vcombine.low %v1376_v42, %v1390_v40  ;;  %v405_v61 = vrot.slane %v403_v45, 7  ;;  %v2919_v1 = vpack.c.bf16 %v316_v49, %v316_v49  ;;  %v600_v5 = vrot.slane %v598_v34, 4  ;;  %v496_v34 = vld [vmem:[#allocation2 + $0x3c] sm:$0x1] }
  0x42   : > { %3098 = vmatpush3.bf16.msra.mxu1 %v3394_v21  ;;  %v603_v6 = vrot.slane %v601_v35, 5  ;;  %v607_v53 = vshll.u32 %v3731_v31, 16  ;;  %v413_v7 = vrot.slane %v411_v55, 7  ;;  %v493_v21 = vld [vmem:[#allocation2 + $0x38] sm:$0xf]  ;;  %v317_v22 = vmax.f32 %v309_v2, 0.0 }
  0x43   : > { %3184 = vmatmul.mubr.bf16.vlgmr.msra.gmra.mrb[0].mxu0 %v2769_v59  ;;  %3099 = vmatprep.subr.bf16.mxu1 %v3396_v43  ;;  %v408_v12 = vor.u32 %v406_v41, %v405_v61  ;;  %v409_v15 = vrot.slane %v405_v61, 4  ;;  %v419_v16 = vshrl.u32 %v2919_v1, 16  ;;  %v422_v17 = vshll.u32 %v2919_v1, 16  ;;  %v3399_v42 = vld [vmem:[%s4153_s1 + $0x158] sm:$0xff]   ;;  %v3770_v41 = vld [vmem:[#allocation2 + $0x8] sm:$0xe] }
  0x44   : > { %3192 = vmatpush3.bf16.msra.mxu0 %v3614_v44  ;;  %v416_v14 = vor.u32 %v414_v57, %v413_v7  ;;  %v417_v20 = vrot.slane %v413_v7, 4  ;;  %v977_v24 = vrot.slane %v3694_v19, 5  ;;  %v604_v44 = vor.u32 %v603_v6, %v600_v5  ;;  %v3402_v55 = vld [vmem:[%s4153_s1 + $0x28] sm:$0xff]   ;;  %v3401_v1 = vld [vmem:[%s4153_s1 + $0x160] sm:$0xff]  }
  0x45   : > { %3193 = vmatprep.subr.bf16.mxu0 %v3395_v60  ;;  %v482_v26 = vsel %vm3620_vm6, %v408_v12, %v481_v50  ;;  %v485_v29 = vsel %vm3626_vm7, %v409_v15, %v484_v54  ;;  %v421_v13 = vrot.slane %v419_v16, 7  ;;  %v2920_v35 = vpack.c.bf16 %v317_v22, %v317_v22 }
  0x46   : > { %3100 = vmatpush3.bf16.msra.mxu1 %v3396_v43  ;;  %483 = vst [vmem:[#allocation2 + $0x28] sm:$0xf] %v482_v26  ;;  %486 = vst [vmem:[#allocation2 + $0x2c] sm:$0x1] %v485_v29  ;;  %v488_v4 = vsel %vm3620_vm6, %v416_v14, %v487_v62  ;;  %v491_v30 = vsel %vm3626_vm7, %v417_v20, %v490_v0  ;;  %v1635_v38 = vrot.slane %v3703_v33, 5  ;;  %v1639_v49 = vrot.slane %v3708_v47, 5 }
  0x47   : > { %3101 = vmatprep.subr.bf16.mxu1 %v3398_v11  ;;  %489 = vst [vmem:[#allocation2 + $0x30] sm:$0xf] %v488_v4  ;;  %492 = vst [vmem:[#allocation2 + $0x34] sm:$0x1] %v491_v30  ;;  %v424_v43 = vor.u32 %v422_v17, %v421_v13  ;;  %v425_v45 = vrot.slane %v421_v13, 4  ;;  %v3773_v40 = vrot.slane %v607_v53, 5 }
  0x48   : > { %3194 = vmatpush3.bf16.msra.mxu0 %v3395_v60  ;;  %v427_v50 = vshrl.u32 %v2920_v35, 16  ;;  %v430_v54 = vshll.u32 %v2920_v35, 16  ;;  %v3782_v61 = vrot.slane %v604_v44, 4  ;;  %v499_v62 = vld [vmem:[#allocation2 + $0x40] sm:$0xf]  ;;  %v2780_v6 = vrot.slane %v3770_v41, 9 }
  0x49   : > { %3195 = vmatprep.subr.bf16.mxu0 %v3397_v8  ;;  %v494_v57 = vsel %vm3620_vm6, %v424_v43, %v493_v21  ;;  %v497_v59 = vsel %vm3626_vm7, %v425_v45, %v496_v34  ;;  %v502_v0 = vld [vmem:[#allocation2 + $0x44] sm:$0x1]  ;;  %v3403_v35 = vld [vmem:[%s4153_s1 + $0x168] sm:$0xff]   ;;  %v938_v41 = vld [vmem:[#allocation2 + $0x10] sm:$0xe] }
  0x4a   : > { %3102 = vmatpush3.bf16.msra.mxu1 %v3398_v11  ;;  %495 = vst [vmem:[#allocation2 + $0x38] sm:$0xf] %v494_v57  ;;  %498 = vst [vmem:[#allocation2 + $0x3c] sm:$0x1] %v497_v59  ;;  %v429_v60 = vrot.slane %v427_v50, 7  ;;  %v3404_v11 = vld [vmem:[%s4153_s1 + $0x30] sm:$0xff]   ;;  %v610_v56 = vsel %vm3649_vm8, %v3782_v61, %v3773_v40 }
  0x4b   : > { %3103 = vmatprep.subr.bf16.mxu1 %v3400_v25  ;;  %v3406_v40 = vld [vmem:[%s4153_s1 + $0x38] sm:$0xff]   ;;  %v3414_v33 = vld [vmem:[%s4153_s1 + $0x90] sm:$0xff]  }
  0x4c   : > { %3196 = vmatpush3.bf16.msra.mxu0 %v3397_v8  ;;  %v432_v2 = vor.u32 %v430_v54, %v429_v60  ;;  %v433_v5 = vrot.slane %v429_v60, 4 }
  0x4d   : > { %3197 = vmatprep.subr.bf16.mxu0 %v3399_v42  ;;  %v3788_v53 = vld [vmem:[#allocation2 + $0x28] sm:$0xf]  ;;  %v3790_v7 = vld [vmem:[#allocation2 + $0x2c] sm:$0x1] }
  0x4e   : > { %v1327_v12 = vld [vmem:[#allocation2 + $0x28] sm:$0xf]  ;;  %3104 = vmatpush3.bf16.msra.mxu1 %v3400_v25  ;;  %v612_v15 = vshrl.u32 %v3788_v53, 16  ;;  %v615_v16 = vshll.u32 %v3788_v53, 16  ;;  %v621_v8 = vshll.u32 %v3790_v7, 16  ;;  %v500_v29 = vsel %vm3620_vm6, %v432_v2, %v499_v62 }
  0x4f   : > { %v3798_v17 = vld [vmem:[#allocation2 + $0x2c] sm:$0x1]  ;;  %v1392_v14 = vshrl.u32 %v1327_v12, 16  ;;  %3105 = vmatprep.subr.bf16.mxu1 %v3402_v55  ;;  %v1329_v20 = vld [vmem:[#allocation2 + $0x30] sm:$0xf]  ;;  %v1395_v22 = vshll.u32 %v1327_v12, 16  ;;  %v503_v25 = vsel %vm3626_vm7, %v433_v5, %v502_v0 }
  0x50   : > { %v3800_v21 = vld [vmem:[#allocation2 + $0x34] sm:$0x1]  ;;  %v1401_v26 = vshll.u32 %v3798_v17, 16  ;;  %3198 = vmatpush3.bf16.msra.mxu0 %v3399_v42  ;;  %v614_v13 = vrot.slane %v612_v15, 4  ;;  %v617_v44 = vrot.slane %v615_v16, 5  ;;  %v623_v4 = vrot.slane %v621_v8, 5 }
  0x51   : > { %v1394_v30 = vrot.slane %v1392_v14, 4  ;;  %v3807_v34 = vld [vmem:[#allocation2 + $0x30] sm:$0xf]  ;;  %501 = vst [vmem:[#allocation2 + $0x40] sm:$0xf] %v500_v29  ;;  %3199 = vmatprep.subr.bf16.mxu0 %v3401_v1  ;;  %v1397_v43 = vrot.slane %v1395_v22, 5 }
  0x52   : > { %504 = vst [vmem:[#allocation2 + $0x44] sm:$0x1] %v503_v25  ;;  %v1403_v52 = vrot.slane %v1401_v26, 5  ;;  %v1406_v45 = vshrl.u32 %v1329_v20, 16  ;;  %v1409_v50 = vshll.u32 %v1329_v20, 16  ;;  %3106 = vmatpush3.bf16.msra.mxu1 %v3402_v55  ;;  %v618_v42 = vor.u32 %v617_v44, %v614_v13  ;;  %v3405_v20 = vld [vmem:[%s4153_s1 + $0x170] sm:$0xff]  }
  0x53   : > { %v1415_v54 = vshll.u32 %v3800_v21, 16  ;;  %v3817_v57 = vld [vmem:[#allocation2 + $0x38] sm:$0xf]  ;;  %v3819_v59 = vld [vmem:[#allocation2 + $0x34] sm:$0x1]  ;;  %v626_v60 = vshrl.u32 %v3807_v34, 16  ;;  %3107 = vmatprep.subr.bf16.mxu1 %v3404_v11  ;;  %v1398_v62 = vor.u32 %v1397_v43, %v1394_v30 }
  0x54   : > { %v1408_v0 = vrot.slane %v1406_v45, 4  ;;  %v1411_v55 = vrot.slane %v1409_v50, 5  ;;  %v3822_v2 = vld [vmem:[#allocation2 + $0x3c] sm:$0x1]  ;;  %v629_v5 = vshll.u32 %v3807_v34, 16  ;;  %3200 = vmatpush3.bf16.msra.mxu0 %v3401_v1  ;;  %v619_v61 = vrot.slane %v618_v42, 4 }
  0x55   : > { %v1417_v12 = vrot.slane %v1415_v54, 5  ;;  %v628_v15 = vrot.slane %v626_v60, 4  ;;  %v635_v16 = vshll.u32 %v3819_v59, 16  ;;  %3201 = vmatprep.subr.bf16.mxu0 %v3403_v35  ;;  %v1399_v8 = vrot.slane %v1398_v62, 4  ;;  %v1331_v29 = vld [vmem:[#allocation2 + $0x38] sm:$0xf] }
  0x56   : > { %v1412_v14 = vor.u32 %v1411_v55, %v1408_v0  ;;  %v631_v22 = vrot.slane %v629_v5, 5  ;;  %v640_v26 = vshrl.u32 %v3817_v57, 16  ;;  %v624_v25 = vsel %vm3649_vm8, %v619_v61, %v623_v4  ;;  %3108 = vmatpush3.bf16.msra.mxu1 %v3404_v11  ;;  %v3837_v30 = vld [vmem:[#allocation2 + $0x3c] sm:$0x1]  ;;  %v3844_v4 = vld [vmem:[%s4153_s1 + $0x80] sm:$0xff]  }
  0x57   : > { %v637_v1 = vrot.slane %v635_v16, 5  ;;  %v643_v13 = vshll.u32 %v3817_v57, 16  ;;  %v649_v44 = vshll.u32 %v3822_v2, 16  ;;  %v2666_v43 = vcombine.low %v610_v56, %v624_v25  ;;  %3109 = vmatprep.subr.bf16.mxu1 %v3406_v40  ;;  %v1602_v60 = vld [vmem:[#allocation2 + $0x10] sm:$0xe] }
  0x58   : > { %v1404_v45 = vsel %vm3649_vm8, %v1399_v8, %v1403_v52  ;;  %v1413_v50 = vrot.slane %v1412_v14, 4  ;;  %v632_v42 = vor.u32 %v631_v22, %v628_v15  ;;  %v1333_v54 = vld [vmem:[#allocation2 + $0x40] sm:$0xf]  ;;  %3202 = vmatpush3.bf16.msra.mxu0 %v3403_v35  ;;  %v642_v62 = vrot.slane %v640_v26, 4  ;;  %v3846_v5 = vld [vmem:[#allocation2 + $0x18] sm:$0xe] }
  0x59   : > { %v645_v0 = vrot.slane %v643_v13, 5  ;;  %v651_v11 = vrot.slane %v649_v44, 5  ;;  %v1420_v55 = vshrl.u32 %v1331_v29, 16  ;;  %3091 = vmatprep.mubr.bf16.mxu1 %v2666_v43  ;;  %3203 = vmatprep.subr.bf16.mxu0 %v3405_v20  ;;  %v3850_v61 = vld [vmem:[#allocation2 + $0x44] sm:$0x1]  ;;  %v1423_v15 = vshll.u32 %v1331_v29, 16 }
  0x5a   : > { %v1418_v52 = vsel %vm3649_vm8, %v1413_v50, %v1417_v12  ;;  %v633_v56 = vrot.slane %v632_v42, 4  ;;  %v1429_v16 = vshll.u32 %v3837_v30, 16  ;;  %v3407_v35 = vld [vmem:[%s4153_s1 + $0x178] sm:$0xff]   ;;  %v1434_v26 = vshrl.u32 %v1333_v54, 16  ;;  %3110 = vmatpush3.bf16.msra.mxu1 %v3406_v40  ;;  %v1604_v44 = vld [vmem:[#allocation2 + $0x20] sm:$0xe] }
  0x5b   : > { %v2770_v8 = vcombine.low %v1404_v45, %v1418_v52  ;;  %v646_v14 = vor.u32 %v645_v0, %v642_v62  ;;  %v1422_v22 = vrot.slane %v1420_v55, 4  ;;  %v1425_v25 = vrot.slane %v1423_v15, 5  ;;  %3119 = vmatprep.subr.bf16.mxu1 %v3844_v4  ;;  %v3864_v40 = vld [vmem:[%s4153_s1 + $0x180] sm:$0xff]   ;;  %v3876_v52 = vld [vmem:[#allocation2 + $0x38] sm:$0xe] }
  0x5c   : > { %v1437_v13 = vshll.u32 %v1333_v54, 16  ;;  %v2781_v12 = vrot.slane %v1602_v60, 9  ;;  %v2782_v43 = vrot.slane %v3846_v5, 9  ;;  %v638_v29 = vsel %vm3649_vm8, %v633_v56, %v637_v1  ;;  %3204 = vmatpush3.bf16.msra.mxu0 %v3405_v20  ;;  %v1605_v54 = vld [vmem:[#allocation2 + $0x28] sm:$0xe] }
  0x5d   : > { %3187 = vmatprep.mubr.bf16.mxu0 %v2770_v8  ;;  %v647_v50 = vrot.slane %v646_v14, 4  ;;  %v1436_v42 = vrot.slane %v1434_v26, 4  ;;  %v1443_v45 = vshll.u32 %v3850_v61, 16  ;;  %v1426_v62 = vor.u32 %v1425_v25, %v1422_v22  ;;  %3205 = vmatprep.subr.bf16.mxu0 %v3407_v35  ;;  %v1606_v1 = vld [vmem:[#allocation2 + $0x30] sm:$0xe] }
  0x5e   : > { %v1431_v60 = vrot.slane %v1429_v16, 5  ;;  %v1439_v0 = vrot.slane %v1437_v13, 5  ;;  %v2676_v5 = vcombine.low %v3579_v18, %v3665_v36  ;;  %v936_v14 = vld [vmem:[#allocation2] sm:$0xe]  ;;  %v1628_v22 = vsel %vm3868_vm11, %v2780_v6, %v1627_v10  ;;  %v937_v26 = vld [vmem:[#allocation2 + $0x8] sm:$0xe] }
  0x5f   : > { %v652_v20 = vsel %vm3649_vm8, %v647_v50, %v651_v11  ;;  %v1427_v15 = vrot.slane %v1426_v62, 4  ;;  %v1445_v8 = vrot.slane %v1443_v45, 5  ;;  %v1632_v18 = vsel %vm3868_vm11, %v2781_v12, %v1631_v58  ;;  %v939_v58 = vld [vmem:[#allocation2 + $0x18] sm:$0xe] }
  0x60   : > { %v2667_v56 = vcombine.low %v638_v29, %v652_v20  ;;  %v1440_v16 = vor.u32 %v1439_v0, %v1436_v42  ;;  %3206 = vmatpush3.bf16.msra.mxu0 %v3407_v35  ;;  %v2783_v36 = vrot.slane %v1604_v44, 9  ;;  %v2784_v11 = vrot.slane %v1605_v54, 9  ;;  %v3420_v20 = vld [vmem:[%s4153_s1 + $0xa8] sm:$0xff]  }
  0x61   : > { %v1432_v25 = vsel %vm3649_vm8, %v1427_v15, %v1431_v60  ;;  %3215 = vmatprep.subr.bf16.mxu0 %v3864_v40  ;;  %v1643_v46 = vrot.slane %v3798_v17, 5  ;;  %v2785_v10 = vrot.slane %v1606_v1, 9  ;;  %v1647_v48 = vrot.slane %v3800_v21, 5  ;;  %v3412_v21 = vld [vmem:[%s4153_s1 + $0x88] sm:$0xff]   ;;  %v3429_v1 = vld [vmem:[#allocation2 + $0x10] ss:$8 sps:$4 sm:$0xff]  }
  0x62   : > { %3092 = vmatmul.mubr.bf16.gmra.mrb[4].mxu1 %v2667_v56  ;;  %v1441_v35 = vrot.slane %v1440_v16, 4  ;;  %v2786_v6 = vrot.slane %v3876_v52, 9  ;;  %v2690_v13 = vrot.slane %v938_v41, 9  ;;  %v2804_v44 = vcombine.low %v1628_v22, %v1632_v18  ;;  %v3421_v52 = vld [vmem:[%s4153_s1 + $0x1a8] sm:$0xff]   ;;  %v3423_v56 = vld [vmem:[%s4153_s1 + $0xb0] sm:$0xff]   ;;  %v3426_v22 = vld [vmem:[%s4153_s1 + $0xb8] sm:$0xff]  }
  0x63   : > { %3111 = vmatprep.mubr.bf16.mxu1 %v2676_v5  ;;  %v1651_v29 = vrot.slane %v3837_v30, 5  ;;  %v2691_v50 = vrot.slane %v939_v58, 9  ;;  %v2688_v45 = vrot.slane %v936_v14, 9  ;;  %v2689_v54 = vrot.slane %v937_v26, 9  ;;  %v3419_v5 = vld [vmem:[%s4153_s1 + $0x1a0] sm:$0xff]  }
  0x64   : > { %v1446_v12 = vsel %vm3649_vm8, %v1441_v35, %v1445_v8  ;;  %v2677_v17 = vcombine.low %v3684_v63, %v3690_v9  ;;  %v3906_v62 = vsel %vm3868_vm11, %v2690_v13, %v973_v28  ;;  %v2678_v63 = vcombine.low %v3725_v23, %v3788_v53  ;;  %v1608_v9 = vld [vmem:[#allocation2 + $0x40] sm:$0xe]  ;;  %v941_v16 = vld [vmem:[#allocation2 + $0x28] sm:$0xe]  ;;  %v1982_v8 = vld [vmem:[#allocation2 + $0x10] sm:$0xf] }
  0x65   : > { %v2771_v42 = vcombine.low %v1432_v25, %v1446_v12  ;;  %v3912_v30 = vsel %vm3868_vm11, %v2691_v50, %v977_v24  ;;  %v1636_v3 = vsel %vm3868_vm11, %v2782_v43, %v1635_v38  ;;  %v1640_v19 = vsel %vm3868_vm11, %v2783_v36, %v1639_v49  ;;  %v940_v15 = vld [vmem:[#allocation2 + $0x20] sm:$0xe]  ;;  %v1984_v14 = vld [vmem:[#allocation2 + $0x18] sm:$0xf]  ;;  %v3424_v25 = vld [vmem:[%s4153_s1 + $0x1b0] sm:$0xff]  }
  0x66   : > { %v2713_v60 = vcombine.low %v3906_v62, %v3912_v30  ;;  %v1644_v28 = vsel %vm3868_vm11, %v2784_v11, %v1643_v46  ;;  %v1648_v23 = vsel %vm3868_vm11, %v2785_v10, %v1647_v48  ;;  %v2805_v24 = vcombine.low %v1636_v3, %v1640_v19  ;;  %v942_v35 = vld [vmem:[#allocation2 + $0x30] sm:$0xe]  ;;  %v943_v46 = vld [vmem:[#allocation2 + $0x38] sm:$0xe]  ;;  %v3432_v3 = vld [vmem:[%s4153_s1 + $0xc8] sm:$0xff]  }
  0x67   : > { %3188 = vmatmul.mubr.bf16.gmra.mrb[4].mxu0 %v2771_v42  ;;  %v2787_v47 = vrot.slane %v1608_v9, 9  ;;  %v1655_v38 = vrot.slane %v3850_v61, 5  ;;  %v966_v49 = vsel %vm3868_vm11, %v2688_v45, %v965_v32  ;;  %v970_v53 = vsel %vm3868_vm11, %v2689_v54, %v969_v51  ;;  %v3415_v51 = vld [vmem:[%s4153_s1 + $0x190] sm:$0xff]   ;;  %v3427_v13 = vld [vmem:[%s4153_s1 + $0x1b8] sm:$0xff]  }
  0x68   : > { %3207 = vmatprep.mubr.bf16.mxu0 %v2804_v44  ;;  %v2806_v43 = vcombine.low %v1644_v28, %v1648_v23  ;;  %v2679_v0 = vcombine.low %v3807_v34, %v3817_v57  ;;  %v2712_v61 = vcombine.low %v966_v49, %v970_v53  ;;  %v1652_v32 = vsel %vm3868_vm11, %v2786_v6, %v1651_v29  ;;  %v3418_v57 = vld [vmem:[%s4153_s1 + $0xa0] sm:$0xff]   ;;  %v3999_v9 = vld [vmem:[#allocation2 + $0x1c] sm:$0x1]  ;;  %v3434_v49 = vld [vmem:[%s4153_s1 + $0xd0] sm:$0xff]  }
  0x69   : > { %v1656_v37 = vsel %vm3868_vm11, %v2787_v47, %v1655_v38  ;;  %v2692_v18 = vrot.slane %v940_v15, 9  ;;  %v981_v36 = vrot.slane %v3731_v31, 5  ;;  %v2693_v11 = vrot.slane %v941_v16, 9  ;;  %v3428_v31 = vld [vmem:[%s4153_s1 + $0xc0] sm:$0xff]   ;;  %v3433_v38 = vld [vmem:[%s4153_s1 + $0x1c8] sm:$0xff]  }
  0x6a   : > { %3112 = vmatmul.mubr.bf16.vlgmr.msra.gmra.mrb[0].mxu1 %v2677_v17  ;;  %v2807_v34 = vcombine.low %v1652_v32, %v1656_v37  ;;  %v985_v26 = vrot.slane %v3790_v7, 5  ;;  %v1999_v41 = vshrl.u32 %v1982_v8, 16  ;;  %v2002_v10 = vshll.u32 %v1982_v8, 16  ;;  %v3442_v62 = vld [vmem:[#allocation2 + $0x30] ss:$8 sps:$4 sm:$0xff]  }
  0x6b   : > { %3120 = vmatpush3.bf16.msra.mxu1 %v3844_v4  ;;  %3115 = vmatprep.mubr.bf16.mxu1 %v2678_v63  ;;  %v3413_v4 = vld [vmem:[%s4153_s1 + $0x188] sm:$0xff]   ;;  %v2013_v48 = vshrl.u32 %v1984_v14, 16  ;;  %v2016_v6 = vshll.u32 %v1984_v14, 16  ;;  %v982_v7 = vsel %vm3868_vm11, %v2692_v18, %v981_v36  ;;  %v2694_v12 = vrot.slane %v942_v35, 9  ;;  %v3997_v63 = vld [vmem:[#allocation2 + $0x14] sm:$0x1] }
  0x6c   : > { %3121 = vmatprep.subr.bf16.mxu1 %v3412_v21  ;;  %v986_v58 = vsel %vm3868_vm11, %v2693_v11, %v985_v26  ;;  %v989_v44 = vrot.slane %v3819_v59, 5  ;;  %v2695_v29 = vrot.slane %v943_v46, 9  ;;  %v993_v50 = vrot.slane %v3822_v2, 5  ;;  %v3430_v59 = vld [vmem:[%s4153_s1 + $0x1c0] sm:$0xff]   ;;  %v3440_v26 = vld [vmem:[%s4153_s1 + $0xe8] sm:$0xff]  }
  0x6d   : > { %v2001_v42 = vrot.slane %v1999_v41, 4  ;;  %v2004_v45 = vrot.slane %v2002_v10, 5  ;;  %v2015_v54 = vrot.slane %v2013_v48, 4  ;;  %v2018_v17 = vrot.slane %v2016_v6, 5  ;;  %v3431_v2 = vld [vmem:[#allocation2 + $0x20] ss:$8 sps:$4 sm:$0xff]  }
  0x6e   : > { %v990_v19 = vsel %vm3868_vm11, %v2694_v12, %v989_v44  ;;  %v994_v28 = vsel %vm3868_vm11, %v2695_v29, %v993_v50  ;;  %v2022_v47 = vshll.u32 %v3999_v9, 16  ;;  %v1986_v32 = vld [vmem:[#allocation2 + $0x20] sm:$0xf]  ;;  %v4046_v48 = vld [vmem:[#allocation2 + $0x2c] sm:$0x1]  ;;  %v3443_v44 = vld [vmem:[%s4153_s1 + $0xf0] sm:$0xff]  }
  0x6f   : > { %3208 = vmatmul.mubr.bf16.vlgmr.msra.gmra.mrb[0].mxu0 %v2805_v24  ;;  %3122 = vmatpush3.bf16.msra.mxu1 %v3412_v21  ;;  %v2714_v21 = vcombine.low %v982_v7, %v986_v58  ;;  %v2005_v23 = vor.u32 %v2004_v45, %v2001_v42  ;;  %v2008_v24 = vshll.u32 %v3997_v63, 16  ;;  %v2715_v30 = vcombine.low %v990_v19, %v994_v28  ;;  %v3439_v11 = vld [vmem:[%s4153_s1 + $0x1e0] sm:$0xff]   ;;  %v4050_v12 = vld [vmem:[#allocation2 + $0x3c] sm:$0x1]  ;;  %v1996_v50 = vld [vmem:[#allocation2 + $0x48] sm:$0xf] }
  0x70   : > { %3216 = vmatpush3.bf16.msra.mxu0 %v3864_v40  ;;  %3123 = vmatprep.subr.bf16.mxu1 %v3414_v33  ;;  %v3417_v40 = vld [vmem:[%s4153_s1 + $0x198] sm:$0xff]   ;;  %v2030_v15 = vshll.u32 %v1986_v32, 16  ;;  %v1994_v29 = vld [vmem:[#allocation2 + $0x40] sm:$0xf]  ;;  %v3441_v42 = vld [vmem:[%s4153_s1 + $0x1e8] sm:$0xff]   ;;  %v2078_v19 = vshll.u32 %v4050_v12, 16 }
  0x71   : > { %3217 = vmatprep.subr.bf16.mxu0 %v3413_v4  ;;  %3211 = vmatprep.mubr.bf16.mxu0 %v2806_v43  ;;  %v2010_v53 = vrot.slane %v2008_v24, 5  ;;  %v2024_v43 = vrot.slane %v2022_v47, 5  ;;  %v2083_v28 = vshrl.u32 %v1994_v29, 16  ;;  %v2097_v24 = vshrl.u32 %v1996_v50, 16  ;;  %v3446_v47 = vld [vmem:[%s4153_s1 + $0xf8] sm:$0xff]  }
  0x72   : > { %3116 = vmatmul.mubr.bf16.gmra.mrb[4].mxu1 %v2679_v0  ;;  %v3448_v0 = vld [vmem:[#allocation2 + $0x8] ss:$8 sps:$4 sm:$0xff]   ;;  %v2032_v46 = vrot.slane %v2030_v15, 5 }
  0x73   : > { %3124 = vmatpush3.bf16.msra.mxu1 %v3414_v33  ;;  %3135 = vmatprep.mubr.bf16.mxu1 %v2712_v61  ;;  %v2019_v33 = vor.u32 %v2018_v17, %v2015_v54  ;;  %v3436_v61 = vld [vmem:[%s4153_s1 + $0xd8] sm:$0xff]  }
  0x74   : > { %3218 = vmatpush3.bf16.msra.mxu0 %v3413_v4  ;;  %3125 = vmatprep.subr.bf16.mxu1 %v3416_v39 }
  0x75   : > { %3219 = vmatprep.subr.bf16.mxu0 %v3415_v51  ;;  %v2020_v4 = vrot.slane %v2019_v33, 4  ;;  %v2100_v33 = vshll.u32 %v1996_v50, 16 }
  0x77   : > { %3126 = vmatpush3.bf16.msra.mxu1 %v3416_v39  ;;  %3212 = vmatmul.mubr.bf16.gmra.mrb[4].mxu0 %v2807_v34  ;;  %v3435_v39 = vld [vmem:[%s4153_s1 + $0x1d0] sm:$0xff]   ;;  %v1988_v34 = vld [vmem:[#allocation2 + $0x28] sm:$0xf] }
  0x78   : > { %3220 = vmatpush3.bf16.msra.mxu0 %v3415_v51  ;;  %3127 = vmatprep.subr.bf16.mxu1 %v3418_v57  ;;  %v2025_v51 = vsel %vm3649_vm8, %v2020_v4, %v2024_v43  ;;  %v2041_v16 = vshrl.u32 %v1988_v34, 16  ;;  %v2044_v8 = vshll.u32 %v1988_v34, 16  ;;  %v2102_v34 = vrot.slane %v2100_v33, 5  ;;  %v3457_v33 = vld [vmem:[%s4153_s1 + $0x228] sm:$0xff]  }
  0x79   : > { %3221 = vmatprep.subr.bf16.mxu0 %v3417_v40  ;;  %3231 = vmatprep.mubr.bf16.mxu0 %v3429_v1  ;;  %v1992_v1 = vld [vmem:[#allocation2 + $0x38] sm:$0xf] }
  0x7a   : > { %v2069_v18 = vshrl.u32 %v1992_v1, 16  ;;  %v2072_v36 = vshll.u32 %v1992_v1, 16  ;;  %v2043_v41 = vrot.slane %v2041_v16, 4  ;;  %v2046_v10 = vrot.slane %v2044_v8, 5  ;;  %v2268_v1 = vld [vmem:[#allocation2 + $0x30] sm:$0xe] }
  0x7b   : > { %3128 = vmatpush3.bf16.msra.mxu1 %v3418_v57  ;;  %v3444_v57 = vld [vmem:[#allocation2 + $0x40] ss:$8 sps:$4 sm:$0xff]  }
  0x7c   : > { %3222 = vmatpush3.bf16.msra.mxu0 %v3417_v40  ;;  %3129 = vmatprep.subr.bf16.mxu1 %v3420_v20  ;;  %v1990_v40 = vld [vmem:[#allocation2 + $0x30] sm:$0xf]  ;;  %v2071_v7 = vrot.slane %v2069_v18, 4  ;;  %v2074_v58 = vrot.slane %v2072_v36, 5  ;;  %v2047_v17 = vor.u32 %v2046_v10, %v2043_v41  ;;  %v2310_v41 = vrot.slane %v4050_v12, 5 }
  0x7d   : > { %3223 = vmatprep.subr.bf16.mxu0 %v3419_v5  ;;  %v2055_v14 = vshrl.u32 %v1990_v40, 16  ;;  %v3452_v8 = vld [vmem:[#allocation2 + $0x28] ss:$8 sps:$4 sm:$0xff]  }
  0x7f   : > { %3130 = vmatpush3.bf16.msra.mxu1 %v3420_v20  ;;  %v3438_v20 = vld [vmem:[%s4153_s1 + $0xe0] sm:$0xff]   ;;  %v2057_v6 = vrot.slane %v2055_v14, 4 }
  0x80   : > { %3224 = vmatpush3.bf16.msra.mxu0 %v3419_v5  ;;  %3131 = vmatprep.subr.bf16.mxu1 %v3423_v56  ;;  %v2027_v5 = vshrl.u32 %v1986_v32, 16  ;;  %v2085_v32 = vrot.slane %v2083_v28, 4  ;;  %v3455_v28 = vld [vmem:[%s4153_s1 + $0x218] sm:$0xff]  }
  0x81   : > { %3225 = vmatprep.subr.bf16.mxu0 %v3421_v52 }
  0x82   : > { %v2029_v35 = vrot.slane %v2027_v5, 4  ;;  %v3449_v5 = vld [vmem:[#allocation2 + $0x18] ss:$8 sps:$4 sm:$0xff]  }
  0x83   : > { %3132 = vmatpush3.bf16.msra.mxu1 %v3423_v56 }
  0x84   : > { %3226 = vmatpush3.bf16.msra.mxu0 %v3421_v52  ;;  %3133 = vmatprep.subr.bf16.mxu1 %v3426_v22  ;;  %v3437_v52 = vld [vmem:[%s4153_s1 + $0x1d8] sm:$0xff]   ;;  %v2033_v45 = vor.u32 %v2032_v46, %v2029_v35 }
  0x85   : > { %3227 = vmatprep.subr.bf16.mxu0 %v3424_v25 }
  0x87   : > { %3134 = vmatpush3.bf16.msra.mxu1 %v3426_v22  ;;  %v2058_v22 = vshll.u32 %v1990_v40, 16  ;;  %v3447_v40 = vld [vmem:[%s4153_s1 + $0x1f8] sm:$0xff]  }
  0x88   : > { %3228 = vmatpush3.bf16.msra.mxu0 %v3424_v25  ;;  %3143 = vmatprep.subr.bf16.mxu1 %v3428_v31  ;;  %v4044_v25 = vld [vmem:[#allocation2 + $0x24] sm:$0x1] }
  0x89   : > { %3229 = vmatprep.subr.bf16.mxu0 %v3427_v13  ;;  %v2036_v54 = vshll.u32 %v4044_v25, 16 }
  0x8a   : > { %3136 = vmatmul.mubr.bf16.vlgmr.msra.gmra.mrb[0].mxu1 %v2713_v60  ;;  %v2006_v60 = vrot.slane %v2005_v23, 4  ;;  %v2086_v23 = vshll.u32 %v1994_v29, 16 }
  0x8b   : > { %3144 = vmatpush3.bf16.msra.mxu1 %v3428_v31  ;;  %3139 = vmatprep.mubr.bf16.mxu1 %v2714_v21  ;;  %v2060_v31 = vrot.slane %v2058_v22, 5  ;;  %v2050_v21 = vshll.u32 %v4046_v48, 16 }
  0x8c   : > { %3230 = vmatpush3.bf16.msra.mxu0 %v3427_v13  ;;  %3145 = vmatprep.subr.bf16.mxu1 %v3432_v3  ;;  %v2011_v37 = vsel %vm3649_vm8, %v2006_v60, %v2010_v53  ;;  %v4048_v13 = vld [vmem:[#allocation2 + $0x34] sm:$0x1] }
  0x8d   : > { %3239 = vmatprep.subr.bf16.mxu0 %v3430_v59  ;;  %v2860_v56 = vcombine.low %v2011_v37, %v2025_v51  ;;  %v2052_v60 = vrot.slane %v2050_v21, 5  ;;  %v2088_v37 = vrot.slane %v2086_v23, 5  ;;  %v2099_v51 = vrot.slane %v2097_v24, 4 }
  0x8e   : > { %v2306_v35 = vrot.slane %v4048_v13, 5 }
  0x8f   : > { %3232 = vmatmul.mubr.bf16.vlgmr.msra.gmra.mrb[0].mxu0 %v3431_v2  ;;  %3146 = vmatpush3.bf16.msra.mxu1 %v3432_v3  ;;  %v2061_v3 = vor.u32 %v2060_v31, %v2057_v6  ;;  %v2075_v2 = vor.u32 %v2074_v58, %v2071_v7  ;;  %v2089_v18 = vor.u32 %v2088_v37, %v2085_v32  ;;  %v2264_v58 = vld [vmem:[#allocation2 + $0x10] sm:$0xe]  ;;  %v2298_v37 = vrot.slane %v4044_v25, 5 }
  0x90   : > { %3240 = vmatpush3.bf16.msra.mxu0 %v3430_v59  ;;  %3147 = vmatprep.subr.bf16.mxu1 %v3434_v49  ;;  %v2064_v59 = vshll.u32 %v4048_v13, 16  ;;  %v2103_v36 = vor.u32 %v2102_v34, %v2099_v51  ;;  %v2302_v34 = vrot.slane %v4046_v48, 5 }
  0x91   : > { %3241 = vmatprep.subr.bf16.mxu0 %v3433_v38  ;;  %3235 = vmatprep.mubr.bf16.mxu0 %v3442_v62  ;;  %v2038_v62 = vrot.slane %v2036_v54, 5  ;;  %v2062_v53 = vrot.slane %v2061_v3, 4  ;;  %v2076_v43 = vrot.slane %v2075_v2, 4  ;;  %v2090_v29 = vrot.slane %v2089_v18, 4 }
  0x92   : > { %3140 = vmatmul.mubr.bf16.gmra.mrb[4].mxu1 %v2715_v30  ;;  %v2048_v30 = vrot.slane %v2047_v17, 4  ;;  %v2066_v4 = vrot.slane %v2064_v59, 5  ;;  %v2104_v50 = vrot.slane %v2103_v36, 4  ;;  %v2872_v54 = vrot.slane %v2264_v58, 9 }
  0x93   : > { %3148 = vmatpush3.bf16.msra.mxu1 %v3434_v49  ;;  %3159 = vmatprep.mubr.bf16.mxu1 %v3448_v0  ;;  %v2034_v49 = vrot.slane %v2033_v45, 4  ;;  %v2080_v0 = vrot.slane %v2078_v19, 5  ;;  %v3453_v45 = vld [vmem:[#allocation2 + $0x38] ss:$8 sps:$4 sm:$0xff]   ;;  %v2290_v17 = vrot.slane %v3997_v63, 5  ;;  %v2294_v3 = vrot.slane %v3999_v9, 5 }
  0x94   : > { %3242 = vmatpush3.bf16.msra.mxu0 %v3433_v38  ;;  %3149 = vmatprep.subr.bf16.mxu1 %v3436_v61  ;;  %v3445_v38 = vld [vmem:[%s4153_s1 + $0x1f0] sm:$0xff]   ;;  %v2067_v14 = vsel %vm3649_vm8, %v2062_v53, %v2066_v4  ;;  %v3459_v4 = vld [vmem:[%s4153_s1 + $0x238] sm:$0xff]  }
  0x95   : > { %3243 = vmatprep.subr.bf16.mxu0 %v3435_v39  ;;  %v2081_v22 = vsel %vm3649_vm8, %v2076_v43, %v2080_v0  ;;  %v2291_v63 = vsel %vm3868_vm11, %v2872_v54, %v2290_v17  ;;  %v2266_v43 = vld [vmem:[#allocation2 + $0x20] sm:$0xe]  ;;  %v2267_v0 = vld [vmem:[#allocation2 + $0x28] sm:$0xe] }
  0x96   : > { %v2862_v6 = vcombine.low %v2067_v14, %v2081_v22  ;;  %v2875_v51 = vrot.slane %v2267_v0, 9 }
  0x97   : > { %3150 = vmatpush3.bf16.msra.mxu1 %v3436_v61  ;;  %3236 = vmatmul.mubr.bf16.gmra.mrb[4].mxu0 %v3444_v57  ;;  %v4068_v61 = vld [vmem:[#allocation2 + $0x44] sm:$0x1] }
  0x98   : > { %3244 = vmatpush3.bf16.msra.mxu0 %v3435_v39  ;;  %3151 = vmatprep.subr.bf16.mxu1 %v3438_v20  ;;  %v4070_v39 = vld [vmem:[#allocation2 + $0x4c] sm:$0x1]  ;;  %v3450_v57 = vld [vmem:[%s4153_s1 + $0x200] sm:$0xff]   ;;  %v2092_v15 = vshll.u32 %v4068_v61, 16 }
  0x99   : > { %3245 = vmatprep.subr.bf16.mxu0 %v3437_v52  ;;  %3255 = vmatprep.mubr.bf16.mxu0 %v2860_v56  ;;  %v2053_v56 = vsel %vm3649_vm8, %v2048_v30, %v2052_v60  ;;  %v2106_v16 = vshll.u32 %v4070_v39, 16  ;;  %v2318_v30 = vrot.slane %v4070_v39, 5  ;;  %v2874_v39 = vrot.slane %v2266_v43, 9 }
  0x9a   : > { %v2094_v31 = vrot.slane %v2092_v15, 5 }
  0x9b   : > { %3152 = vmatpush3.bf16.msra.mxu1 %v3438_v20  ;;  %v2269_v20 = vld [vmem:[#allocation2 + $0x38] sm:$0xe]  ;;  %v2108_v7 = vrot.slane %v2106_v16, 5 }
  0x9c   : > { %3246 = vmatpush3.bf16.msra.mxu0 %v3437_v52  ;;  %3153 = vmatprep.subr.bf16.mxu1 %v3440_v26  ;;  %v2039_v52 = vsel %vm3649_vm8, %v2034_v49, %v2038_v62  ;;  %v2877_v46 = vrot.slane %v2269_v20, 9  ;;  %v2095_v2 = vsel %vm3649_vm8, %v2090_v29, %v2094_v31  ;;  %v2271_v49 = vld [vmem:[#allocation2 + $0x48] sm:$0xe]  ;;  %v2314_v62 = vrot.slane %v4068_v61, 5 }
  0x9d   : > { %3247 = vmatprep.subr.bf16.mxu0 %v3439_v11  ;;  %v2861_v10 = vcombine.low %v2039_v52, %v2053_v56  ;;  %v2109_v19 = vsel %vm3649_vm8, %v2104_v50, %v2108_v7  ;;  %v2879_v53 = vrot.slane %v2271_v49, 9 }
  0x9e   : > { %v2311_v12 = vsel %vm3868_vm11, %v2877_v46, %v2310_v41  ;;  %v2863_v23 = vcombine.low %v2095_v2, %v2109_v19 }
  0x9f   : > { %3154 = vmatpush3.bf16.msra.mxu1 %v3440_v26  ;;  %v2876_v26 = vrot.slane %v2268_v1, 9  ;;  %v2319_v61 = vsel %vm3868_vm11, %v2879_v53, %v2318_v30  ;;  %v2303_v1 = vsel %vm3868_vm11, %v2875_v51, %v2302_v34 }
  0xa0   : > { %3248 = vmatpush3.bf16.msra.mxu0 %v3439_v11  ;;  %3155 = vmatprep.subr.bf16.mxu1 %v3443_v44  ;;  %v3451_v11 = vld [vmem:[%s4153_s1 + $0x208] sm:$0xff]  }
  0xa1   : > { %3249 = vmatprep.subr.bf16.mxu0 %v3441_v42  ;;  %v2307_v13 = vsel %vm3868_vm11, %v2876_v26, %v2306_v35 }
  0xa2   : > { %v2898_v59 = vcombine.low %v2307_v13, %v2311_v12 }
  0xa3   : > { %3156 = vmatpush3.bf16.msra.mxu1 %v3443_v44  ;;  %v2265_v44 = vld [vmem:[#allocation2 + $0x18] sm:$0xe] }
  0xa4   : > { %3250 = vmatpush3.bf16.msra.mxu0 %v3441_v42  ;;  %3157 = vmatprep.subr.bf16.mxu1 %v3446_v47  ;;  %v3454_v42 = vld [vmem:[%s4153_s1 + $0x210] sm:$0xff]   ;;  %v2873_v21 = vrot.slane %v2265_v44, 9 }
  0xa5   : > { %3251 = vmatprep.subr.bf16.mxu0 %v3445_v38 }
  0xa6   : > { %v2295_v9 = vsel %vm3868_vm11, %v2873_v21, %v2294_v3 }
  0xa7   : > { %3158 = vmatpush3.bf16.msra.mxu1 %v3446_v47  ;;  %v2896_v24 = vcombine.low %v2291_v63, %v2295_v9  ;;  %v3458_v47 = vld [vmem:[%s4153_s1 + $0x230] sm:$0xff]  }
  0xa8   : > { %3252 = vmatpush3.bf16.msra.mxu0 %v3445_v38  ;;  %3287 = vmatprep.subr.bf16.mxu1 %v3450_v57  ;;  %v2270_v38 = vld [vmem:[#allocation2 + $0x40] sm:$0xe] }
  0xa9   : > { %3253 = vmatprep.subr.bf16.mxu0 %v3447_v40  ;;  %v2878_v60 = vrot.slane %v2270_v38, 9 }
  0xaa   : > { %3160 = vmatmul.mubr.bf16.vlgmr.msra.gmra.mrb[0].mxu1 %v3449_v5 }
  0xab   : > { %3295 = vmatpush3.bf16.msra.mxu1 %v3450_v57  ;;  %3163 = vmatprep.mubr.bf16.mxu1 %v3452_v8  ;;  %v2315_v32 = vsel %vm3868_vm11, %v2878_v60, %v2314_v62 }
  0xac   : > { %3254 = vmatpush3.bf16.msra.mxu0 %v3447_v40  ;;  %3288 = vmatprep.subr.bf16.mxu1 %v3451_v11  ;;  %v2299_v40 = vsel %vm3868_vm11, %v2874_v39, %v2298_v37 }
  0xad   : > { %3263 = vmatprep.subr.bf16.mxu0 %v3450_v57  ;;  %v2897_v20 = vcombine.low %v2299_v40, %v2303_v1 }
  0xaf   : > { %3256 = vmatmul.mubr.bf16.vlgmr.msra.gmra.mrb[0].mxu0 %v2861_v10  ;;  %3296 = vmatpush3.bf16.msra.mxu1 %v3451_v11 }
  0xb0   : > { %3264 = vmatpush3.bf16.msra.mxu0 %v3450_v57  ;;  %3259 = vmatprep.mubr.bf16.mxu0 %v2862_v6  ;;  %v2899_v57 = vcombine.low %v2315_v32, %v2319_v61  ;;  %v2908_v6 = vld [vmem:[%s4154_s2] ss:$0 sm:$0xff] }
  0xb1   : > { %3265 = vmatprep.subr.bf16.mxu0 %v3451_v11  ;;  %3289 = vmatprep.subr.bf16.mxu1 %v3454_v42 }
  0xb2   : > { %3164 = vmatmul.mubr.bf16.gmra.mrb[4].mxu1 %v3453_v45 }
  0xb3   : > { %3297 = vmatpush3.bf16.msra.mxu1 %v3454_v42  ;;  %3283 = vmatprep.mubr.bf16.mxu1 %v2898_v59 }
  0xb4   : > { %3266 = vmatpush3.bf16.msra.mxu0 %v3451_v11  ;;  %3290 = vmatprep.subr.bf16.mxu1 %v3455_v28 }
  0xb5   : > { %3267 = vmatprep.subr.bf16.mxu0 %v3454_v42 }
  0xb7   : > { %3260 = vmatmul.mubr.bf16.gmra.mrb[4].mxu0 %v2863_v23  ;;  %3298 = vmatpush3.bf16.msra.mxu1 %v3455_v28 }
  0xb8   : > { %3268 = vmatpush3.bf16.msra.mxu0 %v3454_v42  ;;  %3291 = vmatprep.subr.bf16.mxu1 %v3456_v27 }
  0xb9   : > { %3269 = vmatprep.subr.bf16.mxu0 %v3455_v28  ;;  %3279 = vmatprep.mubr.bf16.mxu0 %v2896_v24 }
  0xbb   : > { %3299 = vmatpush3.bf16.msra.mxu1 %v3456_v27 }
  0xbc   : > { %3270 = vmatpush3.bf16.msra.mxu0 %v3455_v28  ;;  %3292 = vmatprep.subr.bf16.mxu1 %v3457_v33 }
  0xbd   : > { %3271 = vmatprep.subr.bf16.mxu0 %v3456_v27 }
  0xbf   : > { %3300 = vmatpush3.bf16.msra.mxu1 %v3457_v33 }
  0xc0   : > { %3272 = vmatpush3.bf16.msra.mxu0 %v3456_v27  ;;  %3293 = vmatprep.subr.bf16.mxu1 %v3458_v47 }
  0xc1   : > { %3273 = vmatprep.subr.bf16.mxu0 %v3457_v33 }
  0xc3   : > { %3301 = vmatpush3.bf16.msra.mxu1 %v3458_v47 }
  0xc4   : > { %3274 = vmatpush3.bf16.msra.mxu0 %v3457_v33  ;;  %3294 = vmatprep.subr.bf16.mxu1 %v3459_v4 }
  0xc5   : > { %3275 = vmatprep.subr.bf16.mxu0 %v3458_v47 }
  0xc7   : > { %3302 = vmatpush3.bf16.msra.mxu1 %v3459_v4 }
  0xc8   : > { %3276 = vmatpush3.bf16.msra.mxu0 %v3458_v47 }
  0xc9   : > { %3277 = vmatprep.subr.bf16.mxu0 %v3459_v4 }
  0xca   : > { %3284 = vmatmul.mubr.bf16.vlgmr.msra.gmra.mrb[8].mxu1 %v2899_v57 }
  0xcc   : > { %3278 = vmatpush3.bf16.msra.mxu0 %v3459_v4 }
  0xcf   : > { %3280 = vmatmul.mubr.bf16.vlgmr.msra.gmra.mrb[0].mxu0 %v2897_v20 }
 0x17d   : > { %v3161_v5 = vpop.f32.mrb[0].mxu1 }
 0x17e   : > { %v1280_v25 = vpop.f32.mrb[1].mxu1 }
 0x17f   : > { %v3162_v52 = vpop.f32.mrb[2].mxu1 }
 0x180   : > { %v1283_v56 = vpop.f32.mrb[3].mxu1 }
 0x185   : > { %v3165_v48 = vpop.f32.mrb[4].mxu1 }
 0x186   : > { %v1296_v15 = vpop.f32.mrb[5].mxu1 }
 0x187   : > { %v3166_v16 = vpop.f32.mrb[6].mxu1 }
 0x188   : > { %v1299_v8 = vpop.f32.mrb[7].mxu1 }
 0x18a   : > { %v3261_v14 = vpop.f32.mrb[4].mxu0 }
 0x18b   : > { %v3307_v22 = vadd.f32 %v3261_v14, %v3165_v48  ;;  %v2241_v18 = vpop.f32.mrb[5].mxu0 }
 0x18c   : > { %v3309_v36 = vadd.f32 %v2241_v18, %v1296_v15  ;;  %v3262_v11 = vpop.f32.mrb[6].mxu0 }
 0x18d   : > { %v3311_v55 = vadd.f32 %v3262_v11, %v3166_v16  ;;  %v2244_v26 = vpop.f32.mrb[7].mxu0 }
 0x18e   : > { %v3313_v35 = vadd.f32 %v2244_v26, %v1299_v8 }
 0x19d   : > { %v3285_v46 = vpop.f32.mrb[8].mxu1 }
 0x19e   : > { %v3308_v41 = vadd.f32 %v3307_v22, %v3285_v46  ;;  %v2451_v10 = vpop.f32.mrb[9].mxu1 }
 0x19f   : > { %v3310_v31 = vadd.f32 %v3309_v36, %v2451_v10  ;;  %v3286_v7 = vpop.f32.mrb[10].mxu1 }
 0x1a0   : > { %v3312_v58 = vadd.f32 %v3311_v55, %v3286_v7  ;;  %v2454_v44 = vpop.f32.mrb[11].mxu1  ;;  %v2486_v13 = vadd.f32 %v3308_v41, %v2908_v6 }
 0x1a1   : > { %v3314_v29 = vadd.f32 %v3313_v35, %v2454_v44  ;;  %v2484_v54 = vadd.f32 %v3310_v31, %v2908_v6 }
 0x1a2   : > { %v3281_v50 = vpop.f32.mrb[0].mxu0  ;;  %v2487_v12 = vadd.f32 %v3312_v58, %v2908_v6  ;;  %v2508_v57 = vmul.f32 %v2486_v13, %v2486_v13 }
 0x1a3   : > { %v3303_v42 = vadd.f32 %v3281_v50, %v3161_v5  ;;  %v2435_v45 = vpop.f32.mrb[1].mxu0  ;;  %v2485_v17 = vadd.f32 %v3314_v29, %v2908_v6  ;;  %v2506_v32 = vmul.f32 %v2484_v54, %v2484_v54 }
 0x1a4   : > { %v3304_v21 = vadd.f32 %v2435_v45, %v1280_v25  ;;  %v3282_v3 = vpop.f32.mrb[2].mxu0  ;;  %v2955_v59 = vpack.c.bf16 %v2487_v12, %v2486_v13  ;;  %v2509_v20 = vmul.f32 %v2487_v12, %v2487_v12 }
 0x1a5   : > { %v3305_v2 = vadd.f32 %v3282_v3, %v3162_v52  ;;  %v2438_v19 = vpop.f32.mrb[3].mxu0  ;;  %v2950_v28 = vpack.c.bf16 %v2485_v17, %v2484_v54  ;;  %v2482_v23 = vadd.f32 %v3303_v42, %v2908_v6  ;;  %v2507_v51 = vmul.f32 %v2485_v17, %v2485_v17 }
 0x1a6   : > { %v2480_v63 = vadd.f32 %v3304_v21, %v2908_v6  ;;  %2962 = vst [vmem:[%s258_s8 + $0x18] sm:$0xff] %v2955_v59   ;;  %v3306_v9 = vadd.f32 %v2438_v19, %v1283_v56 }
 0x1a7   : > { %v2483_v27 = vadd.f32 %v3305_v2, %v2908_v6  ;;  %2961 = vst [vmem:[%s258_s8 + $0x10] sm:$0xff] %v2950_v28   ;;  %v2504_v30 = vmul.f32 %v2482_v23, %v2482_v23 }
 0x1a8   : > { %v2481_v24 = vadd.f32 %v3306_v9, %v2908_v6  ;;  %v2502_v47 = vmul.f32 %v2480_v63, %v2480_v63 }
 0x1a9   : > { %v2945_v33 = vpack.c.bf16 %v2483_v27, %v2482_v23  ;;  %v2505_v4 = vmul.f32 %v2483_v27, %v2483_v27 }
 0x1aa   : > { %v2488_v38 = vadd.f32 %v2481_v24, %v2480_v63  ;;  %v2503_v49 = vmul.f32 %v2481_v24, %v2481_v24  ;;  %v2940_v62 = vpack.c.bf16 %v2481_v24, %v2480_v63 }
 0x1ab   : > { %2960 = vst [vmem:[%s258_s8 + $0x8] sm:$0xff] %v2945_v33  }
 0x1ac   : > { %v2489_v60 = vadd.f32 %v2488_v38, %v2482_v23  ;;  %v2510_v53 = vadd.f32 %v2503_v49, %v2502_v47  ;;  %2941 = vst [vmem:[%s258_s8] sm:$0xff] %v2940_v62  }
 0x1ae   : > { %v2511_v43 = vadd.f32 %v2510_v53, %v2504_v30  ;;  %v2490_v0 = vadd.f32 %v2489_v60, %v2483_v27 }
 0x1b0   : > { %v2491_v61 = vadd.f32 %v2490_v0, %v2484_v54  ;;  %v2512_v39 = vadd.f32 %v2511_v43, %v2505_v4 }
 0x1b2   : > { %v2492_v37 = vadd.f32 %v2491_v61, %v2485_v17  ;;  %v2513_v34 = vadd.f32 %v2512_v39, %v2506_v32 }
 0x1b4   : > { %v2493_v40 = vadd.f32 %v2492_v37, %v2486_v13  ;;  %v2514_v1 = vadd.f32 %v2513_v34, %v2507_v51 }
 0x1b6   : > { %v2494_v5 = vadd.f32 %v2493_v40, %v2487_v12  ;;  %v2515_v25 = vadd.f32 %v2514_v1, %v2508_v57 }
 0x1b8   : > { %v2495_v52 = vrot.slane %v2494_v5, 4  ;;  %v2516_v56 = vadd.f32 %v2515_v25, %v2509_v20 }
 0x1ba   : > { %v2496_v48 = vadd.f32 %v2495_v52, %v2494_v5  ;;  %v2517_v15 = vrot.slane %v2516_v56, 4 }
 0x1bc   : > { %v2497_v16 = vrot.slane %v2496_v48, 2  ;;  %v2518_v8 = vadd.f32 %v2517_v15, %v2516_v56 }
 0x1be   : > { %v2498_v14 = vadd.f32 %v2497_v16, %v2496_v48  ;;  %v2519_v22 = vrot.slane %v2518_v8, 2 }
 0x1c0   : > { %v2499_v18 = vrot.slane %v2498_v14, 1  ;;  %v2520_v36 = vadd.f32 %v2519_v22, %v2518_v8 }
 0x1c2   : > { %v2500_v11 = vadd.f32 %v2499_v18, %v2498_v14  ;;  %v2521_v55 = vrot.slane %v2520_v36, 1 }
 0x1c4   : > { %v2522_v26 = vadd.f32 %v2521_v55, %v2520_v36  ;;  %2540 = vst [vmem:[%s262_s11] sm:$0x1] %v2500_v11 }
 0x1c6   : > { %2541 = vst [vmem:[%s262_s11 + $0x1] sm:$0x1] %v2522_v26 }
 0x1c7 PF: > { %s17_s21 = sadd.s32 1, %s3466_s21  }
 0x1c8   : > { %p14_p4 = scmp.ge.s32.totalorder %s17_s21, 4  }
 0x1ca   :  { %16 = sbr.rel (!%p14_p4) target bundleno = 1 (0x1), region = 92 }

// kernel: down_block_forward.3
= control target key start
LH: loop header
LB: loop body
LE: loop exit
PB: predicated region body
PF: predicated region fallthrough
CT: control target
= control target key end

     0   :  { %s3464_s21 = smov 0   ;;  %s4087_s0 = inlined_call_operand.vmem [shape: bf16[2,2,2,8,8,128], index: 0, kind: input, shape index: {}]   ;;  %s4088_s1 = inlined_call_operand.vmem [shape: bf16[3,3,128,128], index: 1, kind: input, shape index: {}]   ;;  %s4089_s2 = inlined_call_operand.vmem [shape: f32[1,128], index: 2, kind: input, shape index: {}]   ;;  %s4090_s3 = inlined_call_operand.vmem [shape: f32[1,128], index: 3, kind: input, shape index: {}]   ;;  %s4091_s4 = inlined_call_operand.vmem [shape: f32[1,128], index: 4, kind: input, shape index: {}]   ;;  %s4092_s5 = inlined_call_operand.vmem [shape: bf16[2,8,8,128], index: 5, kind: output, shape index: {0}]   ;;  %s4093_s6 = inlined_call_operand.vmem [shape: f32[2,2,128], index: 6, kind: output, shape index: {1}]  }
   0x1 LB: > { %s2601_s3 = sadd.s32 4294967295, %s3426_s21   ;;  %p2605_p0 = scmp.ge.s32.totalorder %s3426_s21, 1  ;;  %s3426_s21 = sphi %s3464_s21, %s17_s21  }
   0x2   : > { %p215_p1 = scmp.lt.s32.totalorder %s3426_s21, 3 }
   0x4   : > { %p216_p2 = pnand %p2605_p0, %p215_p1 }
   0x5   : > { %v3336_v0 = vld [vmem:[%s4088_s1 + $0x40] sm:$0xff] (!%p216_p2)   ;;  %v3338_v2 = vld [vmem:[%s4088_s1 + $0x48] sm:$0xff] (!%p216_p2)   ;;  %p3483_p3 = scmp.lt.s32.totalorder (!%p216_p2), %s2601_s3, 1  ;;  %v3428_v3 = vmov (!%p216_p2), 0   ;;  %v3340_v5 = vld [vmem:[%s4088_s1 + $0x50] sm:$0xff] (!%p216_p2)   ;;  %vm424_vm0 = vcmask (!%p216_p2), 1043456  }
   0x6   : > { %219 = sbr.rel (%p216_p2) target bundleno = 451 (0x1c3), region = 40  ;;  %v3337_v1 = vld [vmem:[%s4088_s1 + $0x100] sm:$0xff] (!%p216_p2)   ;;  %3031 = vmatprep.subr.bf16.mxu1 (!%p216_p2), %v3336_v0  ;;  %323 = vst [vmem:[#allocation2] sm:$0xf] (!%p216_p2), %v3428_v3  ;;  %324 = vst [vmem:[#allocation2 + $0x4] sm:$0x1] (!%p216_p2), %v3428_v3 }
   0x7   : > { %325 = vst [vmem:[#allocation2 + $0x8] sm:$0xf] (!%p216_p2), %v3428_v3  ;;  %326 = vst [vmem:[#allocation2 + $0xc] sm:$0x1] (!%p216_p2), %v3428_v3  ;;  %3127 = vmatprep.subr.bf16.mxu0 (!%p216_p2), %v3337_v1  ;;  %3032 = vmatpush3.bf16.msra.mxu1 (!%p216_p2), %v3336_v0  ;;  %v3339_v4 = vld [vmem:[%s4088_s1 + $0x108] sm:$0xff] (!%p216_p2)   ;;  %v3341_v6 = vld [vmem:[%s4088_s1 + $0x110] sm:$0xff] (!%p216_p2)  }
   0x8   : > { %327 = vst [vmem:[#allocation2 + $0x10] sm:$0xf] (!%p216_p2), %v3428_v3  ;;  %328 = vst [vmem:[#allocation2 + $0x14] sm:$0x1] (!%p216_p2), %v3428_v3  ;;  %3128 = vmatpush3.bf16.msra.mxu0 (!%p216_p2), %v3337_v1  ;;  %3033 = vmatprep.subr.bf16.mxu1 (!%p216_p2), %v3338_v2  ;;  %v3342_v7 = vld [vmem:[%s4088_s1 + $0x58] sm:$0xff] (!%p216_p2)   ;;  %v3344_v9 = vld [vmem:[%s4088_s1 + $0x60] sm:$0xff] (!%p216_p2)  }
   0x9   : > { %329 = vst [vmem:[#allocation2 + $0x18] sm:$0xf] (!%p216_p2), %v3428_v3  ;;  %330 = vst [vmem:[#allocation2 + $0x1c] sm:$0x1] (!%p216_p2), %v3428_v3  ;;  %3129 = vmatprep.subr.bf16.mxu0 (!%p216_p2), %v3339_v4  ;;  %v3343_v8 = vld [vmem:[%s4088_s1 + $0x118] sm:$0xff] (!%p216_p2)   ;;  %v3345_v10 = vld [vmem:[%s4088_s1 + $0x120] sm:$0xff] (!%p216_p2)  }
   0xa   : > { %331 = vst [vmem:[#allocation2 + $0x20] sm:$0xf] (!%p216_p2), %v3428_v3  ;;  %332 = vst [vmem:[#allocation2 + $0x24] sm:$0x1] (!%p216_p2), %v3428_v3  ;;  %v3346_v11 = vld [vmem:[%s4088_s1 + $0x68] sm:$0xff] (!%p216_p2)   ;;  %v3348_v19 = vld [vmem:[%s4088_s1 + $0x70] sm:$0xff] (!%p216_p2)  }
   0xb   : > { %333 = vst [vmem:[#allocation2 + $0x28] sm:$0xf] (!%p216_p2), %v3428_v3  ;;  %334 = vst [vmem:[#allocation2 + $0x2c] sm:$0x1] (!%p216_p2), %v3428_v3  ;;  %3034 = vmatpush3.bf16.msra.mxu1 (!%p216_p2), %v3338_v2  ;;  %v3347_v15 = vld [vmem:[%s4088_s1 + $0x128] sm:$0xff] (!%p216_p2)   ;;  %v3349_v20 = vld [vmem:[%s4088_s1 + $0x130] sm:$0xff] (!%p216_p2)  }
   0xc   : > { %335 = vst [vmem:[#allocation2 + $0x30] sm:$0xf] (!%p216_p2), %v3428_v3  ;;  %336 = vst [vmem:[#allocation2 + $0x34] sm:$0x1] (!%p216_p2), %v3428_v3  ;;  %3130 = vmatpush3.bf16.msra.mxu0 (!%p216_p2), %v3339_v4  ;;  %3035 = vmatprep.subr.bf16.mxu1 (!%p216_p2), %v3340_v5  ;;  %vm430_vm1 = vcmask (!%p216_p2), 1040384   ;;  %v3350_v24 = vld [vmem:[%s4088_s1 + $0x78] sm:$0xff] (!%p216_p2)  }
   0xd   : > { %337 = vst [vmem:[#allocation2 + $0x38] sm:$0xf] %v3428_v3  ;;  %338 = vst [vmem:[#allocation2 + $0x3c] sm:$0x1] %v3428_v3  ;;  %s4104_s3 = smov (!%p3483_p3, %s2601_s3), 1  ;;  %3131 = vmatprep.subr.bf16.mxu0 %v3341_v6  ;;  %v3351_v28 = vld [vmem:[%s4088_s1 + $0x138] sm:$0xff]  }
   0xe   : > { %339 = vst [vmem:[#allocation2 + $0x40] sm:$0xf] %v3428_v3  ;;  %340 = vst [vmem:[#allocation2 + $0x44] sm:$0x1] %v3428_v3  ;;  %s2898_s14 = sshll.u32 %s4104_s3, 7  ;;  %v3570_v48 = vld [vmem:[%s4088_s1] sm:$0xff]  }
   0xf   : > { %341 = vst [vmem:[#allocation2 + $0x48] sm:$0xf] %v3428_v3  ;;  %342 = vst [vmem:[#allocation2 + $0x4c] sm:$0x1] %v3428_v3  ;;  %3036 = vmatpush3.bf16.msra.mxu1 %v3340_v5  ;;  %s3518_s4 = scalar_lea.vmem %s4087_s0, %s2898_s14  ;;  %vm425_vm2 = vsmask.f32 7938 }
  0x10   : > { %3132 = vmatpush3.bf16.msra.mxu0 %v3341_v6  ;;  %3037 = vmatprep.subr.bf16.mxu1 %v3342_v7  ;;  %v264_v12 = vld [vmem:[%s3518_s4] sm:$0xf]  ;;  %vm431_vm3 = vsmask.f32 256  ;;  %v265_v23 = vld [vmem:[%s3518_s4 + $0x4] sm:$0xf]  ;;  %vm3547_vm4 = vmand %vm424_vm0, %vm425_vm2 }
  0x11   : > { %3133 = vmatprep.subr.bf16.mxu0 %v3343_v8  ;;  %v2611_v13 = vld [vmem:[%s3518_s4 + $0x20] sm:$0xf]  ;;  %v2612_v27 = vld [vmem:[%s3518_s4 + $0x24] sm:$0xf]  ;;  %v427_v30 = vld [vmem:[#allocation2 + $0x8] sm:$0xf] }
  0x12   : > { %v2619_v14 = vld [vmem:[%s3518_s4 + $0x40] sm:$0xf]  ;;  %v281_v16 = vmax.bf16 %v2611_v13, %v264_v12  ;;  %v282_v31 = vmax.bf16 %v2612_v27, %v265_v23  ;;  %v2620_v32 = vld [vmem:[%s3518_s4 + $0x44] sm:$0xf]  ;;  %vm3555_vm5 = vmand %vm430_vm1, %vm431_vm3  ;;  %vm511_vm6 = vsmask.f32 3328 }
  0x13   : > { %3038 = vmatpush3.bf16.msra.mxu1 %v3342_v7  ;;  %v2627_v17 = vld [vmem:[%s3518_s4 + $0x60] sm:$0xf]  ;;  %v2628_v33 = vld [vmem:[%s3518_s4 + $0x64] sm:$0xf]  ;;  %v433_v36 = vld [vmem:[#allocation2 + $0xc] sm:$0x1] }
  0x14   : > { %3134 = vmatpush3.bf16.msra.mxu0 %v3343_v8  ;;  %3039 = vmatprep.subr.bf16.mxu1 %v3344_v9  ;;  %v307_v18 = vmax.bf16 %v2627_v17, %v2619_v14  ;;  %v3536_v22 = vld [vmem:[#allocation2] sm:$0xf]  ;;  %v3559_v37 = vld [vmem:[#allocation2 + $0x4] sm:$0x1]  ;;  %v308_v39 = vmax.bf16 %v2628_v33, %v2620_v32  ;;  %v266_v40 = vld [vmem:[%s3518_s4 + $0x8] sm:$0xf] }
  0x15   : > { %3135 = vmatprep.subr.bf16.mxu0 %v3345_v10  ;;  %v515_v38 = vshrl.u32 %v3536_v22, 16  ;;  %v518_v43 = vshll.u32 %v3536_v22, 16  ;;  %v2613_v45 = vld [vmem:[%s3518_s4 + $0x28] sm:$0xf]  ;;  %v524_v47 = vshll.u32 %v3559_v37, 16  ;;  %v3580_v54 = vld [vmem:[%s4088_s1 + $0x140] sm:$0xff]  }
  0x16   : > { %v315_v21 = vmax.bf16 %v307_v18, %v281_v16  ;;  %v316_v44 = vmax.bf16 %v308_v39, %v282_v31  ;;  %v2621_v46 = vld [vmem:[%s3518_s4 + $0x48] sm:$0xf]  ;;  %v283_v49 = vmax.bf16 %v2613_v45, %v266_v40  ;;  %vm512_vm7 = vsmask.f32 7440  ;;  %v267_v55 = vld [vmem:[%s3518_s4 + $0xc] sm:$0xf] }
  0x17   : > { %3040 = vmatpush3.bf16.msra.mxu1 %v3344_v9  ;;  %v2629_v50 = vld [vmem:[%s3518_s4 + $0x68] sm:$0xf]  ;;  %v2614_v56 = vld [vmem:[%s3518_s4 + $0x2c] sm:$0xf]  ;;  %v517_v57 = vrot.slane %v515_v38, 4  ;;  %v520_v63 = vrot.slane %v518_v43, 5  ;;  %vm3607_vm8 = vmor %vm511_vm6, %vm512_vm7 }
  0x18   : > { %3136 = vmatpush3.bf16.msra.mxu0 %v3345_v10  ;;  %3041 = vmatprep.subr.bf16.mxu1 %v3346_v11  ;;  %v344_v25 = vshrl.u32 %v315_v21, 16  ;;  %v347_v26 = vshll.u32 %v315_v21, 16  ;;  %v352_v53 = vshrl.u32 %v316_v44, 16  ;;  %v355_v58 = vshll.u32 %v316_v44, 16  ;;  %v2622_v61 = vld [vmem:[%s3518_s4 + $0x4c] sm:$0xf] }
  0x19   : > { %3137 = vmatprep.subr.bf16.mxu0 %v3347_v15  ;;  %v309_v59 = vmax.bf16 %v2629_v50, %v2621_v46  ;;  %v284_v60 = vmax.bf16 %v2614_v56, %v267_v55  ;;  %v2630_v62 = vld [vmem:[%s3518_s4 + $0x6c] sm:$0xf]  ;;  %v436_v1 = vld [vmem:[#allocation2 + $0x10] sm:$0xf]  ;;  %v439_v2 = vld [vmem:[#allocation2 + $0x14] sm:$0x1]  ;;  %v521_v9 = vor.u32 %v520_v63, %v517_v57 }
  0x1a   : > { %v346_v34 = vrot.slane %v344_v25, 7  ;;  %v354_v0 = vrot.slane %v352_v53, 7  ;;  %v310_v3 = vmax.bf16 %v2630_v62, %v2622_v61  ;;  %v526_v10 = vrot.slane %v524_v47, 5  ;;  %v442_v18 = vld [vmem:[#allocation2 + $0x18] sm:$0xf]  ;;  %v3416_v31 = vld [vmem:[%s4088_s1 + $0x220] sm:$0xff]  }
  0x1b   : > { %3042 = vmatpush3.bf16.msra.mxu1 %v3346_v11  ;;  %v317_v4 = vmax.bf16 %v309_v59, %v283_v49  ;;  %v448_v61 = vld [vmem:[#allocation2 + $0x20] sm:$0xf]  ;;  %vm933_vm9 = vcmask 1042432   ;;  %vm934_vm10 = vcmask 1046532   ;;  %v3366_v29 = vld [vmem:[%s4088_s1 + $0x38] sm:$0xff]   ;;  %s2899_s28 = sshll.u32 %s4104_s3, 5 }
  0x1c   : > { %3138 = vmatpush3.bf16.msra.mxu0 %v3347_v15  ;;  %3043 = vmatprep.subr.bf16.mxu1 %v3348_v19  ;;  %v349_v41 = vor.u32 %v347_v26, %v346_v34  ;;  %v350_v42 = vrot.slane %v346_v34, 4  ;;  %v357_v5 = vor.u32 %v355_v58, %v354_v0  ;;  %v358_v6 = vrot.slane %v354_v0, 4  ;;  %vm3806_vm11 = vmor %vm933_vm9, %vm934_vm10  ;;  %s258_s7 = scalar_lea.vmem %s4092_s5, %s2899_s28  ;;  %s2610_s8 = sshll.u32 %s4104_s3, 1 }
  0x1d   : > { %3139 = vmatprep.subr.bf16.mxu0 %v3349_v20  ;;  %v360_v7 = vshrl.u32 %v317_v4, 16  ;;  %v3588_v8 = vmax.bf16 %v310_v3, %v284_v60  ;;  %v363_v14 = vshll.u32 %v317_v4, 16  ;;  %v522_v26 = vrot.slane %v521_v9, 4  ;;  %s262_s11 = scalar_lea.vmem %s4093_s6, %s2610_s8 }
  0x1e   : > { %v428_v51 = vsel %vm3547_vm4, %v349_v41, %v427_v30  ;;  %v434_v52 = vsel %vm3555_vm5, %v350_v42, %v433_v36  ;;  %v437_v11 = vsel %vm3547_vm4, %v357_v5, %v436_v1  ;;  %v440_v12 = vsel %vm3555_vm5, %v358_v6, %v439_v2  ;;  %v451_v2 = vld [vmem:[#allocation2 + $0x24] sm:$0x1] }
  0x1f   : > { %3044 = vmatpush3.bf16.msra.mxu1 %v3348_v19  ;;  %429 = vst [vmem:[#allocation2 + $0x8] sm:$0xf] %v428_v51  ;;  %435 = vst [vmem:[#allocation2 + $0xc] sm:$0x1] %v434_v52  ;;  %v362_v13 = vrot.slane %v360_v7, 7  ;;  %v368_v25 = vshrl.u32 %v3588_v8, 16  ;;  %v527_v46 = vsel %vm3607_vm8, %v522_v26, %v526_v10 }
  0x20   : > { %3140 = vmatpush3.bf16.msra.mxu0 %v3349_v20  ;;  %3045 = vmatprep.subr.bf16.mxu1 %v3350_v24  ;;  %438 = vst [vmem:[#allocation2 + $0x10] sm:$0xf] %v437_v11  ;;  %441 = vst [vmem:[#allocation2 + $0x14] sm:$0x1] %v440_v12  ;;  %v371_v36 = vshll.u32 %v3588_v8, 16 }
  0x21   : > { %3141 = vmatprep.subr.bf16.mxu0 %v3351_v28  ;;  %v365_v34 = vor.u32 %v363_v14, %v362_v13  ;;  %v366_v41 = vrot.slane %v362_v13, 4  ;;  %v370_v45 = vrot.slane %v368_v25, 7  ;;  %v268_v10 = vld [vmem:[%s3518_s4 + $0x10] sm:$0xf] }
  0x22   : > { %v2615_v11 = vld [vmem:[%s3518_s4 + $0x30] sm:$0xf] }
  0x23   : > { %3046 = vmatpush3.bf16.msra.mxu1 %v3350_v24  ;;  %v445_v24 = vld [vmem:[#allocation2 + $0x1c] sm:$0x1]  ;;  %v443_v44 = vsel %vm3547_vm4, %v365_v34, %v442_v18  ;;  %v373_v9 = vor.u32 %v371_v36, %v370_v45  ;;  %v374_v13 = vrot.slane %v370_v45, 4  ;;  %v2623_v14 = vld [vmem:[%s3518_s4 + $0x50] sm:$0xf]  ;;  %v285_v25 = vmax.bf16 %v2615_v11, %v268_v10 }
  0x24   : > { %3142 = vmatpush3.bf16.msra.mxu0 %v3351_v28  ;;  %3055 = vmatprep.subr.bf16.mxu1 %v3570_v48  ;;  %444 = vst [vmem:[#allocation2 + $0x18] sm:$0xf] %v443_v44  ;;  %v446_v51 = vsel %vm3555_vm5, %v366_v41, %v445_v24 }
  0x25   : > { %3151 = vmatprep.subr.bf16.mxu0 %v3580_v54  ;;  %447 = vst [vmem:[#allocation2 + $0x1c] sm:$0x1] %v446_v51 }
  0x26   : > { %v3594_v15 = vld [vmem:[#allocation2 + $0x8] sm:$0xf]  ;;  %v3596_v16 = vld [vmem:[#allocation2 + $0xc] sm:$0x1] }
  0x27   : > { %v1292_v17 = vld [vmem:[#allocation2 + $0x8] sm:$0xf]  ;;  %v529_v19 = vshrl.u32 %v3594_v15, 16  ;;  %v532_v20 = vshll.u32 %v3594_v15, 16  ;;  %v538_v21 = vshll.u32 %v3596_v16, 16 }
  0x28   : > { %v3601_v23 = vld [vmem:[#allocation2 + $0xc] sm:$0x1]  ;;  %v1309_v27 = vshrl.u32 %v1292_v17, 16  ;;  %v1312_v28 = vshll.u32 %v1292_v17, 16  ;;  %v1294_v47 = vld [vmem:[#allocation2 + $0x10] sm:$0xf] }
  0x29   : > { %v1318_v30 = vshll.u32 %v3601_v23, 16  ;;  %v531_v32 = vrot.slane %v529_v19, 4  ;;  %v534_v33 = vrot.slane %v532_v20, 5  ;;  %v540_v38 = vrot.slane %v538_v21, 5  ;;  %v3616_v49 = vld [vmem:[#allocation2 + $0x14] sm:$0x1] }
  0x2a   : > { %v1311_v39 = vrot.slane %v1309_v27, 4  ;;  %v1314_v40 = vrot.slane %v1312_v28, 5  ;;  %v3620_v52 = vld [vmem:[#allocation2 + $0x10] sm:$0xf]  ;;  %v1323_v55 = vshrl.u32 %v1294_v47, 16  ;;  %v1326_v56 = vshll.u32 %v1294_v47, 16 }
  0x2b   : > { %v535_v42 = vor.u32 %v534_v33, %v531_v32  ;;  %v1320_v43 = vrot.slane %v1318_v30, 5  ;;  %v1332_v57 = vshll.u32 %v3616_v49, 16  ;;  %v3623_v58 = vld [vmem:[#allocation2 + $0x14] sm:$0x1]  ;;  %v543_v59 = vshrl.u32 %v3620_v52, 16 }
  0x2c   : > { %v1315_v50 = vor.u32 %v1314_v40, %v1311_v39  ;;  %v546_v60 = vshll.u32 %v3620_v52, 16  ;;  %v1325_v0 = vrot.slane %v1323_v55, 4  ;;  %v1328_v1 = vrot.slane %v1326_v56, 5  ;;  %v2631_v17 = vld [vmem:[%s3518_s4 + $0x70] sm:$0xf] }
  0x2d   : > { %v536_v53 = vrot.slane %v535_v42, 4  ;;  %v545_v4 = vrot.slane %v543_v59, 4  ;;  %v1334_v7 = vrot.slane %v1332_v57, 5  ;;  %v552_v8 = vshll.u32 %v3623_v58, 16  ;;  %v3636_v20 = vld [vmem:[#allocation2 + $0x18] sm:$0xf] }
  0x2e   : > { %v1316_v63 = vrot.slane %v1315_v50, 4  ;;  %v548_v5 = vrot.slane %v546_v60, 5  ;;  %v1329_v6 = vor.u32 %v1328_v1, %v1325_v0  ;;  %v449_v21 = vsel %vm3547_vm4, %v373_v9, %v448_v61  ;;  %v1296_v24 = vld [vmem:[#allocation2 + $0x18] sm:$0xf]  ;;  %v3640_v26 = vld [vmem:[#allocation2 + $0x1c] sm:$0x1] }
  0x2f   : > { %v541_v62 = vsel %vm3607_vm8, %v536_v53, %v540_v38  ;;  %v557_v27 = vshrl.u32 %v3636_v20, 16  ;;  %v560_v28 = vshll.u32 %v3636_v20, 16  ;;  %450 = vst [vmem:[#allocation2 + $0x20] sm:$0xf] %v449_v21  ;;  %v452_v30 = vsel %vm3555_vm5, %v374_v13, %v451_v2  ;;  %v3649_v38 = vld [vmem:[#allocation2 + $0x1c] sm:$0x1] }
  0x30   : > { %v2651_v3 = vcombine.low %v527_v46, %v541_v62  ;;  %v549_v12 = vor.u32 %v548_v5, %v545_v4  ;;  %v1321_v18 = vsel %vm3607_vm8, %v1316_v63, %v1320_v43  ;;  %v1330_v19 = vrot.slane %v1329_v6, 4  ;;  %453 = vst [vmem:[#allocation2 + $0x24] sm:$0x1] %v452_v30  ;;  %v269_v53 = vld [vmem:[%s3518_s4 + $0x14] sm:$0xf]  ;;  %v3354_v9 = vld [vmem:[%s4088_s1 + $0x8] sm:$0xff]  }
  0x31   : > { %v311_v32 = vmax.bf16 %v2631_v17, %v2623_v14  ;;  %v554_v34 = vrot.slane %v552_v8, 5  ;;  %v566_v36 = vshll.u32 %v3640_v26, 16  ;;  %v1337_v39 = vshrl.u32 %v1296_v24, 16  ;;  %v2616_v56 = vld [vmem:[%s3518_s4 + $0x34] sm:$0xf] }
  0x32   : > { %3047 = vmatprep.mubr.bf16.mxu1 %v2651_v3  ;;  %v1335_v33 = vsel %vm3607_vm8, %v1330_v19, %v1334_v7  ;;  %v550_v41 = vrot.slane %v549_v12, 4  ;;  %v559_v42 = vrot.slane %v557_v27, 4  ;;  %v562_v43 = vrot.slane %v560_v28, 5  ;;  %v2624_v57 = vld [vmem:[%s3518_s4 + $0x54] sm:$0xf] }
  0x33   : > { %v2755_v40 = vcombine.low %v1321_v18, %v1335_v33  ;;  %v1339_v44 = vrot.slane %v1337_v39, 4  ;;  %v1340_v45 = vshll.u32 %v1296_v24, 16  ;;  %v1346_v46 = vshll.u32 %v3649_v38, 16  ;;  %v2632_v63 = vld [vmem:[%s3518_s4 + $0x74] sm:$0xf] }
  0x34   : > { %v563_v47 = vor.u32 %v562_v43, %v559_v42  ;;  %v568_v50 = vrot.slane %v566_v36, 5  ;;  %v319_v51 = vmax.bf16 %v311_v32, %v285_v25  ;;  %v555_v59 = vsel %vm3607_vm8, %v550_v41, %v554_v34  ;;  %v454_v14 = vld [vmem:[#allocation2 + $0x28] sm:$0xf]  ;;  %v457_v17 = vld [vmem:[#allocation2 + $0x2c] sm:$0x1]  ;;  %v3356_v42 = vld [vmem:[%s4088_s1 + $0x10] sm:$0xff]  }
  0x35   : > { %3143 = vmatprep.mubr.bf16.mxu0 %v2755_v40  ;;  %v1342_v55 = vrot.slane %v1340_v45, 5  ;;  %v1348_v2 = vrot.slane %v1346_v46, 5  ;;  %v286_v4 = vmax.bf16 %v2616_v56, %v269_v53  ;;  %v312_v18 = vmax.bf16 %v2632_v63, %v2624_v57  ;;  %v270_v40 = vld [vmem:[%s3518_s4 + $0x18] sm:$0xf]  ;;  %v3355_v56 = vld [vmem:[%s4088_s1 + $0x148] sm:$0xff]  }
  0x36   : > { %v564_v60 = vrot.slane %v563_v47, 4  ;;  %v376_v61 = vshrl.u32 %v319_v51, 16  ;;  %v379_v62 = vshll.u32 %v319_v51, 16  ;;  %v1298_v0 = vld [vmem:[#allocation2 + $0x20] sm:$0xf]  ;;  %v938_v28 = vrot.slane %v3559_v37, 5 }
  0x37   : > { %v1343_v1 = vor.u32 %v1342_v55, %v1339_v44  ;;  %v3658_v3 = vld [vmem:[#allocation2 + $0x20] sm:$0xf]  ;;  %v3662_v6 = vld [vmem:[#allocation2 + $0x24] sm:$0x1]  ;;  %v1351_v7 = vshrl.u32 %v1298_v0, 16  ;;  %v1354_v8 = vshll.u32 %v1298_v0, 16  ;;  %v320_v43 = vmax.bf16 %v312_v18, %v286_v4 }
  0x38   : > { %v569_v5 = vsel %vm3607_vm8, %v564_v60, %v568_v50  ;;  %v378_v10 = vrot.slane %v376_v61, 7  ;;  %v1360_v13 = vshll.u32 %v3662_v6, 16  ;;  %v3668_v27 = vld [vmem:[#allocation2 + $0x24] sm:$0x1]  ;;  %v571_v30 = vshrl.u32 %v3658_v3, 16  ;;  %v3358_v57 = vld [vmem:[%s4088_s1 + $0x18] sm:$0xff]  }
  0x39   : > { %v2652_v11 = vcombine.low %v555_v59, %v569_v5  ;;  %v1344_v12 = vrot.slane %v1343_v1, 4  ;;  %v1353_v19 = vrot.slane %v1351_v7, 4  ;;  %v1356_v21 = vrot.slane %v1354_v8, 5  ;;  %v2617_v44 = vld [vmem:[%s3518_s4 + $0x38] sm:$0xf] }
  0x3a   : > { %v381_v24 = vor.u32 %v379_v62, %v378_v10  ;;  %v382_v25 = vrot.slane %v378_v10, 4  ;;  %v574_v32 = vshll.u32 %v3658_v3, 16  ;;  %v1362_v34 = vrot.slane %v1360_v13, 5  ;;  %v2625_v45 = vld [vmem:[%s3518_s4 + $0x58] sm:$0xf] }
  0x3b   : > { %3048 = vmatmul.mubr.bf16.vlgmr.msra.gmra.mrb[0].mxu1 %v2652_v11  ;;  %v1357_v33 = vor.u32 %v1356_v21, %v1353_v19  ;;  %v1349_v41 = vsel %vm3607_vm8, %v1344_v12, %v1348_v2  ;;  %v573_v47 = vrot.slane %v571_v30, 4  ;;  %v287_v51 = vmax.bf16 %v2617_v44, %v270_v40  ;;  %v2633_v53 = vld [vmem:[%s3518_s4 + $0x78] sm:$0xf]  ;;  %v271_v62 = vld [vmem:[%s3518_s4 + $0x1c] sm:$0xf] }
  0x3c   : > { %3056 = vmatpush3.bf16.msra.mxu1 %v3570_v48  ;;  %v455_v36 = vsel %vm3547_vm4, %v381_v24, %v454_v14  ;;  %v458_v39 = vsel %vm3555_vm5, %v382_v25, %v457_v17  ;;  %v580_v48 = vshll.u32 %v3668_v27, 16  ;;  %v576_v50 = vrot.slane %v574_v32, 5  ;;  %v2618_v0 = vld [vmem:[%s3518_s4 + $0x3c] sm:$0xf]  ;;  %v460_v8 = vld [vmem:[#allocation2 + $0x30] sm:$0xf] }
  0x3d   : > { %3057 = vmatprep.subr.bf16.mxu1 %v3354_v9  ;;  %456 = vst [vmem:[#allocation2 + $0x28] sm:$0xf] %v455_v36  ;;  %459 = vst [vmem:[#allocation2 + $0x2c] sm:$0x1] %v458_v39  ;;  %v1358_v46 = vrot.slane %v1357_v33, 4  ;;  %v942_v55 = vrot.slane %v3596_v16, 5  ;;  %v313_v61 = vmax.bf16 %v2633_v53, %v2625_v45  ;;  %v288_v13 = vmax.bf16 %v2618_v0, %v271_v62 }
  0x3e   : > { %v384_v59 = vshrl.u32 %v320_v43, 16  ;;  %v387_v60 = vshll.u32 %v320_v43, 16  ;;  %v2626_v1 = vld [vmem:[%s3518_s4 + $0x5c] sm:$0xf]  ;;  %v3701_v5 = vrot.slane %v580_v48, 5  ;;  %v577_v12 = vor.u32 %v576_v50, %v573_v47  ;;  %v3357_v17 = vld [vmem:[%s4088_s1 + $0x150] sm:$0xff]  }
  0x3f   : > { %v1363_v63 = vsel %vm3607_vm8, %v1358_v46, %v1362_v34  ;;  %v2634_v2 = vld [vmem:[%s3518_s4 + $0x7c] sm:$0xf]  ;;  %v463_v10 = vld [vmem:[#allocation2 + $0x34] sm:$0x1]  ;;  %v321_v11 = vmax.bf16 %v313_v61, %v287_v51  ;;  %v3360_v32 = vld [vmem:[%s4088_s1 + $0x20] sm:$0xff]  }
  0x40   : > { %3058 = vmatpush3.bf16.msra.mxu1 %v3354_v9  ;;  %v2756_v4 = vcombine.low %v1349_v41, %v1363_v63  ;;  %v386_v7 = vrot.slane %v384_v59, 7  ;;  %v314_v14 = vmax.bf16 %v2634_v2, %v2626_v1  ;;  %v578_v40 = vrot.slane %v577_v12, 4  ;;  %v3359_v43 = vld [vmem:[%s4088_s1 + $0x158] sm:$0xff]   ;;  %v3362_v62 = vld [vmem:[%s4088_s1 + $0x28] sm:$0xff]  }
  0x41   : > { %3059 = vmatprep.subr.bf16.mxu1 %v3356_v42  ;;  %v392_v19 = vshrl.u32 %v321_v11, 16  ;;  %v466_v50 = vld [vmem:[#allocation2 + $0x38] sm:$0xf]  ;;  %v469_v61 = vld [vmem:[#allocation2 + $0x3c] sm:$0x1] }
  0x42   : > { %3144 = vmatmul.mubr.bf16.vlgmr.msra.gmra.mrb[0].mxu0 %v2756_v4  ;;  %v389_v9 = vor.u32 %v387_v60, %v386_v7  ;;  %v390_v18 = vrot.slane %v386_v7, 4  ;;  %v322_v30 = vmax.bf16 %v314_v14, %v288_v13  ;;  %v395_v60 = vshll.u32 %v321_v11, 16  ;;  %v472_v14 = vld [vmem:[#allocation2 + $0x40] sm:$0xf] }
  0x43   : > { %3152 = vmatpush3.bf16.msra.mxu0 %v3580_v54  ;;  %v394_v47 = vrot.slane %v392_v19, 7  ;;  %v1600_v4 = vrot.slane %v3601_v23, 5  ;;  %v1608_v23 = vrot.slane %v3649_v38, 5 }
  0x44   : > { %3060 = vmatpush3.bf16.msra.mxu1 %v3356_v42  ;;  %v3707_v21 = vld [vmem:[#allocation2 + $0x28] sm:$0xf]  ;;  %v3709_v24 = vld [vmem:[#allocation2 + $0x2c] sm:$0x1]  ;;  %3153 = vmatprep.subr.bf16.mxu0 %v3355_v56  ;;  %v461_v54 = vsel %vm3547_vm4, %v389_v9, %v460_v8  ;;  %v464_v41 = vsel %vm3555_vm5, %v390_v18, %v463_v10  ;;  %v400_v1 = vshrl.u32 %v322_v30, 16  ;;  %v403_v2 = vshll.u32 %v322_v30, 16 }
  0x45   : > { %v1300_v25 = vld [vmem:[#allocation2 + $0x28] sm:$0xf]  ;;  %3061 = vmatprep.subr.bf16.mxu1 %v3358_v57  ;;  %v585_v33 = vshrl.u32 %v3707_v21, 16  ;;  %v588_v34 = vshll.u32 %v3707_v21, 16  ;;  %v594_v36 = vshll.u32 %v3709_v24, 16  ;;  %v398_v0 = vrot.slane %v394_v47, 4 }
  0x46   : > { %v3719_v39 = vld [vmem:[#allocation2 + $0x2c] sm:$0x1]  ;;  %462 = vst [vmem:[#allocation2 + $0x30] sm:$0xf] %v461_v54  ;;  %v1365_v42 = vshrl.u32 %v1300_v25, 16  ;;  %v1368_v48 = vshll.u32 %v1300_v25, 16  ;;  %v397_v7 = vor.u32 %v395_v60, %v394_v47  ;;  %v583_v10 = vsel %vm3607_vm8, %v578_v40, %v3701_v5 }
  0x47   : > { %v587_v44 = vrot.slane %v585_v33, 4  ;;  %v590_v45 = vrot.slane %v588_v34, 5  ;;  %465 = vst [vmem:[#allocation2 + $0x34] sm:$0x1] %v464_v41  ;;  %v1374_v46 = vshll.u32 %v3719_v39, 16  ;;  %3154 = vmatpush3.bf16.msra.mxu0 %v3355_v56  ;;  %v596_v51 = vrot.slane %v594_v36, 5 }
  0x48   : > { %3062 = vmatpush3.bf16.msra.mxu1 %v3358_v57  ;;  %v1367_v53 = vrot.slane %v1365_v42, 4  ;;  %v1370_v59 = vrot.slane %v1368_v48, 5  ;;  %3155 = vmatprep.subr.bf16.mxu0 %v3357_v17  ;;  %v1604_v56 = vrot.slane %v3616_v49, 5  ;;  %v3361_v8 = vld [vmem:[%s4088_s1 + $0x160] sm:$0xff]   ;;  %v470_v12 = vsel %vm3555_vm5, %v398_v0, %v469_v61  ;;  %v3364_v18 = vld [vmem:[%s4088_s1 + $0x30] sm:$0xff]   ;;  %v3363_v60 = vld [vmem:[%s4088_s1 + $0x168] sm:$0xff]  }
  0x49   : > { %3063 = vmatprep.subr.bf16.mxu1 %v3360_v32  ;;  %v591_v63 = vor.u32 %v590_v45, %v587_v44  ;;  %v402_v13 = vrot.slane %v400_v1, 7  ;;  %v475_v9 = vld [vmem:[#allocation2 + $0x44] sm:$0x1]  ;;  %v3743_v19 = vrot.slane %v1374_v46, 5  ;;  %v467_v25 = vsel %vm3547_vm4, %v397_v7, %v466_v50  ;;  %471 = vst [vmem:[#allocation2 + $0x3c] sm:$0x1] %v470_v12 }
  0x4a   : > { %v1371_v57 = vor.u32 %v1370_v59, %v1367_v53  ;;  %468 = vst [vmem:[#allocation2 + $0x38] sm:$0xf] %v467_v25  ;;  %v3751_v36 = vld [vmem:[#allocation2 + $0x8] sm:$0xe]  ;;  %v3365_v0 = vld [vmem:[%s4088_s1 + $0x170] sm:$0xff]  }
  0x4b   : > { %v592_v11 = vrot.slane %v591_v63, 4  ;;  %3156 = vmatpush3.bf16.msra.mxu0 %v3357_v17  ;;  %v406_v34 = vrot.slane %v402_v13, 4 }
  0x4c   : > { %3064 = vmatpush3.bf16.msra.mxu1 %v3360_v32  ;;  %3157 = vmatprep.subr.bf16.mxu0 %v3359_v43  ;;  %v1372_v33 = vrot.slane %v1371_v57, 4  ;;  %v405_v32 = vor.u32 %v403_v2, %v402_v13 }
  0x4d   : > { %3065 = vmatprep.subr.bf16.mxu1 %v3362_v62  ;;  %v597_v5 = vsel %vm3607_vm8, %v592_v11, %v596_v51  ;;  %v1302_v30 = vld [vmem:[#allocation2 + $0x30] sm:$0xf]  ;;  %v476_v59 = vsel %vm3555_vm5, %v406_v34, %v475_v9 }
  0x4e   : > { %v3749_v17 = vld [vmem:[#allocation2 + $0x30] sm:$0xf]  ;;  %v2653_v54 = vcombine.low %v583_v10, %v597_v5  ;;  %v3753_v40 = vld [vmem:[#allocation2 + $0x34] sm:$0x1]  ;;  %v1379_v41 = vshrl.u32 %v1302_v30, 16  ;;  %v1382_v42 = vshll.u32 %v1302_v30, 16  ;;  %v473_v53 = vsel %vm3547_vm4, %v405_v32, %v472_v14 }
  0x4f   : > { %v3755_v48 = vld [vmem:[#allocation2 + $0x34] sm:$0x1]  ;;  %v1388_v44 = vshll.u32 %v3753_v40, 16  ;;  %v599_v45 = vshrl.u32 %v3749_v17, 16  ;;  %v602_v46 = vshll.u32 %v3749_v17, 16  ;;  %3158 = vmatpush3.bf16.msra.mxu0 %v3359_v43  ;;  %v1377_v7 = vsel %vm3607_vm8, %v1372_v33, %v3743_v19 }
  0x50   : > { %v608_v47 = vshll.u32 %v3755_v48, 16  ;;  %3066 = vmatpush3.bf16.msra.mxu1 %v3362_v62  ;;  %v1381_v50 = vrot.slane %v1379_v41, 4  ;;  %v1384_v51 = vrot.slane %v1382_v42, 5  ;;  %3159 = vmatprep.subr.bf16.mxu0 %v3361_v8  ;;  %474 = vst [vmem:[#allocation2 + $0x40] sm:$0xf] %v473_v53  ;;  %v2767_v62 = vrot.slane %v3751_v36, 9 }
  0x51   : > { %3051 = vmatprep.mubr.bf16.mxu1 %v2653_v54  ;;  %v601_v61 = vrot.slane %v599_v45, 4  ;;  %v604_v63 = vrot.slane %v602_v46, 5  ;;  %477 = vst [vmem:[#allocation2 + $0x44] sm:$0x1] %v476_v59  ;;  %3067 = vmatprep.subr.bf16.mxu1 %v3364_v18  ;;  %v1390_v35 = vrot.slane %v1388_v44, 5  ;;  %v3367_v59 = vld [vmem:[%s4088_s1 + $0x178] sm:$0xff]  }
  0x52   : > { %v1385_v43 = vor.u32 %v1384_v51, %v1381_v50  ;;  %v3775_v1 = vld [vmem:[#allocation2 + $0x3c] sm:$0x1]  ;;  %v3782_v11 = vld [vmem:[#allocation2 + $0x38] sm:$0xf]  ;;  %v610_v12 = vrot.slane %v608_v47, 5  ;;  %v1612_v36 = vrot.slane %v3662_v6, 5  ;;  %v2664_v6 = vcombine.low %v3620_v52, %v3636_v20 }
  0x53   : > { %v605_v2 = vor.u32 %v604_v63, %v601_v61  ;;  %v3777_v57 = vld [vmem:[#allocation2 + $0x3c] sm:$0x1]  ;;  %3160 = vmatpush3.bf16.msra.mxu0 %v3361_v8  ;;  %v1304_v13 = vld [vmem:[#allocation2 + $0x38] sm:$0xf]  ;;  %v613_v14 = vshrl.u32 %v3782_v11, 16  ;;  %v616_v9 = vshll.u32 %v3782_v11, 16  ;;  %v2665_v52 = vcombine.low %v3658_v3, %v3707_v21 }
  0x54   : > { %v1386_v10 = vrot.slane %v1385_v43, 4  ;;  %3068 = vmatpush3.bf16.msra.mxu1 %v3364_v18  ;;  %3161 = vmatprep.subr.bf16.mxu0 %v3363_v60  ;;  %v622_v25 = vshll.u32 %v3775_v1, 16  ;;  %v1393_v5 = vshrl.u32 %v1304_v13, 16  ;;  %v1575_v8 = vld [vmem:[#allocation2 + $0x10] sm:$0xe]  ;;  %v1396_v33 = vshll.u32 %v1304_v13, 16 }
  0x55   : > { %3069 = vmatprep.subr.bf16.mxu1 %v3366_v29  ;;  %v606_v19 = vrot.slane %v605_v2, 4  ;;  %v1402_v32 = vshll.u32 %v3777_v57, 16  ;;  %v3793_v18 = vld [vmem:[%s4088_s1 + $0x80] sm:$0xff]   ;;  %v615_v54 = vrot.slane %v613_v14, 4  ;;  %v618_v41 = vrot.slane %v616_v9, 5  ;;  %v3373_v3 = vld [vmem:[%s4088_s1 + $0x188] sm:$0xff]  }
  0x56   : > { %v1391_v30 = vsel %vm3607_vm8, %v1386_v10, %v1390_v35  ;;  %v1395_v45 = vrot.slane %v1393_v5, 4  ;;  %v1398_v46 = vrot.slane %v1396_v33, 5  ;;  %v624_v50 = vrot.slane %v622_v25, 5  ;;  %v1576_v13 = vld [vmem:[#allocation2 + $0x18] sm:$0xe] }
  0x57   : > { %v2757_v34 = vcombine.low %v1377_v7, %v1391_v30  ;;  %3162 = vmatpush3.bf16.msra.mxu0 %v3363_v60  ;;  %v1306_v42 = vld [vmem:[#allocation2 + $0x40] sm:$0xf]  ;;  %v619_v47 = vor.u32 %v618_v41, %v615_v54  ;;  %v611_v61 = vsel %vm3607_vm8, %v606_v19, %v610_v12  ;;  %v2768_v43 = vrot.slane %v1575_v8, 9 }
  0x58   : > { %v3795_v44 = vld [vmem:[#allocation2 + $0x44] sm:$0x1]  ;;  %3070 = vmatpush3.bf16.msra.mxu1 %v3366_v29  ;;  %3163 = vmatprep.subr.bf16.mxu0 %v3365_v0  ;;  %v1407_v51 = vshrl.u32 %v1306_v42, 16  ;;  %v1410_v53 = vshll.u32 %v1306_v42, 16  ;;  %v1399_v60 = vor.u32 %v1398_v46, %v1395_v45  ;;  %v1404_v35 = vrot.slane %v1402_v32, 5 }
  0x59   : > { %3147 = vmatprep.mubr.bf16.mxu0 %v2757_v34  ;;  %v1416_v63 = vshll.u32 %v3795_v44, 16  ;;  %3079 = vmatprep.subr.bf16.mxu1 %v3793_v18  ;;  %v620_v29 = vrot.slane %v619_v47, 4  ;;  %v3813_v12 = vld [vmem:[%s4088_s1 + $0x180] sm:$0xff]   ;;  %v2663_v30 = vcombine.low %v3536_v22, %v3594_v15  ;;  %v946_v19 = vrot.slane %v3623_v58, 5  ;;  %v1578_v34 = vld [vmem:[#allocation2 + $0x28] sm:$0xe] }
  0x5a   : > { %v1409_v2 = vrot.slane %v1407_v51, 4  ;;  %v1412_v7 = vrot.slane %v1410_v53, 5  ;;  %v1577_v14 = vld [vmem:[#allocation2 + $0x20] sm:$0xe]  ;;  %v1400_v9 = vrot.slane %v1399_v60, 4  ;;  %v1601_v32 = vsel %vm3806_vm11, %v2767_v62, %v1600_v4 }
  0x5b   : > { %v1418_v25 = vrot.slane %v1416_v63, 5  ;;  %3164 = vmatpush3.bf16.msra.mxu0 %v3365_v0  ;;  %v625_v5 = vsel %vm3607_vm8, %v620_v29, %v624_v50  ;;  %v1605_v0 = vsel %vm3806_vm11, %v2768_v43, %v1604_v56  ;;  %v950_v54 = vrot.slane %v3640_v26, 5  ;;  %v1579_v58 = vld [vmem:[#allocation2 + $0x30] sm:$0xe]  ;;  %v909_v46 = vld [vmem:[#allocation2] sm:$0xe] }
  0x5c   : > { %v1413_v8 = vor.u32 %v1412_v7, %v1409_v2  ;;  %3165 = vmatprep.subr.bf16.mxu0 %v3367_v59  ;;  %v2654_v33 = vcombine.low %v611_v61, %v625_v5  ;;  %v1405_v22 = vsel %vm3607_vm8, %v1400_v9, %v1404_v35  ;;  %v2769_v4 = vrot.slane %v1576_v13, 9  ;;  %v910_v47 = vld [vmem:[#allocation2 + $0x8] sm:$0xe]  ;;  %v1581_v20 = vld [vmem:[#allocation2 + $0x40] sm:$0xe]  ;;  %v3375_v5 = vld [vmem:[%s4088_s1 + $0x190] sm:$0xff]  }
  0x5d   : > { %v2770_v62 = vrot.slane %v1577_v14, 9  ;;  %v2791_v56 = vcombine.low %v1601_v32, %v1605_v0  ;;  %v1616_v26 = vrot.slane %v3719_v39, 5  ;;  %v1620_v41 = vrot.slane %v3753_v40, 5  ;;  %v3372_v39 = vld [vmem:[%s4088_s1 + $0x88] sm:$0xff]   ;;  %v1580_v40 = vld [vmem:[#allocation2 + $0x38] sm:$0xe] }
  0x5e   : > { %v1414_v15 = vrot.slane %v1413_v8, 4  ;;  %3052 = vmatmul.mubr.bf16.gmra.mrb[4].mxu1 %v2654_v33  ;;  %v2771_v45 = vrot.slane %v1578_v34, 9  ;;  %v2772_v38 = vrot.slane %v1579_v58, 9  ;;  %v1609_v50 = vsel %vm3806_vm11, %v2769_v4, %v1608_v23  ;;  %v911_v63 = vld [vmem:[#allocation2 + $0x10] sm:$0xe]  ;;  %v3379_v32 = vld [vmem:[%s4088_s1 + $0x1a0] sm:$0xff]  }
  0x5f   : > { %3166 = vmatpush3.bf16.msra.mxu0 %v3367_v59  ;;  %3071 = vmatprep.mubr.bf16.mxu1 %v2663_v30  ;;  %v1613_v51 = vsel %vm3806_vm11, %v2770_v62, %v1612_v36  ;;  %v2675_v53 = vrot.slane %v909_v46, 9  ;;  %v2676_v59 = vrot.slane %v910_v47, 9  ;;  %v912_v43 = vld [vmem:[#allocation2 + $0x18] sm:$0xe]  ;;  %v2677_v2 = vrot.slane %v911_v63, 9  ;;  %v3380_v0 = vld [vmem:[%s4088_s1 + $0xa8] sm:$0xff]  }
  0x60   : > { %v1419_v49 = vsel %vm3607_vm8, %v1414_v15, %v1418_v25  ;;  %3175 = vmatprep.subr.bf16.mxu0 %v3813_v12  ;;  %v2792_v29 = vcombine.low %v1609_v50, %v1613_v51  ;;  %v2678_v7 = vrot.slane %v912_v43, 9  ;;  %v1617_v37 = vsel %vm3806_vm11, %v2771_v45, %v1616_v26  ;;  %v3389_v33 = vld [vmem:[#allocation2 + $0x10] ss:$8 sps:$4 sm:$0xff]   ;;  %v3381_v34 = vld [vmem:[%s4088_s1 + $0x1a8] sm:$0xff]   ;;  %v3935_v63 = vld [vmem:[#allocation2 + $0x1c] sm:$0x1] }
  0x61   : > { %v2758_v42 = vcombine.low %v1405_v22, %v1419_v49  ;;  %v939_v61 = vsel %vm3806_vm11, %v2675_v53, %v938_v28  ;;  %v943_v60 = vsel %vm3806_vm11, %v2676_v59, %v942_v55  ;;  %v1621_v16 = vsel %vm3806_vm11, %v2772_v38, %v1620_v41  ;;  %v913_v22 = vld [vmem:[#allocation2 + $0x20] sm:$0xe]  ;;  %v914_v15 = vld [vmem:[#allocation2 + $0x28] sm:$0xe]  ;;  %v1955_v58 = vld [vmem:[#allocation2 + $0x10] sm:$0xf] }
  0x62   : > { %v2699_v35 = vcombine.low %v939_v61, %v943_v60  ;;  %v1624_v28 = vrot.slane %v3777_v57, 5  ;;  %v1628_v55 = vrot.slane %v3795_v44, 5  ;;  %v2773_v21 = vrot.slane %v1580_v40, 9  ;;  %v3374_v57 = vld [vmem:[%s4088_s1 + $0x90] sm:$0xff]   ;;  %v1957_v23 = vld [vmem:[#allocation2 + $0x18] sm:$0xf] }
  0x63   : > { %3148 = vmatmul.mubr.bf16.gmra.mrb[4].mxu0 %v2758_v42  ;;  %v2774_v13 = vrot.slane %v1581_v20, 9  ;;  %v3871_v14 = vsel %vm3806_vm11, %v2677_v2, %v946_v19  ;;  %v3875_v9 = vsel %vm3806_vm11, %v2678_v7, %v950_v54  ;;  %v2666_v25 = vcombine.low %v3749_v17, %v3782_v11  ;;  %v3376_v19 = vld [vmem:[%s4088_s1 + $0x98] sm:$0xff]   ;;  %v3383_v54 = vld [vmem:[%s4088_s1 + $0xb0] sm:$0xff]   ;;  %v3391_v2 = vld [vmem:[#allocation2 + $0x20] ss:$8 sps:$4 sm:$0xff]  }
  0x64   : > { %3167 = vmatprep.mubr.bf16.mxu0 %v2791_v56  ;;  %v2700_v44 = vcombine.low %v3871_v14, %v3875_v9  ;;  %v1625_v8 = vsel %vm3806_vm11, %v2773_v21, %v1624_v28  ;;  %v3377_v11 = vld [vmem:[%s4088_s1 + $0x198] sm:$0xff]   ;;  %v3384_v36 = vld [vmem:[%s4088_s1 + $0x1b0] sm:$0xff]   ;;  %v2679_v62 = vrot.slane %v913_v22, 9  ;;  %v954_v49 = vrot.slane %v3668_v27, 5  ;;  %v3388_v27 = vld [vmem:[%s4088_s1 + $0xc0] sm:$0xff]  }
  0x65   : > { %v1629_v30 = vsel %vm3806_vm11, %v2774_v13, %v1628_v55  ;;  %v3386_v4 = vld [vmem:[%s4088_s1 + $0xb8] sm:$0xff]   ;;  %v2680_v56 = vrot.slane %v914_v15, 9  ;;  %v958_v26 = vrot.slane %v3709_v24, 5  ;;  %v915_v41 = vld [vmem:[#allocation2 + $0x30] sm:$0xe]  ;;  %v1972_v45 = vshrl.u32 %v1955_v58, 16 }
  0x66   : > { %3072 = vmatmul.mubr.bf16.vlgmr.msra.gmra.mrb[0].mxu1 %v2664_v6  ;;  %v2794_v17 = vcombine.low %v1625_v8, %v1629_v30  ;;  %v916_v42 = vld [vmem:[#allocation2 + $0x38] sm:$0xe]  ;;  %v1975_v38 = vshll.u32 %v1955_v58, 16  ;;  %v1986_v6 = vshrl.u32 %v1957_v23, 16  ;;  %v1989_v46 = vshll.u32 %v1957_v23, 16  ;;  %v3393_v28 = vld [vmem:[%s4088_s1 + $0x1c8] sm:$0xff]  }
  0x67   : > { %3080 = vmatpush3.bf16.msra.mxu1 %v3793_v18  ;;  %3075 = vmatprep.mubr.bf16.mxu1 %v2665_v52  ;;  %v2793_v18 = vcombine.low %v1617_v37, %v1621_v16  ;;  %v3387_v47 = vld [vmem:[%s4088_s1 + $0x1b8] sm:$0xff]   ;;  %v962_v24 = vrot.slane %v3755_v48, 5  ;;  %v966_v50 = vrot.slane %v3775_v1, 5  ;;  %v955_v51 = vsel %vm3806_vm11, %v2679_v62, %v954_v49  ;;  %v3933_v59 = vld [vmem:[#allocation2 + $0x14] sm:$0x1]  ;;  %v3390_v48 = vld [vmem:[%s4088_s1 + $0x1c0] sm:$0xff]  }
  0x68   : > { %3081 = vmatprep.subr.bf16.mxu1 %v3372_v39  ;;  %v2681_v40 = vrot.slane %v915_v41, 9  ;;  %v2682_v53 = vrot.slane %v916_v42, 9  ;;  %v1974_v52 = vrot.slane %v1972_v45, 4  ;;  %v1977_v20 = vrot.slane %v1975_v38, 5  ;;  %v3392_v1 = vld [vmem:[%s4088_s1 + $0xc8] sm:$0xff]   ;;  %v3394_v55 = vld [vmem:[%s4088_s1 + $0xd0] sm:$0xff]  }
  0x69   : > { %v1988_v61 = vrot.slane %v1986_v6, 4  ;;  %v1991_v60 = vrot.slane %v1989_v46, 5  ;;  %v1995_v16 = vshll.u32 %v3935_v63, 16  ;;  %v3402_v21 = vld [vmem:[#allocation2 + $0x30] ss:$8 sps:$4 sm:$0xff]   ;;  %v3400_v62 = vld [vmem:[%s4088_s1 + $0xe8] sm:$0xff]  }
  0x6a   : > { %v1978_v7 = vor.u32 %v1977_v20, %v1974_v52  ;;  %v3404_v8 = vld [vmem:[#allocation2 + $0x40] ss:$8 sps:$4 sm:$0xff]   ;;  %v1963_v15 = vld [vmem:[#allocation2 + $0x30] sm:$0xf]  ;;  %v1965_v58 = vld [vmem:[#allocation2 + $0x38] sm:$0xf] }
  0x6b   : > { %3168 = vmatmul.mubr.bf16.vlgmr.msra.gmra.mrb[0].mxu0 %v2792_v29  ;;  %3082 = vmatpush3.bf16.msra.mxu1 %v3372_v39  ;;  %v959_v39 = vsel %vm3806_vm11, %v2680_v56, %v958_v26  ;;  %v963_v29 = vsel %vm3806_vm11, %v2681_v40, %v962_v24  ;;  %v1992_v37 = vor.u32 %v1991_v60, %v1988_v61  ;;  %v3408_v30 = vld [vmem:[#allocation2 + $0x8] ss:$8 sps:$4 sm:$0xff]   ;;  %v3974_v23 = vld [vmem:[#allocation2 + $0x24] sm:$0x1]  ;;  %v2028_v42 = vshrl.u32 %v1963_v15, 16 }
  0x6c   : > { %3176 = vmatpush3.bf16.msra.mxu0 %v3813_v12  ;;  %3083 = vmatprep.subr.bf16.mxu1 %v3374_v57  ;;  %v3378_v12 = vld [vmem:[%s4088_s1 + $0xa0] sm:$0xff]   ;;  %v2701_v43 = vcombine.low %v955_v51, %v959_v39  ;;  %v1979_v14 = vrot.slane %v1978_v7, 4  ;;  %v2031_v45 = vshll.u32 %v1963_v15, 16  ;;  %v2042_v38 = vshrl.u32 %v1965_v58, 16  ;;  %v3403_v24 = vld [vmem:[%s4088_s1 + $0xf0] sm:$0xff]  }
  0x6d   : > { %3177 = vmatprep.subr.bf16.mxu0 %v3373_v3  ;;  %3171 = vmatprep.mubr.bf16.mxu0 %v2793_v18  ;;  %v3395_v18 = vld [vmem:[%s4088_s1 + $0x1d0] sm:$0xff]   ;;  %v2045_v6 = vshll.u32 %v1965_v58, 16  ;;  %v2009_v46 = vshll.u32 %v3974_v23, 16  ;;  %v1967_v40 = vld [vmem:[#allocation2 + $0x40] sm:$0xf]  ;;  %v2030_v20 = vrot.slane %v2028_v42, 4 }
  0x6e   : > { %3076 = vmatmul.mubr.bf16.gmra.mrb[4].mxu1 %v2666_v25  ;;  %v1959_v25 = vld [vmem:[#allocation2 + $0x20] sm:$0xf]  ;;  %v3992_v39 = vld [vmem:[#allocation2 + $0x34] sm:$0x1]  ;;  %v3994_v52 = vld [vmem:[#allocation2 + $0x3c] sm:$0x1] }
  0x6f   : > { %3084 = vmatpush3.bf16.msra.mxu1 %v3374_v57  ;;  %3095 = vmatprep.mubr.bf16.mxu1 %v2699_v35  ;;  %v967_v35 = vsel %vm3806_vm11, %v2682_v53, %v966_v50  ;;  %v1993_v57 = vrot.slane %v1992_v37, 4  ;;  %v1969_v53 = vld [vmem:[#allocation2 + $0x48] sm:$0xf]  ;;  %v2033_v61 = vrot.slane %v2031_v45, 5  ;;  %v2044_v60 = vrot.slane %v2042_v38, 4  ;;  %v3406_v37 = vld [vmem:[%s4088_s1 + $0xf8] sm:$0xff]  }
  0x70   : > { %3178 = vmatpush3.bf16.msra.mxu0 %v3373_v3  ;;  %3085 = vmatprep.subr.bf16.mxu1 %v3376_v19  ;;  %v1981_v3 = vshll.u32 %v3933_v59, 16  ;;  %v2702_v13 = vcombine.low %v963_v29, %v967_v35  ;;  %v2056_v29 = vshrl.u32 %v1967_v40, 16  ;;  %v2059_v35 = vshll.u32 %v1967_v40, 16  ;;  %v2241_v58 = vld [vmem:[#allocation2 + $0x30] sm:$0xe] }
  0x71   : > { %3179 = vmatprep.subr.bf16.mxu0 %v3375_v5  ;;  %v2073_v7 = vshll.u32 %v1969_v53, 16  ;;  %v2863_v38 = vrot.slane %v2241_v58, 9 }
  0x72   : > { %v1983_v9 = vrot.slane %v1981_v3, 5  ;;  %v3405_v3 = vld [vmem:[%s4088_s1 + $0x1f0] sm:$0xff]  }
  0x73   : > { %3172 = vmatmul.mubr.bf16.gmra.mrb[4].mxu0 %v2794_v17  ;;  %3086 = vmatpush3.bf16.msra.mxu1 %v3376_v19  ;;  %v1961_v19 = vld [vmem:[#allocation2 + $0x28] sm:$0xf]  ;;  %v3397_v17 = vld [vmem:[%s4088_s1 + $0x1d8] sm:$0xff]  }
  0x74   : > { %3180 = vmatpush3.bf16.msra.mxu0 %v3375_v5  ;;  %3087 = vmatprep.subr.bf16.mxu1 %v3378_v12  ;;  %v3396_v5 = vld [vmem:[%s4088_s1 + $0xd8] sm:$0xff]  }
  0x75   : > { %3181 = vmatprep.subr.bf16.mxu0 %v3377_v11  ;;  %3191 = vmatprep.mubr.bf16.mxu0 %v3389_v33 }
  0x77   : > { %3088 = vmatpush3.bf16.msra.mxu1 %v3378_v12  ;;  %v1984_v12 = vsel %vm3607_vm8, %v1979_v14, %v1983_v9  ;;  %v4004_v9 = vld [vmem:[#allocation2 + $0x44] sm:$0x1] }
  0x78   : > { %3182 = vmatpush3.bf16.msra.mxu0 %v3377_v11  ;;  %3089 = vmatprep.subr.bf16.mxu1 %v3380_v0  ;;  %v3398_v11 = vld [vmem:[%s4088_s1 + $0xe0] sm:$0xff]  }
  0x79   : > { %3183 = vmatprep.subr.bf16.mxu0 %v3379_v32 }
  0x7b   : > { %3090 = vmatpush3.bf16.msra.mxu1 %v3380_v0  ;;  %v2003_v0 = vshll.u32 %v1959_v25, 16 }
  0x7c   : > { %3184 = vmatpush3.bf16.msra.mxu0 %v3379_v32  ;;  %3091 = vmatprep.subr.bf16.mxu1 %v3383_v54  ;;  %v2000_v32 = vshrl.u32 %v1959_v25, 16 }
  0x7d   : > { %3185 = vmatprep.subr.bf16.mxu0 %v3381_v34  ;;  %v2005_v56 = vrot.slane %v2003_v0, 5  ;;  %v2065_v0 = vshll.u32 %v4004_v9, 16 }
  0x7e   : > { %v2002_v49 = vrot.slane %v2000_v32, 4 }
  0x7f   : > { %3092 = vmatpush3.bf16.msra.mxu1 %v3383_v54  ;;  %v2017_v54 = vshll.u32 %v1961_v19, 16  ;;  %v2067_v42 = vrot.slane %v2065_v0, 5 }
  0x80   : > { %3186 = vmatpush3.bf16.msra.mxu0 %v3381_v34  ;;  %3093 = vmatprep.subr.bf16.mxu1 %v3386_v4  ;;  %v2014_v34 = vshrl.u32 %v1961_v19, 16  ;;  %v2006_v50 = vor.u32 %v2005_v56, %v2002_v49  ;;  %v3411_v49 = vld [vmem:[%s4088_s1 + $0x208] sm:$0xff]  }
  0x81   : > { %3187 = vmatprep.subr.bf16.mxu0 %v3384_v36  ;;  %v2019_v41 = vrot.slane %v2017_v54, 5  ;;  %v3409_v54 = vld [vmem:[#allocation2 + $0x18] ss:$8 sps:$4 sm:$0xff]   ;;  %v3412_v56 = vld [vmem:[#allocation2 + $0x28] ss:$8 sps:$4 sm:$0xff]  }
  0x82   : > { %v2016_v26 = vrot.slane %v2014_v34, 4 }
  0x83   : > { %3094 = vmatpush3.bf16.msra.mxu1 %v3386_v4  ;;  %v3399_v4 = vld [vmem:[%s4088_s1 + $0x1e0] sm:$0xff]  }
  0x84   : > { %3188 = vmatpush3.bf16.msra.mxu0 %v3384_v36  ;;  %3103 = vmatprep.subr.bf16.mxu1 %v3388_v27  ;;  %v3976_v36 = vld [vmem:[#allocation2 + $0x2c] sm:$0x1]  ;;  %v2020_v51 = vor.u32 %v2019_v41, %v2016_v26 }
  0x85   : > { %3189 = vmatprep.subr.bf16.mxu0 %v3387_v47 }
  0x86   : > { %3096 = vmatmul.mubr.bf16.vlgmr.msra.gmra.mrb[0].mxu1 %v2700_v44  ;;  %v1997_v44 = vrot.slane %v1995_v16, 5  ;;  %v2007_v16 = vrot.slane %v2006_v50, 4  ;;  %v2237_v50 = vld [vmem:[#allocation2 + $0x10] sm:$0xe] }
  0x87   : > { %3104 = vmatpush3.bf16.msra.mxu1 %v3388_v27  ;;  %3099 = vmatprep.mubr.bf16.mxu1 %v2701_v43  ;;  %v3401_v27 = vld [vmem:[%s4088_s1 + $0x1e8] sm:$0xff]  }
  0x88   : > { %3190 = vmatpush3.bf16.msra.mxu0 %v3387_v47  ;;  %3105 = vmatprep.subr.bf16.mxu1 %v3392_v1  ;;  %v1998_v33 = vsel %vm3607_vm8, %v1993_v57, %v1997_v44  ;;  %v2023_v47 = vshll.u32 %v3976_v36, 16  ;;  %v4006_v57 = vld [vmem:[#allocation2 + $0x4c] sm:$0x1]  ;;  %v2058_v44 = vrot.slane %v2056_v29, 4 }
  0x89   : > { %3199 = vmatprep.subr.bf16.mxu0 %v3390_v48  ;;  %v2847_v22 = vcombine.low %v1984_v12, %v1998_v33  ;;  %v2079_v34 = vshll.u32 %v4006_v57, 16 }
  0x8a   : > { %v2025_v43 = vrot.slane %v2023_v47, 5  ;;  %v2283_v47 = vrot.slane %v3994_v52, 5 }
  0x8b   : > { %3192 = vmatmul.mubr.bf16.vlgmr.msra.gmra.mrb[0].mxu0 %v3391_v2  ;;  %3106 = vmatpush3.bf16.msra.mxu1 %v3392_v1  ;;  %v2011_v1 = vrot.slane %v2009_v46, 5  ;;  %v2070_v2 = vshrl.u32 %v1969_v53, 16  ;;  %v2081_v45 = vrot.slane %v2079_v34, 5  ;;  %v3414_v53 = vld [vmem:[%s4088_s1 + $0x210] sm:$0xff]  }
  0x8c   : > { %3200 = vmatpush3.bf16.msra.mxu0 %v3390_v48  ;;  %3107 = vmatprep.subr.bf16.mxu1 %v3394_v55  ;;  %v2047_v48 = vrot.slane %v2045_v6, 5  ;;  %v2279_v6 = vrot.slane %v3992_v39, 5 }
  0x8d   : > { %3201 = vmatprep.subr.bf16.mxu0 %v3393_v28  ;;  %3195 = vmatprep.mubr.bf16.mxu0 %v3402_v21  ;;  %v2051_v21 = vshll.u32 %v3994_v52, 16  ;;  %v2072_v25 = vrot.slane %v2070_v2, 4  ;;  %v3413_v52 = vld [vmem:[#allocation2 + $0x38] ss:$8 sps:$4 sm:$0xff]  }
  0x8e   : > { %3100 = vmatmul.mubr.bf16.gmra.mrb[4].mxu1 %v2702_v13  ;;  %v2034_v13 = vor.u32 %v2033_v61, %v2030_v20  ;;  %v2048_v14 = vor.u32 %v2047_v48, %v2044_v60  ;;  %v2263_v20 = vrot.slane %v3933_v59, 5  ;;  %v2859_v61 = vrot.slane %v2237_v50, 9 }
  0x8f   : > { %3108 = vmatpush3.bf16.msra.mxu1 %v3394_v55  ;;  %3119 = vmatprep.mubr.bf16.mxu1 %v3408_v30  ;;  %v2037_v55 = vshll.u32 %v3992_v39, 16  ;;  %v2012_v30 = vsel %vm3607_vm8, %v2007_v16, %v2011_v1  ;;  %v2053_v12 = vrot.slane %v2051_v21, 5  ;;  %v2267_v39 = vrot.slane %v3935_v63, 5  ;;  %v3415_v63 = vld [vmem:[%s4088_s1 + $0x218] sm:$0xff]   ;;  %v3418_v16 = vld [vmem:[%s4088_s1 + $0x230] sm:$0xff]  }
  0x90   : > { %3202 = vmatpush3.bf16.msra.mxu0 %v3393_v28  ;;  %3109 = vmatprep.subr.bf16.mxu1 %v3396_v5  ;;  %v2021_v28 = vrot.slane %v2020_v51, 4  ;;  %v2035_v33 = vrot.slane %v2034_v13, 4  ;;  %v2049_v32 = vrot.slane %v2048_v14, 4  ;;  %v2238_v51 = vld [vmem:[#allocation2 + $0x18] sm:$0xe]  ;;  %v2280_v48 = vsel %vm3806_vm11, %v2863_v38, %v2279_v6 }
  0x91   : > { %3203 = vmatprep.subr.bf16.mxu0 %v3395_v18  ;;  %v2860_v60 = vrot.slane %v2238_v51, 9  ;;  %v2264_v2 = vsel %vm3806_vm11, %v2859_v61, %v2263_v20  ;;  %v2287_v21 = vrot.slane %v4004_v9, 5  ;;  %v2291_v13 = vrot.slane %v4006_v57, 5  ;;  %v2239_v14 = vld [vmem:[#allocation2 + $0x20] sm:$0xe] }
  0x92   : > { %v2026_v19 = vsel %vm3607_vm8, %v2021_v28, %v2025_v43  ;;  %v2054_v41 = vsel %vm3607_vm8, %v2049_v32, %v2053_v12  ;;  %v2243_v28 = vld [vmem:[#allocation2 + $0x40] sm:$0xe]  ;;  %v2275_v57 = vrot.slane %v3976_v36, 5 }
  0x93   : > { %3196 = vmatmul.mubr.bf16.gmra.mrb[4].mxu0 %v3404_v8  ;;  %3110 = vmatpush3.bf16.msra.mxu1 %v3396_v5  ;;  %v2075_v5 = vrot.slane %v2073_v7, 5  ;;  %v3407_v8 = vld [vmem:[%s4088_s1 + $0x1f8] sm:$0xff]   ;;  %v2268_v7 = vsel %vm3806_vm11, %v2860_v60, %v2267_v39 }
  0x94   : > { %3204 = vmatpush3.bf16.msra.mxu0 %v3395_v18  ;;  %3111 = vmatprep.subr.bf16.mxu1 %v3398_v11  ;;  %v2061_v18 = vrot.slane %v2059_v35, 5 }
  0x95   : > { %3205 = vmatprep.subr.bf16.mxu0 %v3397_v17  ;;  %3215 = vmatprep.mubr.bf16.mxu0 %v2847_v22  ;;  %v2076_v15 = vor.u32 %v2075_v5, %v2072_v25  ;;  %v3419_v25 = vld [vmem:[%s4088_s1 + $0x238] sm:$0xff]   ;;  %v2240_v5 = vld [vmem:[#allocation2 + $0x28] sm:$0xe] }
  0x96   : > { %v2062_v22 = vor.u32 %v2061_v18, %v2058_v44  ;;  %v2865_v44 = vrot.slane %v2243_v28, 9  ;;  %v2862_v9 = vrot.slane %v2240_v5, 9 }
  0x97   : > { %3112 = vmatpush3.bf16.msra.mxu1 %v3398_v11  ;;  %v2039_v11 = vrot.slane %v2037_v55, 5  ;;  %v2244_v55 = vld [vmem:[#allocation2 + $0x48] sm:$0xe] }
  0x98   : > { %3206 = vmatpush3.bf16.msra.mxu0 %v3397_v17  ;;  %3113 = vmatprep.subr.bf16.mxu1 %v3400_v62  ;;  %v3410_v17 = vld [vmem:[%s4088_s1 + $0x200] sm:$0xff]   ;;  %v2866_v18 = vrot.slane %v2244_v55, 9 }
  0x99   : > { %3207 = vmatprep.subr.bf16.mxu0 %v3399_v4  ;;  %v2040_v26 = vsel %vm3607_vm8, %v2035_v33, %v2039_v11 }
  0x9a   : > { %v2849_v40 = vcombine.low %v2040_v26, %v2054_v41 }
  0x9b   : > { %3114 = vmatpush3.bf16.msra.mxu1 %v3400_v62  ;;  %v2848_v62 = vcombine.low %v2012_v30, %v2026_v19  ;;  %v2271_v30 = vrot.slane %v3974_v23, 5  ;;  %v2288_v19 = vsel %vm3806_vm11, %v2865_v44, %v2287_v21  ;;  %v2276_v23 = vsel %vm3806_vm11, %v2862_v9, %v2275_v57 }
  0x9c   : > { %3208 = vmatpush3.bf16.msra.mxu0 %v3399_v4  ;;  %3115 = vmatprep.subr.bf16.mxu1 %v3403_v24  ;;  %v2242_v4 = vld [vmem:[#allocation2 + $0x38] sm:$0xe] }
  0x9d   : > { %3209 = vmatprep.subr.bf16.mxu0 %v3401_v27  ;;  %v2864_v46 = vrot.slane %v2242_v4, 9 }
  0x9f   : > { %3116 = vmatpush3.bf16.msra.mxu1 %v3403_v24  ;;  %v2077_v24 = vrot.slane %v2076_v15, 4  ;;  %v2284_v1 = vsel %vm3806_vm11, %v2864_v46, %v2283_v47  ;;  %v2895_v46 = vld [vmem:[%s4089_s2] ss:$0 sm:$0xff] }
  0xa0   : > { %3210 = vmatpush3.bf16.msra.mxu0 %v3401_v27  ;;  %3117 = vmatprep.subr.bf16.mxu1 %v3406_v37  ;;  %v2063_v27 = vrot.slane %v2062_v22, 4  ;;  %v2885_v29 = vcombine.low %v2280_v48, %v2284_v1 }
  0xa1   : > { %3211 = vmatprep.subr.bf16.mxu0 %v3405_v3  ;;  %v2082_v59 = vsel %vm3607_vm8, %v2077_v24, %v2081_v45 }
  0xa2   : > { %v2068_v43 = vsel %vm3607_vm8, %v2063_v27, %v2067_v42 }
  0xa3   : > { %3118 = vmatpush3.bf16.msra.mxu1 %v3406_v37  ;;  %v2850_v35 = vcombine.low %v2068_v43, %v2082_v59  ;;  %v3417_v37 = vld [vmem:[%s4088_s1 + $0x228] sm:$0xff]  }
  0xa4   : > { %3212 = vmatpush3.bf16.msra.mxu0 %v3405_v3  ;;  %3247 = vmatprep.subr.bf16.mxu1 %v3410_v17  ;;  %v2883_v3 = vcombine.low %v2264_v2, %v2268_v7 }
  0xa5   : > { %3213 = vmatprep.subr.bf16.mxu0 %v3407_v8 }
  0xa6   : > { %3120 = vmatmul.mubr.bf16.vlgmr.msra.gmra.mrb[0].mxu1 %v3409_v54 }
  0xa7   : > { %3255 = vmatpush3.bf16.msra.mxu1 %v3410_v17  ;;  %3123 = vmatprep.mubr.bf16.mxu1 %v3412_v56 }
  0xa8   : > { %3214 = vmatpush3.bf16.msra.mxu0 %v3407_v8  ;;  %3248 = vmatprep.subr.bf16.mxu1 %v3411_v49  ;;  %v2861_v8 = vrot.slane %v2239_v14, 9 }
  0xa9   : > { %3223 = vmatprep.subr.bf16.mxu0 %v3410_v17 }
  0xaa   : > { %v2272_v12 = vsel %vm3806_vm11, %v2861_v8, %v2271_v30 }
  0xab   : > { %3216 = vmatmul.mubr.bf16.vlgmr.msra.gmra.mrb[0].mxu0 %v2848_v62  ;;  %3256 = vmatpush3.bf16.msra.mxu1 %v3411_v49  ;;  %v2884_v33 = vcombine.low %v2272_v12, %v2276_v23 }
  0xac   : > { %3224 = vmatpush3.bf16.msra.mxu0 %v3410_v17  ;;  %3219 = vmatprep.mubr.bf16.mxu0 %v2849_v40  ;;  %v2292_v17 = vsel %vm3806_vm11, %v2866_v18, %v2291_v13 }
  0xad   : > { %3225 = vmatprep.subr.bf16.mxu0 %v3411_v49  ;;  %3249 = vmatprep.subr.bf16.mxu1 %v3414_v53  ;;  %v2886_v11 = vcombine.low %v2288_v19, %v2292_v17 }
  0xae   : > { %3124 = vmatmul.mubr.bf16.gmra.mrb[4].mxu1 %v3413_v52 }
  0xaf   : > { %3257 = vmatpush3.bf16.msra.mxu1 %v3414_v53  ;;  %3243 = vmatprep.mubr.bf16.mxu1 %v2885_v29 }
  0xb0   : > { %3226 = vmatpush3.bf16.msra.mxu0 %v3411_v49  ;;  %3250 = vmatprep.subr.bf16.mxu1 %v3415_v63 }
  0xb1   : > { %3227 = vmatprep.subr.bf16.mxu0 %v3414_v53 }
  0xb3   : > { %3220 = vmatmul.mubr.bf16.gmra.mrb[4].mxu0 %v2850_v35  ;;  %3258 = vmatpush3.bf16.msra.mxu1 %v3415_v63 }
  0xb4   : > { %3228 = vmatpush3.bf16.msra.mxu0 %v3414_v53  ;;  %3251 = vmatprep.subr.bf16.mxu1 %v3416_v31 }
  0xb5   : > { %3229 = vmatprep.subr.bf16.mxu0 %v3415_v63  ;;  %3239 = vmatprep.mubr.bf16.mxu0 %v2883_v3 }
  0xb7   : > { %3259 = vmatpush3.bf16.msra.mxu1 %v3416_v31 }
  0xb8   : > { %3230 = vmatpush3.bf16.msra.mxu0 %v3415_v63  ;;  %3252 = vmatprep.subr.bf16.mxu1 %v3417_v37 }
  0xb9   : > { %3231 = vmatprep.subr.bf16.mxu0 %v3416_v31 }
  0xbb   : > { %3260 = vmatpush3.bf16.msra.mxu1 %v3417_v37 }
  0xbc   : > { %3232 = vmatpush3.bf16.msra.mxu0 %v3416_v31  ;;  %3253 = vmatprep.subr.bf16.mxu1 %v3418_v16 }
  0xbd   : > { %3233 = vmatprep.subr.bf16.mxu0 %v3417_v37 }
  0xbf   : > { %3261 = vmatpush3.bf16.msra.mxu1 %v3418_v16 }
  0xc0   : > { %3234 = vmatpush3.bf16.msra.mxu0 %v3417_v37  ;;  %3254 = vmatprep.subr.bf16.mxu1 %v3419_v25 }
  0xc1   : > { %3235 = vmatprep.subr.bf16.mxu0 %v3418_v16 }
  0xc3   : > { %3262 = vmatpush3.bf16.msra.mxu1 %v3419_v25 }
  0xc4   : > { %3236 = vmatpush3.bf16.msra.mxu0 %v3418_v16 }
  0xc5   : > { %3237 = vmatprep.subr.bf16.mxu0 %v3419_v25 }
  0xc6   : > { %3244 = vmatmul.mubr.bf16.vlgmr.msra.gmra.mrb[8].mxu1 %v2886_v11 }
  0xc8   : > { %3238 = vmatpush3.bf16.msra.mxu0 %v3419_v25 }
  0xcb   : > { %3240 = vmatmul.mubr.bf16.vlgmr.msra.gmra.mrb[0].mxu0 %v2884_v33 }
 0x179   : > { %v3121_v36 = vpop.f32.mrb[0].mxu1 }
 0x17a   : > { %v1253_v32 = vpop.f32.mrb[1].mxu1 }
 0x17b   : > { %v3122_v0 = vpop.f32.mrb[2].mxu1 }
 0x17c   : > { %v1256_v34 = vpop.f32.mrb[3].mxu1 }
 0x181   : > { %v3125_v54 = vpop.f32.mrb[4].mxu1 }
 0x182   : > { %v1269_v22 = vpop.f32.mrb[5].mxu1 }
 0x183   : > { %v3126_v15 = vpop.f32.mrb[6].mxu1 }
 0x184   : > { %v1272_v58 = vpop.f32.mrb[7].mxu1 }
 0x186   : > { %v3221_v4 = vpop.f32.mrb[4].mxu0 }
 0x187   : > { %v3267_v62 = vadd.f32 %v3221_v4, %v3125_v54  ;;  %v2214_v49 = vpop.f32.mrb[5].mxu0 }
 0x188   : > { %v3269_v56 = vadd.f32 %v2214_v49, %v1269_v22  ;;  %v3222_v10 = vpop.f32.mrb[6].mxu0 }
 0x189   : > { %v3271_v26 = vadd.f32 %v3222_v10, %v3126_v15  ;;  %v2217_v41 = vpop.f32.mrb[7].mxu0 }
 0x18a   : > { %v3273_v42 = vadd.f32 %v2217_v41, %v1272_v58 }
 0x199   : > { %v3245_v45 = vpop.f32.mrb[8].mxu1 }
 0x19a   : > { %v3268_v38 = vadd.f32 %v3267_v62, %v3245_v45  ;;  %v2424_v6 = vpop.f32.mrb[9].mxu1 }
 0x19b   : > { %v3270_v47 = vadd.f32 %v3269_v56, %v2424_v6  ;;  %v3246_v27 = vpop.f32.mrb[10].mxu1 }
 0x19c   : > { %v3272_v24 = vadd.f32 %v3271_v26, %v3246_v27  ;;  %v2427_v50 = vpop.f32.mrb[11].mxu1  ;;  %v2459_v20 = vadd.f32 %v3268_v38, %v2895_v46 }
 0x19d   : > { %v3274_v40 = vadd.f32 %v3273_v42, %v2427_v50  ;;  %v2457_v60 = vadd.f32 %v3270_v47, %v2895_v46 }
 0x19e   : > { %v3241_v51 = vpop.f32.mrb[0].mxu0  ;;  %v2460_v52 = vadd.f32 %v3272_v24, %v2895_v46  ;;  %v2481_v11 = vmul.f32 %v2459_v20, %v2459_v20 }
 0x19f   : > { %v3263_v53 = vadd.f32 %v3241_v51, %v3121_v36  ;;  %v2408_v39 = vpop.f32.mrb[1].mxu0  ;;  %v2458_v1 = vadd.f32 %v3274_v40, %v2895_v46  ;;  %v2479_v8 = vmul.f32 %v2457_v60, %v2457_v60 }
 0x1a0   : > { %v3264_v61 = vadd.f32 %v2408_v39, %v1253_v32  ;;  %v3242_v48 = vpop.f32.mrb[2].mxu0  ;;  %v2918_v59 = vpack.c.bf16 %v2460_v52, %v2459_v20  ;;  %v2482_v33 = vmul.f32 %v2460_v52, %v2460_v52 }
 0x1a1   : > { %v3265_v43 = vadd.f32 %v3242_v48, %v3122_v0  ;;  %v2411_v63 = vpop.f32.mrb[3].mxu0  ;;  %v2913_v2 = vpack.c.bf16 %v2458_v1, %v2457_v60  ;;  %v2455_v7 = vadd.f32 %v3263_v53, %v2895_v46  ;;  %v2480_v19 = vmul.f32 %v2458_v1, %v2458_v1 }
 0x1a2   : > { %v2453_v29 = vadd.f32 %v3264_v61, %v2895_v46  ;;  %v3266_v35 = vadd.f32 %v2411_v63, %v1256_v34  ;;  %2922 = vst [vmem:[%s258_s7 + $0x18] sm:$0xff] %v2918_v59  }
 0x1a3   : > { %v2456_v31 = vadd.f32 %v3265_v43, %v2895_v46  ;;  %2921 = vst [vmem:[%s258_s7 + $0x10] sm:$0xff] %v2913_v2   ;;  %v2477_v13 = vmul.f32 %v2455_v7, %v2455_v7 }
 0x1a4   : > { %v2454_v3 = vadd.f32 %v3266_v35, %v2895_v46  ;;  %v2475_v16 = vmul.f32 %v2453_v29, %v2453_v29 }
 0x1a5   : > { %v2908_v37 = vpack.c.bf16 %v2456_v31, %v2455_v7  ;;  %v2478_v18 = vmul.f32 %v2456_v31, %v2456_v31 }
 0x1a6   : > { %v2461_v28 = vadd.f32 %v2454_v3, %v2453_v29  ;;  %v2476_v55 = vmul.f32 %v2454_v3, %v2454_v3  ;;  %v2903_v21 = vpack.c.bf16 %v2454_v3, %v2453_v29 }
 0x1a7   : > { %2920 = vst [vmem:[%s258_s7 + $0x8] sm:$0xff] %v2908_v37  }
 0x1a8   : > { %v2462_v14 = vadd.f32 %v2461_v28, %v2455_v7  ;;  %v2483_v44 = vadd.f32 %v2476_v55, %v2475_v16  ;;  %2904 = vst [vmem:[%s258_s7] sm:$0xff] %v2903_v21  }
 0x1aa   : > { %v2484_v25 = vadd.f32 %v2483_v44, %v2477_v13  ;;  %v2463_v5 = vadd.f32 %v2462_v14, %v2456_v31 }
 0x1ac   : > { %v2464_v30 = vadd.f32 %v2463_v5, %v2457_v60  ;;  %v2485_v9 = vadd.f32 %v2484_v25, %v2478_v18 }
 0x1ae   : > { %v2465_v57 = vadd.f32 %v2464_v30, %v2458_v1  ;;  %v2486_v17 = vadd.f32 %v2485_v9, %v2479_v8 }
 0x1b0   : > { %v2466_v12 = vadd.f32 %v2465_v57, %v2459_v20  ;;  %v2487_v23 = vadd.f32 %v2486_v17, %v2480_v19 }
 0x1b2   : > { %v2467_v36 = vadd.f32 %v2466_v12, %v2460_v52  ;;  %v2488_v32 = vadd.f32 %v2487_v23, %v2481_v11 }
 0x1b4   : > { %v2468_v0 = vrot.slane %v2467_v36, 4  ;;  %v2489_v34 = vadd.f32 %v2488_v32, %v2482_v33 }
 0x1b6   : > { %v2469_v54 = vadd.f32 %v2468_v0, %v2467_v36  ;;  %v2490_v22 = vrot.slane %v2489_v34, 4 }
 0x1b8   : > { %v2470_v15 = vrot.slane %v2469_v54, 2  ;;  %v2491_v58 = vadd.f32 %v2490_v22, %v2489_v34 }
 0x1ba   : > { %v2471_v4 = vadd.f32 %v2470_v15, %v2469_v54  ;;  %v2492_v62 = vrot.slane %v2491_v58, 2 }
 0x1bc   : > { %v2472_v49 = vrot.slane %v2471_v4, 1  ;;  %v2493_v56 = vadd.f32 %v2492_v62, %v2491_v58 }
 0x1be   : > { %v2473_v10 = vadd.f32 %v2472_v49, %v2471_v4  ;;  %v2494_v26 = vrot.slane %v2493_v56, 1 }
 0x1c0   : > { %v2495_v41 = vadd.f32 %v2494_v26, %v2493_v56  ;;  %2513 = vst [vmem:[%s262_s11] sm:$0x1] %v2473_v10 }
 0x1c2   : > { %2514 = vst [vmem:[%s262_s11 + $0x1] sm:$0x1] %v2495_v41 }
 0x1c3 PF: > { %s17_s21 = sadd.s32 1, %s3426_s21  }
 0x1c4   : > { %p14_p4 = scmp.ge.s32.totalorder %s17_s21, 4  }
 0x1c6   :  { %16 = sbr.rel (!%p14_p4) target bundleno = 1 (0x1), region = 95 }

</bundles_post_ra>
